<compile_context>
chip_gen: v7x
topology: tpu7x:2x2x1
jax: 0.10.0
libtpu: 0.0.40
codegen_flags: <defaults>
</compile_context>

<pallas_src>
import functools

import jax
import jax.numpy as jnp
from jax.experimental import pallas as pl
from jax.experimental.pallas import tpu as pltpu


# ------------------------ fused Grapher_conv branch ------------------------

def _grapher_branch_kernel(x_ref, xt_ref, wcat_ref, eb_ref, f2w_ref, f2b_ref,
                           o_ref, *, k):
    # x : (1, Cin, N) channel-major   xt : (1, N, Cin) node-major (same data)
    x = x_ref[0]                                      # (Cin, N)
    xt = xt_ref[0]                                    # (N, Cin)
    c2 = eb_ref.shape[0]                              # 2 * Cin
    n = x.shape[1]

    # --- DenseDilatedKnnGraph: F.normalize(dim=1) + k-NN on pairwise dist ---
    s_row = jnp.sum(x * x, axis=0, keepdims=True)                    # (1, N)
    inv_row = 1.0 / jnp.maximum(jnp.sqrt(s_row), 1e-12)
    sqn = s_row * inv_row * inv_row                                  # |xn_j|^2 (row)
    s_col = jnp.sum(xt * xt, axis=1, keepdims=True)                  # (N, 1)
    xnt = xt * (1.0 / jnp.maximum(jnp.sqrt(s_col), 1e-12))           # normalized nodes
    gram = jax.lax.dot_general(xnt, xnt, (((1,), (1,)), ((), ())),
                               preferred_element_type=jnp.float32)   # (N, N)
    # score[i, j] = 2 xn_i.xn_j - |xn_j|^2 ; the per-row -|xn_i|^2 term of the
    # true negative distance is constant per row and cannot change the
    # row-wise top-k ordering, so it is dropped.
    score = 2.0 * gram - sqn

    # --- EdgeConv 1x1 conv: one MXU pass on stacked [(W1 - W2); W2] ---
    z = jnp.dot(wcat_ref[...].astype(jnp.bfloat16), x.astype(jnp.bfloat16),
                preferred_element_type=jnp.float32)                  # (4Cin, N)
    base = z[:c2] + eb_ref[...]                       # center term + bias
    a2 = z[c2:]                                       # neighbor term (W2 @ x)

    # --- in-VMEM iterative top-k (k neighbors, self included) + gather ---
    # Gather is a one-hot MXU matmul; ReLU + running max never leave VMEM.
    colf = jax.lax.broadcasted_iota(jnp.int32, (n, n), 1).astype(jnp.float32)
    acc = jnp.zeros((c2, n), jnp.float32)             # ReLU output is >= 0
    d = score
    for _ in range(k):                                # static unroll (k = 9)
        m = jnp.max(d, axis=1, keepdims=True)                         # (N, 1)
        # smallest column index achieving the row max (deterministic ties)
        idx = jnp.min(jnp.where(d >= m, colf, float(n)), axis=1, keepdims=True)
        sel = (colf == idx).astype(jnp.float32)                       # (N_i, N_j)
        gathered = jax.lax.dot_general(a2, sel, (((1,), (1,)), ((), ())),
                                       preferred_element_type=jnp.float32)
        acc = jnp.maximum(acc, jnp.maximum(base + gathered, 0.0))
        d = jnp.where(sel > 0.0, jnp.float32(-1e30), d)               # mask picked

    # --- Grapher_conv.fc2: 1x1 conv + folded BatchNorm ---
    out = jnp.dot(f2w_ref[...].astype(jnp.bfloat16), acc.astype(jnp.bfloat16),
                  preferred_element_type=jnp.float32) + f2b_ref[...]
    o_ref[0] = out


def grapher_conv_fused(x_bcn, params, k=9):
    """One Grapher_conv (conv='edge', r=1, act='relu', norm=None) branch,
    fully fused into a single per-batch Pallas kernel."""
    B, Cin, N = x_bcn.shape
    c2 = 2 * Cin
    Wm = params["econv_w"]                            # (2Cin, 2Cin) over [x_i; x_j - x_i]
    W1, W2 = Wm[:, :Cin], Wm[:, Cin:]
    wcat = jnp.concatenate([W1 - W2, W2], axis=0).astype(jnp.float32)  # (4Cin, Cin)
    eb = params["econv_b"].reshape(c2, 1).astype(jnp.float32)
    f2w = params["fc2_w"].astype(jnp.float32)
    f2b = params["fc2_b"].reshape(Cin, 1).astype(jnp.float32)
    xf = x_bcn.astype(jnp.float32)
    xt = jnp.transpose(xf, (0, 2, 1))                 # node-major copy (tiny)

    return pl.pallas_call(
        functools.partial(_grapher_branch_kernel, k=k),
        out_shape=jax.ShapeDtypeStruct((B, Cin, N), jnp.float32),
        grid=(B,),
        in_specs=[
            pl.BlockSpec((1, Cin, N), lambda b: (b, 0, 0)),
            pl.BlockSpec((1, N, Cin), lambda b: (b, 0, 0)),
            pl.BlockSpec((4 * Cin, Cin), lambda b: (0, 0)),
            pl.BlockSpec((c2, 1), lambda b: (0, 0)),
            pl.BlockSpec((Cin, c2), lambda b: (0, 0)),
            pl.BlockSpec((Cin, 1), lambda b: (0, 0)),
        ],
        out_specs=pl.BlockSpec((1, Cin, N), lambda b: (b, 0, 0)),
        compiler_params=pltpu.CompilerParams(dimension_semantics=("parallel",)),
    )(xf, xt, wcat, eb, f2w, f2b)


# ---------------------- lane-dense 1x1-conv style kernels -------------------

def _mm_bias_kernel(w_ref, b_ref, x_ref, o_ref):
    # w: (Cout, Cin)  b: (Cout, 1)  x: (Cin, L)  o: (Cout, L);  L = B*N (lane-dense)
    z = jnp.dot(w_ref[...].astype(jnp.bfloat16), x_ref[...].astype(jnp.bfloat16),
                preferred_element_type=jnp.float32)
    o_ref[...] = z + b_ref[...]


def conv1x1_lanes(w, b, x2):
    cout = w.shape[0]
    return pl.pallas_call(
        _mm_bias_kernel,
        out_shape=jax.ShapeDtypeStruct((cout, x2.shape[1]), jnp.float32),
    )(w.astype(jnp.float32), b.reshape(cout, 1).astype(jnp.float32),
      x2.astype(jnp.float32))


def _combine_fc2_res_kernel(a_ref, xh_ref, xw_ref, xc_ref, res_ref,
                            w_ref, b_ref, o_ref):
    # a: (3, C, L)  xh/xw/xc/res: (C, L)  w: (C, C)  b: (C, 1)  o: (C, L)
    comb = (xh_ref[...] * a_ref[0] + xw_ref[...] * a_ref[1]
            + xc_ref[...] * a_ref[2])
    z = jnp.dot(w_ref[...].astype(jnp.bfloat16), comb.astype(jnp.bfloat16),
                preferred_element_type=jnp.float32)
    o_ref[...] = z + b_ref[...] + res_ref[...]


def combine_fc2_residual(a_full, xh2, xw2, xc2, res2, w, b):
    C, L = xh2.shape
    return pl.pallas_call(
        _combine_fc2_res_kernel,
        out_shape=jax.ShapeDtypeStruct((C, L), jnp.float32),
    )(a_full, xh2, xw2, xc2, res2, w.astype(jnp.float32),
      b.reshape(C, 1).astype(jnp.float32))


# ----------------------------- parameter init ------------------------------

def _fold_bn(w, b, gamma, beta, mean, var, eps=1e-5):
    scale = gamma / jnp.sqrt(var + eps)
    return w * scale[:, None], (b - mean) * scale + beta


def _conv_init(key, cout, cin, scale=0.1):
    kw, kb = jax.random.split(key)
    w = scale * jax.random.normal(kw, (cout, cin), jnp.float32)
    b = scale * jax.random.normal(kb, (cout,), jnp.float32)
    return w, b


def _default_bn(c):
    return jnp.ones((c,)), jnp.zeros((c,)), jnp.zeros((c,)), jnp.ones((c,))


def init_grapher_conv(key, cin):
    """Params of one Grapher_conv(in_channels=cin, conv='edge', r=1)."""
    cout = 2 * cin
    k1, k2 = jax.random.split(key)
    ew, ebias = _conv_init(k1, cout, 2 * cin)   # EdgeConv BasicConv([2*cin, 2*cin])
    fw, fb = _conv_init(k2, cin, cout)          # fc2: Conv2d(2*cin, cin, 1)
    fw, fb = _fold_bn(fw, fb, *_default_bn(cin))  # + BatchNorm2d(cin) (eval, folded)
    return dict(econv_w=ew, econv_b=ebias, fc2_w=fw, fc2_b=fb)


def init_grapher_3d_2(key, C, H, W):
    assert C % 2 == 0 and C % 4 == 0
    ks = jax.random.split(key, 7)
    fc1_w, fc1_b = _conv_init(ks[0], C, C)
    fc1_w, fc1_b = _fold_bn(fc1_w, fc1_b, *_default_bn(C))
    fc2_w, fc2_b = _conv_init(ks[1], C, C)
    fc2_w, fc2_b = _fold_bn(fc2_w, fc2_b, *_default_bn(C))
    rw1_w, rw1_b = _conv_init(ks[2], C // 4, C)       # Mlp.fc1
    rw2_w, rw2_b = _conv_init(ks[3], 3 * C, C // 4)   # Mlp.fc2
    return dict(
        fc1_w=fc1_w, fc1_b=fc1_b, fc2_w=fc2_w, fc2_b=fc2_b,
        rw1_w=rw1_w, rw1_b=rw1_b, rw2_w=rw2_w, rw2_b=rw2_b,
        gc_c=init_grapher_conv(ks[4], C),
        gc_h=init_grapher_conv(ks[5], H * 2),
        gc_w=init_grapher_conv(ks[6], W * 2),
    )


# ------------------------------- forward ----------------------------------

def grapher_3d_2_forward(x, params, k=9):
    B, C, H, W = x.shape
    N = H * W

    def to_lanes(t):  # (B, C, N) -> (C, B*N), lane-dense
        return jnp.transpose(t, (1, 0, 2)).reshape(t.shape[1], B * N)

    # --- fc1: Conv2d(C, C, 1) + folded BN, batch folded into lanes ---
    x2 = to_lanes(x.reshape(B, C, N))
    y2 = conv1x1_lanes(params["fc1_w"], params["fc1_b"], x2)         # (C, B*N)
    y = jnp.transpose(y2.reshape(C, B, N), (1, 0, 2))                # (B, C, N)
    y_img = y.reshape(B, C, H, W)

    # --- channel branch ---
    x_c = grapher_conv_fused(y, params["gc_c"], k)                   # (B, C, N)

    # --- H branch: (B,C,H,W) -> (B, 2H, (C//2)*W), channels = 2H ---
    xh_in = jnp.transpose(y_img.reshape(B, C // 2, 2 * H, W), (0, 2, 1, 3))
    xh = grapher_conv_fused(xh_in.reshape(B, 2 * H, (C // 2) * W),
                            params["gc_h"], k)
    xh = jnp.transpose(xh.reshape(B, 2 * H, C // 2, W),
                       (0, 2, 1, 3)).reshape(B, C, N)

    # --- W branch: (B,C,H,W) -> (B, 2W, H*(C//2)), channels = 2W ---
    xw_in = jnp.transpose(y_img.reshape(B, C // 2, H, 2 * W), (0, 3, 2, 1))
    xw = grapher_conv_fused(xw_in.reshape(B, 2 * W, H * (C // 2)),
                            params["gc_w"], k)
    xw = jnp.transpose(xw.reshape(B, 2 * W, H, C // 2),
                       (0, 3, 2, 1)).reshape(B, C, N)

    # --- reweight Mlp (C -> C/4 -> 3C, exact GELU, softmax): tiny -> plain XLA ---
    s_mean = jnp.mean(xh + xw + x_c, axis=-1)                        # (B, C)
    h = jax.nn.gelu(s_mean @ params["rw1_w"].T + params["rw1_b"],
                    approximate=False)
    a3 = (h @ params["rw2_w"].T + params["rw2_b"]).reshape(B, C, 3)
    a3 = jax.nn.softmax(a3, axis=-1)                                 # over 3 branches
    a_full = jnp.repeat(jnp.transpose(a3, (2, 1, 0)), N, axis=2)     # (3, C, B*N)

    # --- weighted combine + fc2 (folded BN) + residual, fused, lane-dense ---
    out2 = combine_fc2_residual(a_full, to_lanes(xh), to_lanes(xw),
                                to_lanes(x_c), to_lanes(x.reshape(B, C, N)),
                                params["fc2_w"], params["fc2_b"])
    return jnp.transpose(out2.reshape(C, B, N), (1, 0, 2)).reshape(B, C, H, W)


# --------------------------------- main ------------------------------------

if __name__ == "__main__":
    B, C, H, W = 2, 16, 8, 8   # k=9 <= min(H*W, (C//2)*W, H*(C//2)) = 64
    key = jax.random.PRNGKey(0)
    kx, kp = jax.random.split(key)
    x = jax.random.normal(kx, (B, C, H, W), jnp.float32)
    params = init_grapher_3d_2(kp, C, H, W)

    fwd = jax.jit(functools.partial(grapher_3d_2_forward, k=9))
    out = fwd(x, params)
    jax.block_until_ready(out)
    assert out.shape == (B, C, H, W) and out.dtype == jnp.float32
    assert bool(jnp.all(jnp.isfinite(out)))
    print("KERNEL_OK")
</pallas_src>

<mosaic_0001>
module attributes {stable_mosaic.version = 11 : i64} {
  func.func @_mm_bias_kernel(%arg0: memref<16x16xf32, #tpu.memory_space<vmem>>, %arg1: memref<16x1xf32, #tpu.memory_space<vmem>>, %arg2: memref<16x128xf32, #tpu.memory_space<vmem>>, %arg3: memref<16x128xf32, #tpu.memory_space<vmem>>) attributes {dimension_semantics = [], scalar_prefetch = 0 : i64, scratch_operands = 0 : i64, tpu.core_type = #tpu.core_type<tc>} {
    %c0 = arith.constant 0 : index
    %c0_0 = arith.constant 0 : index
    %0 = vector.load %arg0[%c0, %c0_0] : memref<16x16xf32, #tpu.memory_space<vmem>>, vector<16x16xf32>
    %1 = arith.truncf %0 : vector<16x16xf32> to vector<16x16xbf16>
    %c0_1 = arith.constant 0 : index
    %c0_2 = arith.constant 0 : index
    %2 = vector.load %arg2[%c0_1, %c0_2] : memref<16x128xf32, #tpu.memory_space<vmem>>, vector<16x128xf32>
    %3 = arith.truncf %2 : vector<16x128xf32> to vector<16x128xbf16>
    %cst = arith.constant dense<0.000000e+00> : vector<16x128xf32>
    %4 = tpu.matmul %1, %3, %cst {dimension_numbers = #tpu.dot_dimension_numbers<[1], [0], [0], [1], [0, 0, 1, 1], [], []>} : vector<16x16xbf16>, vector<16x128xbf16>, vector<16x128xf32> -> vector<16x128xf32>
    %c0_3 = arith.constant 0 : index
    %c0_4 = arith.constant 0 : index
    %5 = vector.load %arg1[%c0_3, %c0_4] : memref<16x1xf32, #tpu.memory_space<vmem>>, vector<16x1xf32>
    %6 = vector.broadcast %5 : vector<16x1xf32> to vector<16x128xf32>
    %7 = arith.addf %4, %6 : vector<16x128xf32>
    %c0_5 = arith.constant 0 : index
    %c0_6 = arith.constant 0 : index
    %8 = vector.load %arg3[%c0_5, %c0_6] : memref<16x128xf32, #tpu.memory_space<vmem>>, vector<16x128xf32>
    tpu.vector_store %arg3[%c0_5, %c0_6], %7 {strides = array<i32>} : memref<16x128xf32, #tpu.memory_space<vmem>>, vector<16x128xf32>,
    return
  }
}

module attributes {stable_mosaic.version = 11 : i64} {
  func.func @_grapher_branch_kernel(%arg0: i32, %arg1: memref<1x16x64xf32, #tpu.memory_space<vmem>>, %arg2: memref<1x64x16xf32, #tpu.memory_space<vmem>>, %arg3: memref<64x16xf32, #tpu.memory_space<vmem>>, %arg4: memref<32x1xf32, #tpu.memory_space<vmem>>, %arg5: memref<16x32xf32, #tpu.memory_space<vmem>>, %arg6: memref<16x1xf32, #tpu.memory_space<vmem>>, %arg7: memref<1x16x64xf32, #tpu.memory_space<vmem>>) attributes {dimension_semantics = [#tpu.dimension_semantics<parallel>], iteration_bounds = array<i64: 2>, scalar_prefetch = 0 : i64, scratch_operands = 0 : i64, tpu.core_type = #tpu.core_type<tc>, window_params = [{transform_indices = @transform_0, window_bounds = array<i64: 1, 16, 64>}, {transform_indices = @transform_1, window_bounds = array<i64: 1, 64, 16>}, {pipeline_mode = #tpu.pipeline_mode<synchronous>, transform_indices = @transform_2, window_bounds = array<i64: 64, 16>}, {pipeline_mode = #tpu.pipeline_mode<synchronous>, transform_indices = @transform_3, window_bounds = array<i64: 32, 1>}, {pipeline_mode = #tpu.pipeline_mode<synchronous>, transform_indices = @transform_4, window_bounds = array<i64: 16, 32>}, {pipeline_mode = #tpu.pipeline_mode<synchronous>, transform_indices = @transform_5, window_bounds = array<i64: 16, 1>}, {transform_indices = @transform_6, window_bounds = array<i64: 1, 16, 64>}]} {
    %c0 = arith.constant 0 : index
    %c0_0 = arith.constant 0 : index
    %c0_1 = arith.constant 0 : index
    %0 = vector.load %arg1[%c0, %c0_0, %c0_1] : memref<1x16x64xf32, #tpu.memory_space<vmem>>, vector<1x16x64xf32>
    %1 = vector.shape_cast %0 : vector<1x16x64xf32> to vector<16x64xf32>
    %c0_2 = arith.constant 0 : index
    %c0_3 = arith.constant 0 : index
    %c0_4 = arith.constant 0 : index
    %2 = vector.load %arg2[%c0_2, %c0_3, %c0_4] : memref<1x64x16xf32, #tpu.memory_space<vmem>>, vector<1x64x16xf32>
    %3 = vector.shape_cast %2 : vector<1x64x16xf32> to vector<64x16xf32>
    %4 = arith.mulf %1, %1 : vector<16x64xf32>
    %cst = arith.constant dense<0.000000e+00> : vector<64xf32>
    %5 = vector.multi_reduction <add>, %4, %cst [0] : vector<16x64xf32> to vector<64xf32>
    %6 = vector.shape_cast %5 : vector<64xf32> to vector<1x64xf32>
    %7 = math.sqrt %6 : vector<1x64xf32>
    %cst_5 = arith.constant 9.99999996E-13 : f32
    %8 = vector.broadcast %cst_5 : f32 to vector<1x64xf32>
    %9 = arith.maximumf %7, %8 : vector<1x64xf32>
    %cst_6 = arith.constant 1.000000e+00 : f32
    %10 = vector.broadcast %cst_6 : f32 to vector<1x64xf32>
    %11 = arith.divf %10, %9 : vector<1x64xf32>
    %12 = arith.mulf %6, %11 : vector<1x64xf32>
    %13 = arith.mulf %12, %11 : vector<1x64xf32>
    %14 = arith.mulf %3, %3 : vector<64x16xf32>
    %cst_7 = arith.constant dense<0.000000e+00> : vector<64xf32>
    %15 = vector.multi_reduction <add>, %14, %cst_7 [1] : vector<64x16xf32> to vector<64xf32>
    %16 = vector.shape_cast %15 : vector<64xf32> to vector<64x1xf32>
    %17 = math.sqrt %16 : vector<64x1xf32>
    %cst_8 = arith.constant 9.99999996E-13 : f32
    %18 = vector.broadcast %cst_8 : f32 to vector<64x1xf32>
    %19 = arith.maximumf %17, %18 : vector<64x1xf32>
    %cst_9 = arith.constant 1.000000e+00 : f32
    %20 = vector.broadcast %cst_9 : f32 to vector<64x1xf32>
    %21 = arith.divf %20, %19 : vector<64x1xf32>
    %22 = vector.broadcast %21 : vector<64x1xf32> to vector<64x16xf32>
    %23 = arith.mulf %3, %22 : vector<64x16xf32>
    %cst_10 = arith.constant dense<0.000000e+00> : vector<64x64xf32>
    %24 = tpu.matmul %23, %23, %cst_10 {dimension_numbers = #tpu.dot_dimension_numbers<[1], [1], [0], [0], [0, 0, 1, 0], [], []>} : vector<64x16xf32>, vector<64x16xf32>, vector<64x64xf32> -> vector<64x64xf32>
    %cst_11 = arith.constant 2.000000e+00 : f32
    %25 = vector.broadcast %cst_11 : f32 to vector<64x64xf32>
    %26 = arith.mulf %25, %24 : vector<64x64xf32>
    %27 = vector.broadcast %13 : vector<1x64xf32> to vector<64x64xf32>
    %28 = arith.subf %26, %27 : vector<64x64xf32>
    %c0_12 = arith.constant 0 : index
    %c0_13 = arith.constant 0 : index
    %29 = vector.load %arg3[%c0_12, %c0_13] : memref<64x16xf32, #tpu.memory_space<vmem>>, vector<64x16xf32>
    %30 = arith.truncf %29 : vector<64x16xf32> to vector<64x16xbf16>
    %31 = arith.truncf %1 : vector<16x64xf32> to vector<16x64xbf16>
    %cst_14 = arith.constant dense<0.000000e+00> : vector<64x64xf32>
    %32 = tpu.matmul %30, %31, %cst_14 {dimension_numbers = #tpu.dot_dimension_numbers<[1], [0], [0], [1], [0, 0, 1, 1], [], []>} : vector<64x16xbf16>, vector<16x64xbf16>, vector<64x64xf32> -> vector<64x64xf32>
    %33 = vector.extract_strided_slice %32 {offsets = [0, 0], sizes = [32, 64], strides = [1, 1]} : vector<64x64xf32> to vector<32x64xf32>
    %c0_15 = arith.constant 0 : index
    %c0_16 = arith.constant 0 : index
    %34 = vector.load %arg4[%c0_15, %c0_16] : memref<32x1xf32, #tpu.memory_space<vmem>>, vector<32x1xf32>
    %35 = vector.broadcast %34 : vector<32x1xf32> to vector<32x64xf32>
    %36 = arith.addf %33, %35 : vector<32x64xf32>
    %37 = vector.extract_strided_slice %32 {offsets = [32, 0], sizes = [32, 64], strides = [1, 1]} : vector<64x64xf32> to vector<32x64xf32>
    %38 = tpu.iota {dimensions = array<i32: 1>} : vector<64x64xi32>
    %39 = arith.sitofp %38 : vector<64x64xi32> to vector<64x64xf32>
    %cst_17 = arith.constant 0.000000e+00 : f32
    %40 = vector.broadcast %cst_17 : f32 to vector<32x64xf32>
    %cst_18 = arith.constant dense<0xFF800000> : vector<64xf32>
    %41 = vector.multi_reduction <maximumf>, %28, %cst_18 [1] : vector<64x64xf32> to vector<64xf32>
    %42 = vector.shape_cast %41 : vector<64xf32> to vector<64x1xf32>
    %43 = vector.broadcast %42 : vector<64x1xf32> to vector<64x64xf32>
    %44 = arith.cmpf oge, %28, %43 : vector<64x64xf32>
    %cst_19 = arith.constant 6.400000e+01 : f32
    %45 = vector.broadcast %cst_19 : f32 to vector<64x64xf32>
    %46 = arith.select %44, %39, %45 : vector<64x64xi1>, vector<64x64xf32>
    %cst_20 = arith.constant dense<0x7F800000> : vector<64xf32>
    %47 = vector.multi_reduction <minimumf>, %46, %cst_20 [1] : vector<64x64xf32> to vector<64xf32>
    %48 = vector.shape_cast %47 : vector<64xf32> to vector<64x1xf32>
    %49 = vector.broadcast %48 : vector<64x1xf32> to vector<64x64xf32>
    %50 = arith.cmpf oeq, %39, %49 : vector<64x64xf32>
    %51 = arith.extui %50 : vector<64x64xi1> to vector<64x64xi32>
    %52 = arith.sitofp %51 : vector<64x64xi32> to vector<64x64xf32>
    %cst_21 = arith.constant dense<0.000000e+00> : vector<32x64xf32>
    %53 = tpu.matmul %37, %52, %cst_21 {dimension_numbers = #tpu.dot_dimension_numbers<[1], [1], [0], [0], [0, 0, 1, 0], [], []>} : vector<32x64xf32>, vector<64x64xf32>, vector<32x64xf32> -> vector<32x64xf32>
    %54 = arith.addf %36, %53 : vector<32x64xf32>
    %cst_22 = arith.constant 0.000000e+00 : f32
    %55 = vector.broadcast %cst_22 : f32 to vector<32x64xf32>
    %56 = arith.maximumf %54, %55 : vector<32x64xf32>
    %57 = arith.maximumf %40, %56 : vector<32x64xf32>
    %cst_23 = arith.constant 0.000000e+00 : f32
    %58 = vector.broadcast %cst_23 : f32 to vector<64x64xf32>
    %59 = arith.cmpf ogt, %52, %58 : vector<64x64xf32>
    %cst_24 = arith.constant -1.000000e+30 : f32
    %60 = vector.broadcast %cst_24 : f32 to vector<64x64xf32>
    %61 = arith.select %59, %60, %28 : vector<64x64xi1>, vector<64x64xf32>
    %cst_25 = arith.constant dense<0xFF800000> : vector<64xf32>
    %62 = vector.multi_reduction <maximumf>, %61, %cst_25 [1] : vector<64x64xf32> to vector<64xf32>
    %63 = vector.shape_cast %62 : vector<64xf32> to vector<64x1xf32>
    %64 = vector.broadcast %63 : vector<64x1xf32> to vector<64x64xf32>
    %65 = arith.cmpf oge, %61, %64 : vector<64x64xf32>
    %cst_26 = arith.constant 6.400000e+01 : f32
    %66 = vector.broadcast %cst_26 : f32 to vector<64x64xf32>
    %67 = arith.select %65, %39, %66 : vector<64x64xi1>, vector<64x64xf32>
    %cst_27 = arith.constant dense<0x7F800000> : vector<64xf32>
    %68 = vector.multi_reduction <minimumf>, %67, %cst_27 [1] : vector<64x64xf32> to vector<64xf32>
    %69 = vector.shape_cast %68 : vector<64xf32> to vector<64x1xf32>
    %70 = vector.broadcast %69 : vector<64x1xf32> to vector<64x64xf32>
    %71 = arith.cmpf oeq, %39, %70 : vector<64x64xf32>
    %72 = arith.extui %71 : vector<64x64xi1> to vector<64x64xi32>
    %73 = arith.sitofp %72 : vector<64x64xi32> to vector<64x64xf32>
    %cst_28 = arith.constant dense<0.000000e+00> : vector<32x64xf32>
    %74 = tpu.matmul %37, %73, %cst_28 {dimension_numbers = #tpu.dot_dimension_numbers<[1], [1], [0], [0], [0, 0, 1, 0], [], []>} : vector<32x64xf32>, vector<64x64xf32>, vector<32x64xf32> -> vector<32x64xf32>
    %75 = arith.addf %36, %74 : vector<32x64xf32>
    %cst_29 = arith.constant 0.000000e+00 : f32
    %76 = vector.broadcast %cst_29 : f32 to vector<32x64xf32>
    %77 = arith.maximumf %75, %76 : vector<32x64xf32>
    %78 = arith.maximumf %57, %77 : vector<32x64xf32>
    %cst_30 = arith.constant 0.000000e+00 : f32
    %79 = vector.broadcast %cst_30 : f32 to vector<64x64xf32>
    %80 = arith.cmpf ogt, %73, %79 : vector<64x64xf32>
    %cst_31 = arith.constant -1.000000e+30 : f32
    %81 = vector.broadcast %cst_31 : f32 to vector<64x64xf32>
    %82 = arith.select %80, %81, %61 : vector<64x64xi1>, vector<64x64xf32>
    %cst_32 = arith.constant dense<0xFF800000> : vector<64xf32>
    %83 = vector.multi_reduction <maximumf>, %82, %cst_32 [1] : vector<64x64xf32> to vector<64xf32>
    %84 = vector.shape_cast %83 : vector<64xf32> to vector<64x1xf32>
    %85 = vector.broadcast %84 : vector<64x1xf32> to vector<64x64xf32>
    %86 = arith.cmpf oge, %82, %85 : vector<64x64xf32>
    %cst_33 = arith.constant 6.400000e+01 : f32
    %87 = vector.broadcast %cst_33 : f32 to vector<64x64xf32>
    %88 = arith.select %86, %39, %87 : vector<64x64xi1>, vector<64x64xf32>
    %cst_34 = arith.constant dense<0x7F800000> : vector<64xf32>
    %89 = vector.multi_reduction <minimumf>, %88, %cst_34 [1] : vector<64x64xf32> to vector<64xf32>
    %90 = vector.shape_cast %89 : vector<64xf32> to vector<64x1xf32>
    %91 = vector.broadcast %90 : vector<64x1xf32> to vector<64x64xf32>
    %92 = arith.cmpf oeq, %39, %91 : vector<64x64xf32>
    %93 = arith.extui %92 : vector<64x64xi1> to vector<64x64xi32>
    %94 = arith.sitofp %93 : vector<64x64xi32> to vector<64x64xf32>
    %cst_35 = arith.constant dense<0.000000e+00> : vector<32x64xf32>
    %95 = tpu.matmul %37, %94, %cst_35 {dimension_numbers = #tpu.dot_dimension_numbers<[1], [1], [0], [0], [0, 0, 1, 0], [], []>} : vector<32x64xf32>, vector<64x64xf32>, vector<32x64xf32> -> vector<32x64xf32>
    %96 = arith.addf %36, %95 : vector<32x64xf32>
    %cst_36 = arith.constant 0.000000e+00 : f32
    %97 = vector.broadcast %cst_36 : f32 to vector<32x64xf32>
    %98 = arith.maximumf %96, %97 : vector<32x64xf32>
    %99 = arith.maximumf %78, %98 : vector<32x64xf32>
    %cst_37 = arith.constant 0.000000e+00 : f32
    %100 = vector.broadcast %cst_37 : f32 to vector<64x64xf32>
    %101 = arith.cmpf ogt, %94, %100 : vector<64x64xf32>
    %cst_38 = arith.constant -1.000000e+30 : f32
    %102 = vector.broadcast %cst_38 : f32 to vector<64x64xf32>
    %103 = arith.select %101, %102, %82 : vector<64x64xi1>, vector<64x64xf32>
    %cst_39 = arith.constant dense<0xFF800000> : vector<64xf32>
    %104 = vector.multi_reduction <maximumf>, %103, %cst_39 [1] : vector<64x64xf32> to vector<64xf32>
    %105 = vector.shape_cast %104 : vector<64xf32> to vector<64x1xf32>
    %106 = vector.broadcast %105 : vector<64x1xf32> to vector<64x64xf32>
    %107 = arith.cmpf oge, %103, %106 : vector<64x64xf32>
    %cst_40 = arith.constant 6.400000e+01 : f32
    %108 = vector.broadcast %cst_40 : f32 to vector<64x64xf32>
    %109 = arith.select %107, %39, %108 : vector<64x64xi1>, vector<64x64xf32>
    %cst_41 = arith.constant dense<0x7F800000> : vector<64xf32>
    %110 = vector.multi_reduction <minimumf>, %109, %cst_41 [1] : vector<64x64xf32> to vector<64xf32>
    %111 = vector.shape_cast %110 : vector<64xf32> to vector<64x1xf32>
    %112 = vector.broadcast %111 : vector<64x1xf32> to vector<64x64xf32>
    %113 = arith.cmpf oeq, %39, %112 : vector<64x64xf32>
    %114 = arith.extui %113 : vector<64x64xi1> to vector<64x64xi32>
    %115 = arith.sitofp %114 : vector<64x64xi32> to vector<64x64xf32>
    %cst_42 = arith.constant dense<0.000000e+00> : vector<32x64xf32>
    %116 = tpu.matmul %37, %115, %cst_42 {dimension_numbers = #tpu.dot_dimension_numbers<[1], [1], [0], [0], [0, 0, 1, 0], [], []>} : vector<32x64xf32>, vector<64x64xf32>, vector<32x64xf32> -> vector<32x64xf32>
    %117 = arith.addf %36, %116 : vector<32x64xf32>
    %cst_43 = arith.constant 0.000000e+00 : f32
    %118 = vector.broadcast %cst_43 : f32 to vector<32x64xf32>
    %119 = arith.maximumf %117, %118 : vector<32x64xf32>
    %120 = arith.maximumf %99, %119 : vector<32x64xf32>
    %cst_44 = arith.constant 0.000000e+00 : f32
    %121 = vector.broadcast %cst_44 : f32 to vector<64x64xf32>
    %122 = arith.cmpf ogt, %115, %121 : vector<64x64xf32>
    %cst_45 = arith.constant -1.000000e+30 : f32
    %123 = vector.broadcast %cst_45 : f32 to vector<64x64xf32>
    %124 = arith.select %122, %123, %103 : vector<64x64xi1>, vector<64x64xf32>
    %cst_46 = arith.constant dense<0xFF800000> : vector<64xf32>
    %125 = vector.multi_reduction <maximumf>, %124, %cst_46 [1] : vector<64x64xf32> to vector<64xf32>
    %126 = vector.shape_cast %125 : vector<64xf32> to vector<64x1xf32>
    %127 = vector.broadcast %126 : vector<64x1xf32> to vector<64x64xf32>
    %128 = arith.cmpf oge, %124, %127 : vector<64x64xf32>
    %cst_47 = arith.constant 6.400000e+01 : f32
    %129 = vector.broadcast %cst_47 : f32 to vector<64x64xf32>
    %130 = arith.select %128, %39, %129 : vector<64x64xi1>, vector<64x64xf32>
    %cst_48 = arith.constant dense<0x7F800000> : vector<64xf32>
    %131 = vector.multi_reduction <minimumf>, %130, %cst_48 [1] : vector<64x64xf32> to vector<64xf32>
    %132 = vector.shape_cast %131 : vector<64xf32> to vector<64x1xf32>
    %133 = vector.broadcast %132 : vector<64x1xf32> to vector<64x64xf32>
    %134 = arith.cmpf oeq, %39, %133 : vector<64x64xf32>
    %135 = arith.extui %134 : vector<64x64xi1> to vector<64x64xi32>
    %136 = arith.sitofp %135 : vector<64x64xi32> to vector<64x64xf32>
    %cst_49 = arith.constant dense<0.000000e+00> : vector<32x64xf32>
    %137 = tpu.matmul %37, %136, %cst_49 {dimension_numbers = #tpu.dot_dimension_numbers<[1], [1], [0], [0], [0, 0, 1, 0], [], []>} : vector<32x64xf32>, vector<64x64xf32>, vector<32x64xf32> -> vector<32x64xf32>
    %138 = arith.addf %36, %137 : vector<32x64xf32>
    %cst_50 = arith.constant 0.000000e+00 : f32
    %139 = vector.broadcast %cst_50 : f32 to vector<32x64xf32>
    %140 = arith.maximumf %138, %139 : vector<32x64xf32>
    %141 = arith.maximumf %120, %140 : vector<32x64xf32>
    %cst_51 = arith.constant 0.000000e+00 : f32
    %142 = vector.broadcast %cst_51 : f32 to vector<64x64xf32>
    %143 = arith.cmpf ogt, %136, %142 : vector<64x64xf32>
    %cst_52 = arith.constant -1.000000e+30 : f32
    %144 = vector.broadcast %cst_52 : f32 to vector<64x64xf32>
    %145 = arith.select %143, %144, %124 : vector<64x64xi1>, vector<64x64xf32>
    %cst_53 = arith.constant dense<0xFF800000> : vector<64xf32>
    %146 = vector.multi_reduction <maximumf>, %145, %cst_53 [1] : vector<64x64xf32> to vector<64xf32>
    %147 = vector.shape_cast %146 : vector<64xf32> to vector<64x1xf32>
    %148 = vector.broadcast %147 : vector<64x1xf32> to vector<64x64xf32>
    %149 = arith.cmpf oge, %145, %148 : vector<64x64xf32>
    %cst_54 = arith.constant 6.400000e+01 : f32
    %150 = vector.broadcast %cst_54 : f32 to vector<64x64xf32>
    %151 = arith.select %149, %39, %150 : vector<64x64xi1>, vector<64x64xf32>
    %cst_55 = arith.constant dense<0x7F800000> : vector<64xf32>
    %152 = vector.multi_reduction <minimumf>, %151, %cst_55 [1] : vector<64x64xf32> to vector<64xf32>
    %153 = vector.shape_cast %152 : vector<64xf32> to vector<64x1xf32>
    %154 = vector.broadcast %153 : vector<64x1xf32> to vector<64x64xf32>
    %155 = arith.cmpf oeq, %39, %154 : vector<64x64xf32>
    %156 = arith.extui %155 : vector<64x64xi1> to vector<64x64xi32>
    %157 = arith.sitofp %156 : vector<64x64xi32> to vector<64x64xf32>
    %cst_56 = arith.constant dense<0.000000e+00> : vector<32x64xf32>
    %158 = tpu.matmul %37, %157, %cst_56 {dimension_numbers = #tpu.dot_dimension_numbers<[1], [1], [0], [0], [0, 0, 1, 0], [], []>} : vector<32x64xf32>, vector<64x64xf32>, vector<32x64xf32> -> vector<32x64xf32>
    %159 = arith.addf %36, %158 : vector<32x64xf32>
    %cst_57 = arith.constant 0.000000e+00 : f32
    %160 = vector.broadcast %cst_57 : f32 to vector<32x64xf32>
    %161 = arith.maximumf %159, %160 : vector<32x64xf32>
    %162 = arith.maximumf %141, %161 : vector<32x64xf32>
    %cst_58 = arith.constant 0.000000e+00 : f32
    %163 = vector.broadcast %cst_58 : f32 to vector<64x64xf32>
    %164 = arith.cmpf ogt, %157, %163 : vector<64x64xf32>
    %cst_59 = arith.constant -1.000000e+30 : f32
    %165 = vector.broadcast %cst_59 : f32 to vector<64x64xf32>
    %166 = arith.select %164, %165, %145 : vector<64x64xi1>, vector<64x64xf32>
    %cst_60 = arith.constant dense<0xFF800000> : vector<64xf32>
    %167 = vector.multi_reduction <maximumf>, %166, %cst_60 [1] : vector<64x64xf32> to vector<64xf32>
    %168 = vector.shape_cast %167 : vector<64xf32> to vector<64x1xf32>
    %169 = vector.broadcast %168 : vector<64x1xf32> to vector<64x64xf32>
    %170 = arith.cmpf oge, %166, %169 : vector<64x64xf32>
    %cst_61 = arith.constant 6.400000e+01 : f32
    %171 = vector.broadcast %cst_61 : f32 to vector<64x64xf32>
    %172 = arith.select %170, %39, %171 : vector<64x64xi1>, vector<64x64xf32>
    %cst_62 = arith.constant dense<0x7F800000> : vector<64xf32>
    %173 = vector.multi_reduction <minimumf>, %172, %cst_62 [1] : vector<64x64xf32> to vector<64xf32>
    %174 = vector.shape_cast %173 : vector<64xf32> to vector<64x1xf32>
    %175 = vector.broadcast %174 : vector<64x1xf32> to vector<64x64xf32>
    %176 = arith.cmpf oeq, %39, %175 : vector<64x64xf32>
    %177 = arith.extui %176 : vector<64x64xi1> to vector<64x64xi32>
    %178 = arith.sitofp %177 : vector<64x64xi32> to vector<64x64xf32>
    %cst_63 = arith.constant dense<0.000000e+00> : vector<32x64xf32>
    %179 = tpu.matmul %37, %178, %cst_63 {dimension_numbers = #tpu.dot_dimension_numbers<[1], [1], [0], [0], [0, 0, 1, 0], [], []>} : vector<32x64xf32>, vector<64x64xf32>, vector<32x64xf32> -> vector<32x64xf32>
    %180 = arith.addf %36, %179 : vector<32x64xf32>
    %cst_64 = arith.constant 0.000000e+00 : f32
    %181 = vector.broadcast %cst_64 : f32 to vector<32x64xf32>
    %182 = arith.maximumf %180, %181 : vector<32x64xf32>
    %183 = arith.maximumf %162, %182 : vector<32x64xf32>
    %cst_65 = arith.constant 0.000000e+00 : f32
    %184 = vector.broadcast %cst_65 : f32 to vector<64x64xf32>
    %185 = arith.cmpf ogt, %178, %184 : vector<64x64xf32>
    %cst_66 = arith.constant -1.000000e+30 : f32
    %186 = vector.broadcast %cst_66 : f32 to vector<64x64xf32>
    %187 = arith.select %185, %186, %166 : vector<64x64xi1>, vector<64x64xf32>
    %cst_67 = arith.constant dense<0xFF800000> : vector<64xf32>
    %188 = vector.multi_reduction <maximumf>, %187, %cst_67 [1] : vector<64x64xf32> to vector<64xf32>
    %189 = vector.shape_cast %188 : vector<64xf32> to vector<64x1xf32>
    %190 = vector.broadcast %189 : vector<64x1xf32> to vector<64x64xf32>
    %191 = arith.cmpf oge, %187, %190 : vector<64x64xf32>
    %cst_68 = arith.constant 6.400000e+01 : f32
    %192 = vector.broadcast %cst_68 : f32 to vector<64x64xf32>
    %193 = arith.select %191, %39, %192 : vector<64x64xi1>, vector<64x64xf32>
    %cst_69 = arith.constant dense<0x7F800000> : vector<64xf32>
    %194 = vector.multi_reduction <minimumf>, %193, %cst_69 [1] : vector<64x64xf32> to vector<64xf32>
    %195 = vector.shape_cast %194 : vector<64xf32> to vector<64x1xf32>
    %196 = vector.broadcast %195 : vector<64x1xf32> to vector<64x64xf32>
    %197 = arith.cmpf oeq, %39, %196 : vector<64x64xf32>
    %198 = arith.extui %197 : vector<64x64xi1> to vector<64x64xi32>
    %199 = arith.sitofp %198 : vector<64x64xi32> to vector<64x64xf32>
    %cst_70 = arith.constant dense<0.000000e+00> : vector<32x64xf32>
    %200 = tpu.matmul %37, %199, %cst_70 {dimension_numbers = #tpu.dot_dimension_numbers<[1], [1], [0], [0], [0, 0, 1, 0], [], []>} : vector<32x64xf32>, vector<64x64xf32>, vector<32x64xf32> -> vector<32x64xf32>
    %201 = arith.addf %36, %200 : vector<32x64xf32>
    %cst_71 = arith.constant 0.000000e+00 : f32
    %202 = vector.broadcast %cst_71 : f32 to vector<32x64xf32>
    %203 = arith.maximumf %201, %202 : vector<32x64xf32>
    %204 = arith.maximumf %183, %203 : vector<32x64xf32>
    %cst_72 = arith.constant 0.000000e+00 : f32
    %205 = vector.broadcast %cst_72 : f32 to vector<64x64xf32>
    %206 = arith.cmpf ogt, %199, %205 : vector<64x64xf32>
    %cst_73 = arith.constant -1.000000e+30 : f32
    %207 = vector.broadcast %cst_73 : f32 to vector<64x64xf32>
    %208 = arith.select %206, %207, %187 : vector<64x64xi1>, vector<64x64xf32>
    %cst_74 = arith.constant dense<0xFF800000> : vector<64xf32>
    %209 = vector.multi_reduction <maximumf>, %208, %cst_74 [1] : vector<64x64xf32> to vector<64xf32>
    %210 = vector.shape_cast %209 : vector<64xf32> to vector<64x1xf32>
    %211 = vector.broadcast %210 : vector<64x1xf32> to vector<64x64xf32>
    %212 = arith.cmpf oge, %208, %211 : vector<64x64xf32>
    %cst_75 = arith.constant 6.400000e+01 : f32
    %213 = vector.broadcast %cst_75 : f32 to vector<64x64xf32>
    %214 = arith.select %212, %39, %213 : vector<64x64xi1>, vector<64x64xf32>
    %cst_76 = arith.constant dense<0x7F800000> : vector<64xf32>
    %215 = vector.multi_reduction <minimumf>, %214, %cst_76 [1] : vector<64x64xf32> to vector<64xf32>
    %216 = vector.shape_cast %215 : vector<64xf32> to vector<64x1xf32>
    %217 = vector.broadcast %216 : vector<64x1xf32> to vector<64x64xf32>
    %218 = arith.cmpf oeq, %39, %217 : vector<64x64xf32>
    %219 = arith.extui %218 : vector<64x64xi1> to vector<64x64xi32>
    %220 = arith.sitofp %219 : vector<64x64xi32> to vector<64x64xf32>
    %cst_77 = arith.constant dense<0.000000e+00> : vector<32x64xf32>
    %221 = tpu.matmul %37, %220, %cst_77 {dimension_numbers = #tpu.dot_dimension_numbers<[1], [1], [0], [0], [0, 0, 1, 0], [], []>} : vector<32x64xf32>, vector<64x64xf32>, vector<32x64xf32> -> vector<32x64xf32>
    %222 = arith.addf %36, %221 : vector<32x64xf32>
    %cst_78 = arith.constant 0.000000e+00 : f32
    %223 = vector.broadcast %cst_78 : f32 to vector<32x64xf32>
    %224 = arith.maximumf %222, %223 : vector<32x64xf32>
    %225 = arith.maximumf %204, %224 : vector<32x64xf32>
    %c0_79 = arith.constant 0 : index
    %c0_80 = arith.constant 0 : index
    %226 = vector.load %arg5[%c0_79, %c0_80] : memref<16x32xf32, #tpu.memory_space<vmem>>, vector<16x32xf32>
    %227 = arith.truncf %226 : vector<16x32xf32> to vector<16x32xbf16>
    %228 = arith.truncf %225 : vector<32x64xf32> to vector<32x64xbf16>
    %cst_81 = arith.constant dense<0.000000e+00> : vector<16x64xf32>
    %229 = tpu.matmul %227, %228, %cst_81 {dimension_numbers = #tpu.dot_dimension_numbers<[1], [0], [0], [1], [0, 0, 1, 1], [], []>} : vector<16x32xbf16>, vector<32x64xbf16>, vector<16x64xf32> -> vector<16x64xf32>
    %c0_82 = arith.constant 0 : index
    %c0_83 = arith.constant 0 : index
    %230 = vector.load %arg6[%c0_82, %c0_83] : memref<16x1xf32, #tpu.memory_space<vmem>>, vector<16x1xf32>
    %231 = vector.broadcast %230 : vector<16x1xf32> to vector<16x64xf32>
    %232 = arith.addf %229, %231 : vector<16x64xf32>
    %c0_84 = arith.constant 0 : index
    %c0_85 = arith.constant 0 : index
    %c0_86 = arith.constant 0 : index
    %233 = vector.load %arg7[%c0_84, %c0_85, %c0_86] : memref<1x16x64xf32, #tpu.memory_space<vmem>>, vector<1x16x64xf32>
    %234 = vector.shape_cast %233 : vector<1x16x64xf32> to vector<16x64xf32>
    %235 = vector.shape_cast %232 : vector<16x64xf32> to vector<1x16x64xf32>
    tpu.vector_store %arg7[%c0_84, %c0_85, %c0_86], %235 {strides = array<i32>} : memref<1x16x64xf32, #tpu.memory_space<vmem>>, vector<1x16x64xf32>,
    return
  }
  func.func @transform_0(%arg0: i32) -> (i32, i32, i32) {
    %c0_i32 = arith.constant 0 : i32
    %c0_i32_0 = arith.constant 0 : i32
    %c0_i32_1 = arith.constant 0 : i32
    return %arg0, %c0_i32, %c0_i32_0 : i32, i32, i32
  }
  func.func @transform_1(%arg0: i32) -> (i32, i32, i32) {
    %c0_i32 = arith.constant 0 : i32
    %c0_i32_0 = arith.constant 0 : i32
    %c0_i32_1 = arith.constant 0 : i32
    return %arg0, %c0_i32, %c0_i32_0 : i32, i32, i32
  }
  func.func @transform_2(%arg0: i32) -> (i32, i32) {
    %c0_i32 = arith.constant 0 : i32
    %c0_i32_0 = arith.constant 0 : i32
    %c0_i32_1 = arith.constant 0 : i32
    return %c0_i32, %c0_i32_0 : i32, i32
  }
  func.func @transform_3(%arg0: i32) -> (i32, i32) {
    %c0_i32 = arith.constant 0 : i32
    %c0_i32_0 = arith.constant 0 : i32
    %c0_i32_1 = arith.constant 0 : i32
    return %c0_i32, %c0_i32_0 : i32, i32
  }
  func.func @transform_4(%arg0: i32) -> (i32, i32) {
    %c0_i32 = arith.constant 0 : i32
    %c0_i32_0 = arith.constant 0 : i32
    %c0_i32_1 = arith.constant 0 : i32
    return %c0_i32, %c0_i32_0 : i32, i32
  }
  func.func @transform_5(%arg0: i32) -> (i32, i32) {
    %c0_i32 = arith.constant 0 : i32
    %c0_i32_0 = arith.constant 0 : i32
    %c0_i32_1 = arith.constant 0 : i32
    return %c0_i32, %c0_i32_0 : i32, i32
  }
  func.func @transform_6(%arg0: i32) -> (i32, i32, i32) {
    %c0_i32 = arith.constant 0 : i32
    %c0_i32_0 = arith.constant 0 : i32
    %c0_i32_1 = arith.constant 0 : i32
    return %arg0, %c0_i32, %c0_i32_0 : i32, i32, i32
  }
}

module attributes {stable_mosaic.version = 11 : i64} {
  func.func @_combine_fc2_res_kernel(%arg0: memref<3x16x128xf32, #tpu.memory_space<vmem>>, %arg1: memref<16x128xf32, #tpu.memory_space<vmem>>, %arg2: memref<16x128xf32, #tpu.memory_space<vmem>>, %arg3: memref<16x128xf32, #tpu.memory_space<vmem>>, %arg4: memref<16x128xf32, #tpu.memory_space<vmem>>, %arg5: memref<16x16xf32, #tpu.memory_space<vmem>>, %arg6: memref<16x1xf32, #tpu.memory_space<vmem>>, %arg7: memref<16x128xf32, #tpu.memory_space<vmem>>) attributes {dimension_semantics = [], scalar_prefetch = 0 : i64, scratch_operands = 0 : i64, tpu.core_type = #tpu.core_type<tc>} {
    %c0 = arith.constant 0 : index
    %c0_0 = arith.constant 0 : index
    %0 = vector.load %arg1[%c0, %c0_0] : memref<16x128xf32, #tpu.memory_space<vmem>>, vector<16x128xf32>
    %c0_1 = arith.constant 0 : index
    %c0_2 = arith.constant 0 : index
    %c0_3 = arith.constant 0 : index
    %1 = vector.load %arg0[%c0_1, %c0_2, %c0_3] : memref<3x16x128xf32, #tpu.memory_space<vmem>>, vector<1x16x128xf32>
    %2 = vector.shape_cast %1 : vector<1x16x128xf32> to vector<16x128xf32>
    %3 = arith.mulf %0, %2 : vector<16x128xf32>
    %c0_4 = arith.constant 0 : index
    %c0_5 = arith.constant 0 : index
    %4 = vector.load %arg2[%c0_4, %c0_5] : memref<16x128xf32, #tpu.memory_space<vmem>>, vector<16x128xf32>
    %c1 = arith.constant 1 : index
    %c0_6 = arith.constant 0 : index
    %c0_7 = arith.constant 0 : index
    %5 = vector.load %arg0[%c1, %c0_6, %c0_7] : memref<3x16x128xf32, #tpu.memory_space<vmem>>, vector<1x16x128xf32>
    %6 = vector.shape_cast %5 : vector<1x16x128xf32> to vector<16x128xf32>
    %7 = arith.mulf %4, %6 : vector<16x128xf32>
    %8 = arith.addf %3, %7 : vector<16x128xf32>
    %c0_8 = arith.constant 0 : index
    %c0_9 = arith.constant 0 : index
    %9 = vector.load %arg3[%c0_8, %c0_9] : memref<16x128xf32, #tpu.memory_space<vmem>>, vector<16x128xf32>
    %c2 = arith.constant 2 : index
    %c0_10 = arith.constant 0 : index
    %c0_11 = arith.constant 0 : index
    %10 = vector.load %arg0[%c2, %c0_10, %c0_11] : memref<3x16x128xf32, #tpu.memory_space<vmem>>, vector<1x16x128xf32>
    %11 = vector.shape_cast %10 : vector<1x16x128xf32> to vector<16x128xf32>
    %12 = arith.mulf %9, %11 : vector<16x128xf32>
    %13 = arith.addf %8, %12 : vector<16x128xf32>
    %c0_12 = arith.constant 0 : index
    %c0_13 = arith.constant 0 : index
    %14 = vector.load %arg5[%c0_12, %c0_13] : memref<16x16xf32, #tpu.memory_space<vmem>>, vector<16x16xf32>
    %15 = arith.truncf %14 : vector<16x16xf32> to vector<16x16xbf16>
    %16 = arith.truncf %13 : vector<16x128xf32> to vector<16x128xbf16>
    %cst = arith.constant dense<0.000000e+00> : vector<16x128xf32>
    %17 = tpu.matmul %15, %16, %cst {dimension_numbers = #tpu.dot_dimension_numbers<[1], [0], [0], [1], [0, 0, 1, 1], [], []>} : vector<16x16xbf16>, vector<16x128xbf16>, vector<16x128xf32> -> vector<16x128xf32>
    %c0_14 = arith.constant 0 : index
    %c0_15 = arith.constant 0 : index
    %18 = vector.load %arg6[%c0_14, %c0_15] : memref<16x1xf32, #tpu.memory_space<vmem>>, vector<16x1xf32>
    %19 = vector.broadcast %18 : vector<16x1xf32> to vector<16x128xf32>
    %20 = arith.addf %17, %19 : vector<16x128xf32>
    %c0_16 = arith.constant 0 : index
    %c0_17 = arith.constant 0 : index
    %21 = vector.load %arg4[%c0_16, %c0_17] : memref<16x128xf32, #tpu.memory_space<vmem>>, vector<16x128xf32>
    %22 = arith.addf %20, %21 : vector<16x128xf32>
    %c0_18 = arith.constant 0 : index
    %c0_19 = arith.constant 0 : index
    %23 = vector.load %arg7[%c0_18, %c0_19] : memref<16x128xf32, #tpu.memory_space<vmem>>, vector<16x128xf32>
    tpu.vector_store %arg7[%c0_18, %c0_19], %22 {strides = array<i32>} : memref<16x128xf32, #tpu.memory_space<vmem>>, vector<16x128xf32>,
    return
  }
}

</mosaic_0001>

<bundles_post_ra>
// kernel: sub.7
= control target key start
LH: loop header
LB: loop body
LE: loop exit
PB: predicated region body
PF: predicated region fallthrough
CT: control target
= control target key end

     0   :  { %s56_s0 = inlined_call_operand.vmem [shape: f32[32,16], index: 0, kind: input, shape index: {}]   ;;  %s57_s1 = inlined_call_operand.vmem [shape: f32[32,16], index: 1, kind: input, shape index: {}]   ;;  %s58_s2 = inlined_call_operand.vmem [shape: f32[32,16], index: 2, kind: output, shape index: {}]  }
   0x1   :  { %v3_v0 = vld [vmem:[%s56_s0] sm:$0xff]  ;;  %v20_v2 = vld [vmem:[%s56_s0 + $0x8] sm:$0xff] }
   0x2   :  { %v4_v1 = vld [vmem:[%s57_s1] sm:$0xff]  ;;  %v21_v4 = vld [vmem:[%s57_s1 + $0x8] sm:$0xff] }
   0x3   :  { %v7_v3 = vsub.f32 %v3_v0, %v4_v1  ;;  %v16_v5 = vsub.f32 %v20_v2, %v21_v4 }
   0x5   :  { %9 = vst [vmem:[%s58_s2] sm:$0xff] %v7_v3  ;;  %22 = vst [vmem:[%s58_s2 + $0x8] sm:$0xff] %v16_v5 }

// kernel: grapher_3d_2_forward.5
= control target key start
LH: loop header
LB: loop body
LE: loop exit
PB: predicated region body
PF: predicated region fallthrough
CT: control target
= control target key end

     0   :  { %v97_v0 = vmov 0.0   ;;  %vm98_vm0 = vmmov 0   ;;  %v99_v6 = vmov 0   ;;  %vm33_vm1 = vcmask 130048   ;;  %s144_s2 = inlined_call_operand.vmem [shape: f32[16,128], index: 2, kind: input, shape index: {}]   ;;  %s145_s0 = inlined_call_operand.vmem [shape: f32[16,16], index: 0, kind: input, shape index: {}]   ;;  %s146_s1 = inlined_call_operand.vmem [shape: f32[16,1], index: 1, kind: input, shape index: {}]   ;;  %s147_s3 = inlined_call_operand.vmem [shape: f32[16,128], index: 3, kind: output, shape index: {}]  }
   0x1   :  { %87 = vmatprep.subr.bf16.mxu0 %v97_v0  ;;  %v18_v1 = vld [vmem:[%s144_s2] sm:$0xff]  ;;  %v19_v2 = vld [vmem:[%s144_s2 + $0x8] sm:$0xff]  ;;  %89 = vmatprep.mubr.msk.bf16.mxu0 %vm98_vm0, %v97_v0 }
   0x2   :  { %v15_v3 = vld [vmem:[%s145_s0] sm:$0xff]  ;;  %v20_v4 = vpack.c.bf16 %v19_v2, %v18_v1  ;;  %v16_v5 = vld [vmem:[%s145_s0 + $0x8] sm:$0xff]  ;;  %96 = vset.pattern.permute.xlu0 %v99_v6 }
   0x3   :  { %v21_v7 = vld [vmem:[%s146_s1] sm:$0xff]  ;;  %v17_v8 = vpack.c.bf16 %v16_v5, %v15_v3  ;;  %v22_v9 = vld [vmem:[%s146_s1 + $0x8] sm:$0xff] }
   0x4   :  { %25 = vperm.xlu0 %96, %v21_v7   ;;  %88 = vmatpush3.bf16.msra.mxu0 %v20_v4 }
   0x7   :  { %90 = vmatmul.mubr.msk.bf16.vlgmr.msra.gmra.mrb[0].mxu0 %vm33_vm1, %v17_v8 }
   0x8   :  { %30 = vperm.xlu0 %96, %v22_v9  }
  0x83   :  { %v26_v10 = vpop.permute.xlu0 %25 }
  0x87   :  { %v31_v14 = vpop.permute.xlu0 %30 }
  0xda   :  { %v71_v11 = vpop.f32.mrb[0].mxu0 }
  0xdb   :  { %v72_v12 = vadd.f32 %v71_v11, %v26_v10  ;;  %v91_v13 = vpop.f32.mrb[1].mxu0 }
  0xdc   :  { %v74_v15 = vpop.f32.mrb[2].mxu0 }
  0xdd   :  { %78 = vst [vmem:[%s147_s3] sm:$0xff] %v72_v12  ;;  %v75_v16 = vadd.f32 %v74_v15, %v31_v14  ;;  %v92_v17 = vpop.f32.mrb[3].mxu0 }
  0xdf   :  { %79 = vst [vmem:[%s147_s3 + $0x8] sm:$0xff] %v75_v16 }

// kernel: grapher_3d_2_forward.9
= control target key start
LH: loop header
LB: loop body
LE: loop exit
PB: predicated region body
PF: predicated region fallthrough
CT: control target
= control target key end

     0   :  { %v139_v0 = vmov 0.0   ;;  %vm140_vm0 = vmmov 0   ;;  %v141_v8 = vmov 0   ;;  %vm67_vm1 = vcmask 130048   ;;  %s242_s0 = inlined_call_operand.vmem [shape: f32[3,16,128], index: 0, kind: input, shape index: {}]   ;;  %s243_s1 = inlined_call_operand.vmem [shape: f32[16,128], index: 1, kind: input, shape index: {}]   ;;  %s244_s2 = inlined_call_operand.vmem [shape: f32[16,128], index: 2, kind: input, shape index: {}]   ;;  %s245_s3 = inlined_call_operand.vmem [shape: f32[16,128], index: 3, kind: input, shape index: {}]   ;;  %s246_s6 = inlined_call_operand.vmem [shape: f32[16,1], index: 6, kind: input, shape index: {}]   ;;  %s247_s5 = inlined_call_operand.vmem [shape: f32[16,16], index: 5, kind: input, shape index: {}]   ;;  %s248_s4 = inlined_call_operand.vmem [shape: f32[16,128], index: 4, kind: input, shape index: {}]   ;;  %s249_s7 = inlined_call_operand.vmem [shape: f32[16,128], index: 7, kind: output, shape index: {}]  }
   0x1   :  { %129 = vmatprep.subr.bf16.mxu0 %v139_v0  ;;  %v27_v1 = vld [vmem:[%s243_s1] sm:$0xff]  ;;  %v28_v2 = vld [vmem:[%s243_s1 + $0x8] sm:$0xff]  ;;  %131 = vmatprep.mubr.msk.bf16.mxu0 %vm140_vm0, %v139_v0  ;;  %v122_v10 = vld [vmem:[%s242_s0 + $0x10] sm:$0xff] }
   0x2   :  { %v29_v3 = vld [vmem:[%s242_s0] sm:$0xff]  ;;  %v30_v4 = vld [vmem:[%s242_s0 + $0x8] sm:$0xff]  ;;  %138 = vset.pattern.permute.xlu0 %v141_v8  ;;  %v123_v11 = vld [vmem:[%s242_s0 + $0x18] sm:$0xff] }
   0x3   :  { %v31_v5 = vmul.f32 %v29_v3, %v27_v1  ;;  %v33_v6 = vld [vmem:[%s244_s2] sm:$0xff]  ;;  %v34_v7 = vld [vmem:[%s244_s2 + $0x8] sm:$0xff]  ;;  %v32_v9 = vmul.f32 %v30_v4, %v28_v2 }
   0x4   :  { %v42_v12 = vld [vmem:[%s245_s3] sm:$0xff]  ;;  %v38_v13 = vmul.f32 %v122_v10, %v33_v6  ;;  %v39_v14 = vmul.f32 %v123_v11, %v34_v7  ;;  %v43_v15 = vld [vmem:[%s245_s3 + $0x8] sm:$0xff] }
   0x5   :  { %v124_v16 = vld [vmem:[%s242_s0 + $0x20] sm:$0xff]  ;;  %v125_v17 = vld [vmem:[%s242_s0 + $0x28] sm:$0xff] }
   0x6   :  { %v47_v18 = vmul.f32 %v124_v16, %v42_v12  ;;  %v48_v19 = vmul.f32 %v125_v17, %v43_v15  ;;  %v55_v20 = vld [vmem:[%s246_s6] sm:$0xff]  ;;  %v40_v21 = vadd.f32 %v38_v13, %v31_v5  ;;  %v41_v22 = vadd.f32 %v39_v14, %v32_v9  ;;  %v56_v23 = vld [vmem:[%s246_s6 + $0x8] sm:$0xff] }
   0x7   :  { %59 = vperm.xlu0 %138, %v55_v20   ;;  %v51_v26 = vld [vmem:[%s247_s5] sm:$0xff]  ;;  %v52_v27 = vld [vmem:[%s247_s5 + $0x8] sm:$0xff] }
   0x8   :  { %v49_v24 = vadd.f32 %v47_v18, %v40_v21  ;;  %v50_v25 = vadd.f32 %v48_v19, %v41_v22  ;;  %v53_v29 = vpack.c.bf16 %v52_v27, %v51_v26  ;;  %v112_v32 = vld [vmem:[%s248_s4] sm:$0xff]  ;;  %v113_v37 = vld [vmem:[%s248_s4 + $0x8] sm:$0xff] }
   0xa   :  { %v54_v28 = vpack.c.bf16 %v50_v25, %v49_v24 }
   0xb   :  { %64 = vperm.xlu0 %138, %v56_v23  }
   0xc   :  { %130 = vmatpush3.bf16.msra.mxu0 %v54_v28 }
   0xf   :  { %132 = vmatmul.mubr.msk.bf16.vlgmr.msra.gmra.mrb[0].mxu0 %vm67_vm1, %v53_v29 }
  0x86   :  { %v60_v30 = vpop.permute.xlu0 %59 }
  0x8a   :  { %v65_v35 = vpop.permute.xlu0 %64 }
  0xe2   :  { %v105_v31 = vpop.f32.mrb[0].mxu0 }
  0xe3   :  { %v106_v33 = vadd.f32 %v105_v31, %v60_v30  ;;  %v133_v34 = vpop.f32.mrb[1].mxu0 }
  0xe4   :  { %v108_v36 = vpop.f32.mrb[2].mxu0 }
  0xe5   :  { %v114_v38 = vadd.f32 %v112_v32, %v106_v33  ;;  %v109_v39 = vadd.f32 %v108_v36, %v65_v35  ;;  %v134_v40 = vpop.f32.mrb[3].mxu0 }
  0xe7   :  { %116 = vst [vmem:[%s249_s7] sm:$0xff] %v114_v38  ;;  %v115_v41 = vadd.f32 %v113_v37, %v109_v39 }
  0xe9   :  { %117 = vst [vmem:[%s249_s7 + $0x8] sm:$0xff] %v115_v41 }

// kernel: grapher_3d_2_forward.6
= control target key start
LH: loop header
LB: loop body
LE: loop exit
PB: predicated region body
PF: predicated region fallthrough
CT: control target
= control target key end

     0   :  { %s3774_s21 = smov 0   ;;  %s5036_s0 = inlined_call_operand.vmem [shape: f32[2,16,64], index: 0, kind: input, shape index: {}]   ;;  %s5037_s1 = inlined_call_operand.vmem [shape: f32[2,64,16], index: 1, kind: input, shape index: {}]   ;;  %s5038_s2 = inlined_call_operand.vmem [shape: f32[64,16], index: 2, kind: input, shape index: {}]   ;;  %s5039_s3 = inlined_call_operand.vmem [shape: f32[32,1], index: 3, kind: input, shape index: {}]   ;;  %s5040_s4 = inlined_call_operand.vmem [shape: f32[16,32], index: 4, kind: input, shape index: {}]   ;;  %s5041_s5 = inlined_call_operand.vmem [shape: f32[16,1], index: 5, kind: input, shape index: {}]   ;;  %s5042_s6 = inlined_call_operand.vmem [shape: f32[2,16,64], index: 6, kind: output, shape index: {}]  }
   0x1 LB: > { %s2846_s22 = sadd.s32 4294967295, %s3734_s21   ;;  %p2850_p0 = scmp.ge.s32.totalorder %s3734_s21, 1  ;;  %s3734_s21 = sphi %s3774_s21, %s16_s21  }
   0x2   : > { %p222_p1 = scmp.lt.s32.totalorder %s3734_s21, 3 }
   0x4   : > { %p223_p2 = pnand %p2850_p0, %p222_p1 }
   0x5   : > { %p257_p3 = scmp.lt.s32.totalorder (!%p223_p2), %s2846_s22, 1  ;;  %vm315_vm0 = vcmask (!%p223_p2), 130048  }
   0x6   : > { %226 = sbr.rel (%p223_p2) target bundleno = 3553 (0xde1), region = 44 }
   0xd   : > { %s5048_s22 = smov (!%p257_p3, %s2846_s22), 1 }
   0xe   : > { %s3061_s23 = sshll.u32 %s5048_s22, 6  ;;  %s3060_s27 = sshll.u32 %s5048_s22, 4 }
   0xf   : > { %s266_s26 = scalar_lea.vmem %s5037_s1, %s3061_s23  ;;  %s261_s30 = scalar_lea.vmem %s5036_s0, %s3060_s27 }
  0x10   : > { %v3788_v0 = vld [vmem:[%s266_s26 + $0x10] sm:$0xff]  ;;  %v3792_v2 = vld [vmem:[%s266_s26] sm:$0xff]  ;;  %v3794_v3 = vld [vmem:[%s266_s26 + $0x18] sm:$0xff]  ;;  %s271_s20 = scalar_lea.vmem %s5042_s6, %s3060_s27 }
  0x11   : > { %v309_v1 = vmul.f32 %v3788_v0, %v3788_v0  ;;  %v3796_v4 = vld [vmem:[%s266_s26 + $0x8] sm:$0xff]  ;;  %v307_v5 = vmul.f32 %v3792_v2, %v3792_v2  ;;  %v310_v6 = vmul.f32 %v3794_v3, %v3794_v3  ;;  %v3807_v10 = vld [vmem:[%s266_s26 + $0x20] sm:$0xff]  ;;  %v3816_v16 = vld [vmem:[%s266_s26 + $0x38] sm:$0xff] }
  0x12   : > { %v308_v7 = vmul.f32 %v3796_v4, %v3796_v4  ;;  %v3804_v8 = vld [vmem:[%s266_s26 + $0x28] sm:$0xff]  ;;  %v311_v15 = vmul.f32 %v3807_v10, %v3807_v10  ;;  %v3818_v17 = vld [vmem:[%s266_s26 + $0x30] sm:$0xff]  ;;  %v314_v19 = vmul.f32 %v3816_v16, %v3816_v16 }
  0x13   : > { %v322_v9 = vsel %vm315_vm0, %v309_v1, 0.0  ;;  %v316_v11 = vsel %vm315_vm0, %v307_v5, 0.0  ;;  %v325_v12 = vsel %vm315_vm0, %v310_v6, 0.0  ;;  %v312_v13 = vmul.f32 %v3804_v8, %v3804_v8 }
  0x14   : > { %323 = vadd.xlane.f32.xlu1 %v322_v9  ;;  %317 = vadd.xlane.f32.xlu0 %v316_v11  ;;  %v319_v14 = vsel %vm315_vm0, %v308_v7, 0.0  ;;  %v328_v20 = vsel %vm315_vm0, %v311_v15, 0.0  ;;  %v313_v21 = vmul.f32 %v3818_v17, %v3818_v17  ;;  %v337_v22 = vsel %vm315_vm0, %v314_v19, 0.0 }
  0x15   : > { %v331_v18 = vsel %vm315_vm0, %v312_v13, 0.0 }
  0x16   : > { %v334_v23 = vsel %vm315_vm0, %v313_v21, 0.0 }
  0x18   : > { %326 = vadd.xlane.f32.xlu1 %v325_v12  ;;  %320 = vadd.xlane.f32.xlu0 %v319_v14 }
  0x1c   : > { %332 = vadd.xlane.f32.xlu1 %v331_v18  ;;  %329 = vadd.xlane.f32.xlu0 %v328_v20 }
  0x20   : > { %338 = vadd.xlane.f32.xlu1 %v337_v22  ;;  %335 = vadd.xlane.f32.xlu0 %v334_v23 }
  0xa1   : > { %v324_v24 = vpop.xlane.xlu1 %323  ;;  %v318_v25 = vpop.xlane.xlu0 %317 }
  0xa2   : > { %3692 = vrsqrt.f32 %v324_v24  ;;  %vm356_vm1 = vcmp.eq.f32.partialorder %v324_v24, inf  ;;  %vm358_vm2 = vcmp.eq.f32.partialorder %v324_v24, 0.0  ;;  %v359_v33 = vand.u32 2147483648, %v324_v24 }
  0xa3   : > { %3694 = vrsqrt.f32 %v318_v25  ;;  %vm342_vm3 = vcmp.eq.f32.partialorder %v318_v25, inf  ;;  %v345_v36 = vand.u32 2147483648, %v318_v25  ;;  %vm344_vm5 = vcmp.eq.f32.partialorder %v318_v25, 0.0 }
  0xa5   : > { %v327_v26 = vpop.xlane.xlu1 %326  ;;  %v321_v27 = vpop.xlane.xlu0 %320 }
  0xa6   : > { %3696 = vrsqrt.f32 %v327_v26  ;;  %vm363_vm4 = vcmp.eq.f32.partialorder %v327_v26, inf  ;;  %vm365_vm6 = vcmp.eq.f32.partialorder %v327_v26, 0.0  ;;  %v366_v41 = vand.u32 2147483648, %v327_v26 }
  0xa7   : > { %3698 = vrsqrt.f32 %v321_v27  ;;  %vm349_vm7 = vcmp.eq.f32.partialorder %v321_v27, inf  ;;  %vm351_vm8 = vcmp.eq.f32.partialorder %v321_v27, 0.0  ;;  %v352_v48 = vand.u32 2147483648, %v321_v27 }
  0xa9   : > { %v333_v28 = vpop.xlane.xlu1 %332  ;;  %v330_v29 = vpop.xlane.xlu0 %329 }
  0xaa   : > { %3700 = vrsqrt.f32 %v333_v28  ;;  %vm377_vm9 = vcmp.eq.f32.partialorder %v333_v28, inf  ;;  %vm379_vm10 = vcmp.eq.f32.partialorder %v333_v28, 0.0  ;;  %v380_v51 = vand.u32 2147483648, %v333_v28 }
  0xab   : > { %3702 = vrsqrt.f32 %v330_v29  ;;  %vm370_vm11 = vcmp.eq.f32.partialorder %v330_v29, inf  ;;  %v373_v58 = vand.u32 2147483648, %v330_v29  ;;  %vm372_vm12 = vcmp.eq.f32.partialorder %v330_v29, 0.0 }
  0xac   : > { %v3693_v30 = vpop.eup %3692 }
  0xad   : > { %v3695_v31 = vpop.eup %3694  ;;  %v355_v32 = vmul.f32 %v3693_v30, %v324_v24  ;;  %v3828_v34 = vpop.xlane.xlu1 %338 }
  0xae   : > { %v341_v35 = vmul.f32 %v3695_v31, %v318_v25  ;;  %3704 = vrsqrt.f32 %v3828_v34  ;;  %v3831_v37 = vpop.xlane.xlu0 %335  ;;  %vm391_vm13 = vcmp.eq.f32.partialorder %v3828_v34, inf  ;;  %v394_v13 = vand.u32 2147483648, %v3828_v34 }
  0xaf   : > { %v357_v38 = vsel %vm356_vm1, %v324_v24, %v355_v32  ;;  %3706 = vrsqrt.f32 %v3831_v37  ;;  %vm384_vm14 = vcmp.eq.f32.partialorder %v3831_v37, inf  ;;  %vm393_vm15 = vcmp.eq.f32.partialorder %v3828_v34, 0.0 }
  0xb0   : > { %v3697_v39 = vpop.eup %3696  ;;  %v360_v40 = vsel %vm358_vm2, %v359_v33, %v357_v38  ;;  %v343_v42 = vsel %vm342_vm3, %v318_v25, %v341_v35  ;;  %v387_v18 = vand.u32 2147483648, %v3831_v37  ;;  %vm386_vm1 = vcmp.eq.f32.partialorder %v3831_v37, 0.0  ;;  %vm3855_vm2 = vmpackc.low %vm315_vm0, %vm315_vm0 }
  0xb1   : > { %v3699_v43 = vpop.eup %3698  ;;  %v362_v44 = vmul.f32 %v3697_v39, %v327_v26  ;;  %v346_v45 = vsel %vm344_vm5, %v345_v36, %v343_v42  ;;  %v398_v46 = vmax.f32 %v360_v40, 1e-12  ;;  %vm285_vm3 = vcmask 523264  }
  0xb2   : > { %v348_v47 = vmul.f32 %v3699_v43, %v321_v27  ;;  %v396_v49 = vmax.f32 %v346_v45, 1e-12 }
  0xb3   : > { %v364_v50 = vsel %vm363_vm4, %v327_v26, %v362_v44 }
  0xb4   : > { %v3701_v52 = vpop.eup %3700  ;;  %v367_v53 = vsel %vm365_vm6, %v366_v41, %v364_v50  ;;  %v350_v54 = vsel %vm349_vm7, %v321_v27, %v348_v47  ;;  %3708 = vrcp.f32 %v396_v49 }
  0xb5   : > { %v3703_v55 = vpop.eup %3702  ;;  %v399_v56 = vmax.f32 %v367_v53, 1e-12  ;;  %v376_v57 = vmul.f32 %v3701_v52, %v333_v28  ;;  %v353_v59 = vsel %vm351_vm8, %v352_v48, %v350_v54  ;;  %3710 = vrcp.f32 %v398_v46 }
  0xb6   : > { %v369_v60 = vmul.f32 %v3703_v55, %v330_v29  ;;  %v397_v61 = vmax.f32 %v353_v59, 1e-12 }
  0xb7   : > { %3712 = vrcp.f32 %v399_v56  ;;  %v378_v62 = vsel %vm377_vm9, %v333_v28, %v376_v57 }
  0xb8   : > { %v3705_v63 = vpop.eup %3704  ;;  %v381_v1 = vsel %vm379_vm10, %v380_v51, %v378_v62  ;;  %v371_v5 = vsel %vm370_vm11, %v330_v29, %v369_v60  ;;  %3714 = vrcp.f32 %v397_v61 }
  0xb9   : > { %v3707_v6 = vpop.eup %3706  ;;  %v401_v7 = vmax.f32 %v381_v1, 1e-12  ;;  %v374_v9 = vsel %vm372_vm12, %v373_v58, %v371_v5  ;;  %v390_v11 = vmul.f32 %v3705_v63, %v3828_v34 }
  0xba   : > { %v400_v12 = vmax.f32 %v374_v9, 1e-12  ;;  %v383_v14 = vmul.f32 %v3707_v6, %v3831_v37 }
  0xbb   : > { %v392_v15 = vsel %vm391_vm13, %v3828_v34, %v390_v11  ;;  %3716 = vrcp.f32 %v401_v7 }
  0xbc   : > { %v385_v19 = vsel %vm384_vm14, %v3831_v37, %v383_v14  ;;  %3718 = vrcp.f32 %v400_v12  ;;  %v395_v21 = vsel %vm393_vm15, %v394_v13, %v392_v15 }
  0xbd   : > { %v388_v22 = vsel %vm386_vm1, %v387_v18, %v385_v19  ;;  %v403_v26 = vmax.f32 %v395_v21, 1e-12 }
  0xbe   : > { %v3709_v20 = vpop.eup %3708  ;;  %v402_v28 = vmax.f32 %v388_v22, 1e-12 }
  0xbf   : > { %v420_v23 = vmul.f32 %v3709_v20, %v3792_v2  ;;  %v3711_v24 = vpop.eup %3710  ;;  %3720 = vrcp.f32 %v403_v26 }
  0xc0   : > { %v422_v2 = vmul.f32 %v3711_v24, %v3788_v0  ;;  %3722 = vrcp.f32 %v402_v28 }
  0xc1   : > { %v3713_v25 = vpop.eup %3712  ;;  %3211 = vmatprep.mubr.msk.f32.mxu0 %vm315_vm0, %v420_v23 }
  0xc2   : > { %v3715_v27 = vpop.eup %3714  ;;  %v423_v30 = vmul.f32 %v3713_v25, %v3794_v3 }
  0xc3   : > { %v421_v29 = vmul.f32 %v3715_v27, %v3796_v4 }
  0xc4   : > { %v3445_v34 = vpack.c.bf16 %v423_v30, %v422_v2 }
  0xc5   : > { %v3439_v32 = vpack.c.bf16 %v421_v29, %v420_v23  ;;  %v3717_v33 = vpop.eup %3716 }
  0xc6   : > { %v3719_v35 = vpop.eup %3718  ;;  %v425_v4 = vmul.f32 %v3717_v33, %v3804_v8  ;;  %v3893_v8 = vld [vmem:[%s261_s30] sm:$0xff] }
  0xc7   : > { %3441 = vmatprep.subr.msk.bf16.mxu0 %vm3855_vm2, %v3439_v32  ;;  %v424_v3 = vmul.f32 %v3719_v35, %v3807_v10  ;;  %v3895_v10 = vld [vmem:[%s261_s30 + $0x8] sm:$0xff]  ;;  %v691_v35 = vlaneseq }
  0xc8   : > { %3444 = vmatpush3.bf16.xpose.msk.msra.mxu0 %vm3855_vm2, %v3439_v32 }
  0xc9   : > { %3447 = vmatprep.subr.msk.bf16.mxu0 %vm3855_vm2, %v3445_v34  ;;  %v3721_v36 = vpop.eup %3720  ;;  %v3451_v37 = vpack.c.bf16 %v425_v4, %v424_v3 }
  0xca   : > { %v3723_v0 = vpop.eup %3722  ;;  %v427_v39 = vmul.f32 %v3721_v36, %v3816_v16  ;;  %v283_v16 = vmul.f32 %v3893_v8, %v3893_v8 }
  0xcb   : > { %v426_v38 = vmul.f32 %v3723_v0, %v3818_v17  ;;  %v284_v17 = vmul.f32 %v3895_v10, %v3895_v10 }
  0xcc   : > { %v286_v41 = vsel %vm285_vm3, %v283_v16, 0.0 }
  0xcd   : > { %v3457_v40 = vpack.c.bf16 %v427_v39, %v426_v38  ;;  %v287_v42 = vsel %vm285_vm3, %v284_v17, 0.0 }
  0xce   : > { %v288_v43 = vadd.f32 %v287_v42, %v286_v41 }
  0xd0   : > { %3450 = vmatpush3.bf16.xpose.msk.msra.mxu0 %vm3855_vm2, %v3445_v34  ;;  %v289_v44 = vrot.slane %v288_v43, 4  ;;  %v585_v34 = vpack.c.bf16 %v3895_v10, %v3893_v8 }
  0xd1   : > { %3453 = vmatprep.subr.msk.bf16.mxu0 %vm3855_vm2, %v3451_v37 }
  0xd2   : > { %v290_v45 = vadd.f32 %v289_v44, %v288_v43  ;;  %3223 = vmatprep.subr.bf16.mxu1 %v585_v34 }
  0xd3   : > { %3224 = vmatpush3.bf16.msra.mxu1 %v585_v34 }
  0xd4   : > { %v291_v46 = vrot.slane %v290_v45, 2 }
  0xd6   : > { %v292_v47 = vadd.f32 %v291_v46, %v290_v45 }
  0xd8   : > { %3456 = vmatpush3.bf16.xpose.msk.msra.mxu0 %vm3855_vm2, %v3451_v37  ;;  %v293_v48 = vrot.slane %v292_v47, 1 }
  0xd9   : > { %3459 = vmatprep.subr.msk.bf16.mxu0 %vm3855_vm2, %v3457_v40 }
  0xda   : > { %v294_v49 = vadd.f32 %v293_v48, %v292_v47 }
  0xdc   : > { %3724 = vrsqrt.f32 %v294_v49  ;;  %vm297_vm4 = vcmp.eq.f32.partialorder %v294_v49, inf  ;;  %v300_v52 = vand.u32 2147483648, %v294_v49  ;;  %vm299_vm5 = vcmp.eq.f32.partialorder %v294_v49, 0.0 }
  0xe0   : > { %3462 = vmatpush3.bf16.xpose.msk.msra.mxu0 %vm3855_vm2, %v3457_v40  ;;  %vm3983_vm2 = vmpackc.low %vm285_vm3, %vm285_vm3 }
  0xe6   : > { %v3725_v50 = vpop.eup %3724 }
  0xe7   : > { %3212 = vmatmul.mubr.msk.f32.vlgmr.msra.gmra.mrb[0].mxu0 %vm315_vm0, %v421_v29  ;;  %v296_v51 = vmul.f32 %v3725_v50, %v294_v49 }
  0xe8   : > { %3214 = vmatprep.mubr.msk.f32.mxu0 %vm315_vm0, %v422_v2 }
  0xe9   : > { %v298_v53 = vsel %vm297_vm4, %v294_v49, %v296_v51 }
  0xea   : > { %v301_v54 = vsel %vm299_vm5, %v300_v52, %v298_v53 }
  0xeb   : > { %3215 = vmatmul.mubr.msk.f32.gmra.mrb[2].mxu0 %vm315_vm0, %v423_v30  ;;  %v302_v55 = vmax.f32 %v301_v54, 1e-12 }
  0xec   : > { %3217 = vmatprep.mubr.msk.f32.mxu0 %vm315_vm0, %v424_v3  ;;  %v692_v3 = vand.u32 127, %v691_v35 }
  0xed   : > { %3726 = vrcp.f32 %v302_v55  ;;  %v573_v55 = vld [vmem:[%s5038_s2] sm:$0xff] }
  0xef   : > { %3218 = vmatmul.mubr.msk.f32.gmra.mrb[4].mxu0 %vm315_vm0, %v425_v4  ;;  %v3937_v4 = vcvt.s32.f32 %v692_v3 }
  0xf0   : > { %3220 = vmatprep.mubr.msk.f32.mxu0 %vm315_vm0, %v426_v38 }
  0xf3   : > { %3221 = vmatmul.mubr.msk.f32.gmra.mrb[6].mxu0 %vm315_vm0, %v427_v39 }
  0xf7   : > { %v3727_v56 = vpop.eup %3726 }
  0xf8   : > { %v305_v57 = vmul.f32 %v3727_v56, %v294_v49 }
  0xfa   : > { %v306_v58 = vmul.f32 %v3727_v56, %v305_v57  ;;  %v574_v56 = vld [vmem:[%s5038_s2 + $0x8] sm:$0xff] }
  0xfb   : > { %v581_v57 = vpack.c.bf16 %v574_v56, %v573_v55 }
  0xfd   : > { %3225 = vmatprep.mubr.msk.bf16.mxu1 %vm315_vm0, %v581_v57 }
 0x1ba   : > { %v3213_v59 = vpop.f32.mrb[0].mxu0 }
 0x1bb   : > { %v558_v60 = vmul.f32 2.0, %v3213_v59  ;;  %v518_v61 = vpop.f32.mrb[1].mxu0  ;;  %v576_v59 = vld [vmem:[%s5038_s2 + $0x18] sm:$0xff] }
 0x1bc   : > { %v557_v62 = vmul.f32 2.0, %v518_v61 }
 0x1bd   : > { %v3903_v63 = vsub.f32 %v558_v60, %v306_v58 }
 0x1be   : > { %v3905_v1 = vsub.f32 %v557_v62, %v306_v58  ;;  %v3216_v5 = vpop.f32.mrb[2].mxu0 }
 0x1bf   : > { %v560_v6 = vmul.f32 2.0, %v3216_v5  ;;  %v528_v7 = vpop.f32.mrb[3].mxu0  ;;  %v697_v9 = vsel %vm285_vm3, %v3903_v63, -inf  ;;  %v3736_v5 = vmov 0.0  }
 0x1c0   : > { %v559_v11 = vmul.f32 2.0, %v528_v7  ;;  %698 = vmax.xlane.f32.xlu1 %v697_v9  ;;  %v694_v12 = vsel %vm285_vm3, %v3905_v1, -inf }
 0x1c1   : > { %v3911_v13 = vsub.f32 %v560_v6, %v306_v58  ;;  %695 = vmax.xlane.f32.xlu0 %v694_v12 }
 0x1c2   : > { %v3913_v14 = vsub.f32 %v559_v11, %v306_v58  ;;  %v3219_v15 = vpop.f32.mrb[4].mxu0 }
 0x1c3   : > { %v562_v18 = vmul.f32 2.0, %v3219_v15  ;;  %v538_v19 = vpop.f32.mrb[5].mxu0  ;;  %v703_v20 = vsel %vm285_vm3, %v3911_v13, -inf }
 0x1c4   : > { %v561_v21 = vmul.f32 2.0, %v538_v19  ;;  %704 = vmax.xlane.f32.xlu1 %v703_v20  ;;  %v700_v22 = vsel %vm285_vm3, %v3913_v14, -inf }
 0x1c5   : > { %v3919_v23 = vsub.f32 %v562_v18, %v306_v58  ;;  %701 = vmax.xlane.f32.xlu0 %v700_v22 }
 0x1c6   : > { %v3921_v24 = vsub.f32 %v561_v21, %v306_v58  ;;  %v3222_v25 = vpop.f32.mrb[6].mxu0 }
 0x1c7   : > { %v564_v26 = vmul.f32 2.0, %v3222_v25  ;;  %v548_v27 = vpop.f32.mrb[7].mxu0  ;;  %v709_v28 = vsel %vm285_vm3, %v3919_v23, -inf }
 0x1c8   : > { %v563_v29 = vmul.f32 2.0, %v548_v27  ;;  %710 = vmax.xlane.f32.xlu1 %v709_v28  ;;  %v706_v30 = vsel %vm285_vm3, %v3921_v24, -inf }
 0x1c9   : > { %v3927_v31 = vsub.f32 %v564_v26, %v306_v58  ;;  %707 = vmax.xlane.f32.xlu0 %v706_v30 }
 0x1ca   : > { %v3929_v32 = vsub.f32 %v563_v29, %v306_v58  ;;  %v575_v58 = vld [vmem:[%s5038_s2 + $0x10] sm:$0xff] }
 0x1cb   : > { %v715_v2 = vsel %vm285_vm3, %v3927_v31, -inf  ;;  %v582_v60 = vpack.c.bf16 %v576_v59, %v575_v58 }
 0x1cc   : > { %716 = vmax.xlane.f32.xlu1 %v715_v2  ;;  %v712_v33 = vsel %vm285_vm3, %v3929_v32, -inf }
 0x1cd   : > { %713 = vmax.xlane.f32.xlu0 %v712_v33  ;;  %3226 = vmatmul.mubr.msk.bf16.vlgmr.msra.gmra.mrb[0].mxu1 %vm315_vm0, %v582_v60  ;;  %v577_v60 = vld [vmem:[%s5038_s2 + $0x20] sm:$0xff] }
 0x24d   : > { %v699_v36 = vpop.xlane.xlu1 %698 }
 0x24e   : > { %vm719_vm6 = vcmp.ge.f32.partialorder %v3903_v63, %v699_v36  ;;  %v696_v37 = vpop.xlane.xlu0 %695 }
 0x24f   : > { %vm718_vm7 = vcmp.ge.f32.partialorder %v3905_v1, %v696_v37  ;;  %v727_v0 = vsel %vm719_vm6, %v3937_v4, 64.0 }
 0x250   : > { %v737_v38 = vsel %vm285_vm3, %v727_v0, inf  ;;  %v726_v39 = vsel %vm718_vm7, %v3937_v4, 64.0 }
 0x251   : > { %738 = vmin.xlane.f32.xlu1 %v737_v38  ;;  %v705_v40 = vpop.xlane.xlu1 %704  ;;  %v734_v8 = vsel %vm285_vm3, %v726_v39, inf }
 0x252   : > { %vm721_vm8 = vcmp.ge.f32.partialorder %v3911_v13, %v705_v40  ;;  %735 = vmin.xlane.f32.xlu0 %v734_v8  ;;  %v702_v10 = vpop.xlane.xlu0 %701 }
 0x253   : > { %vm720_vm9 = vcmp.ge.f32.partialorder %v3913_v14, %v702_v10  ;;  %v729_v16 = vsel %vm721_vm8, %v3937_v4, 64.0 }
 0x254   : > { %v743_v17 = vsel %vm285_vm3, %v729_v16, inf  ;;  %v728_v41 = vsel %vm720_vm9, %v3937_v4, 64.0 }
 0x255   : > { %744 = vmin.xlane.f32.xlu1 %v743_v17  ;;  %v711_v42 = vpop.xlane.xlu1 %710  ;;  %v740_v43 = vsel %vm285_vm3, %v728_v41, inf }
 0x256   : > { %vm723_vm10 = vcmp.ge.f32.partialorder %v3919_v23, %v711_v42  ;;  %741 = vmin.xlane.f32.xlu0 %v740_v43  ;;  %v708_v44 = vpop.xlane.xlu0 %707 }
 0x257   : > { %vm722_vm11 = vcmp.ge.f32.partialorder %v3921_v24, %v708_v44  ;;  %v731_v45 = vsel %vm723_vm10, %v3937_v4, 64.0 }
 0x258   : > { %v749_v46 = vsel %vm285_vm3, %v731_v45, inf  ;;  %v730_v47 = vsel %vm722_vm11, %v3937_v4, 64.0 }
 0x259   : > { %750 = vmin.xlane.f32.xlu1 %v749_v46  ;;  %v717_v48 = vpop.xlane.xlu1 %716  ;;  %v746_v49 = vsel %vm285_vm3, %v730_v47, inf }
 0x25a   : > { %vm725_vm12 = vcmp.ge.f32.partialorder %v3927_v31, %v717_v48  ;;  %747 = vmin.xlane.f32.xlu0 %v746_v49  ;;  %v714_v50 = vpop.xlane.xlu0 %713 }
 0x25b   : > { %vm724_vm13 = vcmp.ge.f32.partialorder %v3929_v32, %v714_v50  ;;  %v733_v51 = vsel %vm725_vm12, %v3937_v4, 64.0 }
 0x25c   : > { %v755_v52 = vsel %vm285_vm3, %v733_v51, inf  ;;  %v732_v53 = vsel %vm724_vm13, %v3937_v4, 64.0 }
 0x25d   : > { %756 = vmin.xlane.f32.xlu1 %v755_v52  ;;  %v752_v54 = vsel %vm285_vm3, %v732_v53, inf }
 0x25e   : > { %753 = vmin.xlane.f32.xlu0 %v752_v54 }
 0x2de   : > { %v739_v61 = vpop.xlane.xlu1 %738 }
 0x2df   : > { %vm759_vm14 = vcmp.eq.f32.partialorder %v3937_v4, %v739_v61  ;;  %v736_v62 = vpop.xlane.xlu0 %735  ;;  %v578_v61 = vld [vmem:[%s5038_s2 + $0x28] sm:$0xff] }
 0x2e0   : > { %v2878_v6 = vsel %vm759_vm14, 1.0, %v3736_v5  ;;  %vm758_vm15 = vcmp.eq.f32.partialorder %v3937_v4, %v736_v62  ;;  %v579_v62 = vld [vmem:[%s5038_s2 + $0x30] sm:$0xff] }
 0x2e1   : > { %v2877_v7 = vsel %vm758_vm15, 1.0, %v3736_v5  ;;  %vm916_vm1 = vcmp.gt.f32.partialorder %v2878_v6, 0.0 }
 0x2e2   : > { %v3463_v11 = vpack.c.bf16 %v2878_v6, %v2877_v7  ;;  %v745_v12 = vpop.xlane.xlu1 %744  ;;  %v3988_v15 = vsel %vm916_vm1, -1e+30, %v3903_v63  ;;  %vm915_vm4 = vcmp.gt.f32.partialorder %v2877_v7, 0.0  ;;  %v583_v6 = vpack.c.bf16 %v578_v61, %v577_v60  ;;  %v580_v7 = vld [vmem:[%s5038_s2 + $0x38] sm:$0xff] }
 0x2e3   : > { %vm761_vm5 = vcmp.eq.f32.partialorder %v3937_v4, %v745_v12  ;;  %v742_v18 = vpop.xlane.xlu0 %741  ;;  %v934_v19 = vsel %vm285_vm3, %v3988_v15, -inf  ;;  %v3994_v20 = vsel %vm915_vm4, -1e+30, %v3905_v1 }
 0x2e4   : > { %v2880_v21 = vsel %vm761_vm5, 1.0, %v3736_v5  ;;  %vm760_vm6 = vcmp.eq.f32.partialorder %v3937_v4, %v742_v18  ;;  %935 = vmax.xlane.f32.xlu1 %v934_v19  ;;  %3465 = vmatprep.subr.msk.bf16.mxu1 %vm3983_vm2, %v3463_v11  ;;  %v931_v63 = vsel %vm285_vm3, %v3994_v20, -inf }
 0x2e5   : > { %v2879_v22 = vsel %vm760_vm6, 1.0, %v3736_v5  ;;  %932 = vmax.xlane.f32.xlu0 %v931_v63  ;;  %3468 = vmatpush3.bf16.xpose.msk.msra.mxu1 %vm3983_vm2, %v3463_v11  ;;  %vm918_vm7 = vcmp.gt.f32.partialorder %v2880_v21, 0.0  ;;  %v584_v11 = vpack.c.bf16 %v580_v7, %v579_v62 }
 0x2e6   : > { %v3469_v1 = vpack.c.bf16 %v2880_v21, %v2879_v22  ;;  %v751_v25 = vpop.xlane.xlu1 %750  ;;  %v4006_v26 = vsel %vm918_vm7, -1e+30, %v3911_v13  ;;  %vm917_vm8 = vcmp.gt.f32.partialorder %v2879_v22, 0.0  ;;  %3229 = vmatprep.mubr.msk.bf16.mxu1 %vm315_vm0, %v583_v6 }
 0x2e7   : > { %vm763_vm9 = vcmp.eq.f32.partialorder %v3937_v4, %v751_v25  ;;  %v748_v27 = vpop.xlane.xlu0 %747  ;;  %v940_v28 = vsel %vm285_vm3, %v4006_v26, -inf  ;;  %v4012_v29 = vsel %vm917_vm8, -1e+30, %v3913_v14  ;;  %3230 = vmatmul.mubr.msk.bf16.gmra.mrb[4].mxu1 %vm315_vm0, %v584_v11 }
 0x2e8   : > { %v2882_v30 = vsel %vm763_vm9, 1.0, %v3736_v5  ;;  %vm762_vm10 = vcmp.eq.f32.partialorder %v3937_v4, %v748_v27  ;;  %941 = vmax.xlane.f32.xlu1 %v940_v28  ;;  %3471 = vmatprep.subr.msk.bf16.mxu1 %vm3983_vm2, %v3469_v1  ;;  %v937_v13 = vsel %vm285_vm3, %v4012_v29, -inf }
 0x2e9   : > { %v2881_v2 = vsel %vm762_vm10, 1.0, %v3736_v5  ;;  %938 = vmax.xlane.f32.xlu0 %v937_v13  ;;  %vm920_vm11 = vcmp.gt.f32.partialorder %v2882_v30, 0.0 }
 0x2ea   : > { %v757_v33 = vpop.xlane.xlu1 %756  ;;  %v4022_v34 = vsel %vm920_vm11, -1e+30, %v3919_v23  ;;  %vm919_vm12 = vcmp.gt.f32.partialorder %v2881_v2, 0.0  ;;  %v3475_v36 = vpack.c.bf16 %v2882_v30, %v2881_v2 }
 0x2eb   : > { %vm765_vm13 = vcmp.eq.f32.partialorder %v3937_v4, %v757_v33  ;;  %v754_v14 = vpop.xlane.xlu0 %753  ;;  %v946_v35 = vsel %vm285_vm3, %v4022_v34, -inf  ;;  %v4028_v3 = vsel %vm919_vm12, -1e+30, %v3921_v24 }
 0x2ec   : > { %v2884_v37 = vsel %vm765_vm13, 1.0, %v3736_v5  ;;  %vm764_vm14 = vcmp.eq.f32.partialorder %v3937_v4, %v754_v14  ;;  %947 = vmax.xlane.f32.xlu1 %v946_v35  ;;  %v943_v23 = vsel %vm285_vm3, %v4028_v3, -inf }
 0x2ed   : > { %v2883_v0 = vsel %vm764_vm14, 1.0, %v3736_v5  ;;  %3474 = vmatpush3.bf16.xpose.msk.msra.mxu1 %vm3983_vm2, %v3469_v1  ;;  %944 = vmax.xlane.f32.xlu0 %v943_v23  ;;  %vm922_vm15 = vcmp.gt.f32.partialorder %v2884_v37, 0.0 }
 0x2ee   : > { %3477 = vmatprep.subr.msk.bf16.mxu1 %vm3983_vm2, %v3475_v36  ;;  %v4040_v24 = vsel %vm922_vm15, -1e+30, %v3927_v31  ;;  %vm921_vm1 = vcmp.gt.f32.partialorder %v2883_v0, 0.0  ;;  %v3481_v8 = vpack.c.bf16 %v2884_v37, %v2883_v0 }
 0x2ef   : > { %v952_v38 = vsel %vm285_vm3, %v4040_v24, -inf  ;;  %v4045_v39 = vsel %vm921_vm1, -1e+30, %v3929_v32 }
 0x2f0   : > { %953 = vmax.xlane.f32.xlu1 %v952_v38  ;;  %v949_v40 = vsel %vm285_vm3, %v4045_v39, -inf }
 0x2f1   : > { %950 = vmax.xlane.f32.xlu0 %v949_v40 }
 0x2f5   : > { %3480 = vmatpush3.bf16.xpose.msk.msra.mxu1 %vm3983_vm2, %v3475_v36 }
 0x2f6   : > { %3483 = vmatprep.subr.msk.bf16.mxu1 %vm3983_vm2, %v3481_v8 }
 0x2fd   : > { %3486 = vmatpush3.bf16.xpose.msk.msra.mxu1 %vm3983_vm2, %v3481_v8 }
 0x371   : > { %v936_v31 = vpop.xlane.xlu1 %935 }
 0x372   : > { %vm956_vm4 = vcmp.ge.f32.partialorder %v3988_v15, %v936_v31  ;;  %v933_v32 = vpop.xlane.xlu0 %932 }
 0x373   : > { %vm955_vm5 = vcmp.ge.f32.partialorder %v3994_v20, %v933_v32  ;;  %v964_v10 = vsel %vm956_vm4, %v3937_v4, 64.0 }
 0x374   : > { %v974_v16 = vsel %vm285_vm3, %v964_v10, inf  ;;  %v963_v17 = vsel %vm955_vm5, %v3937_v4, 64.0 }
 0x375   : > { %975 = vmin.xlane.f32.xlu1 %v974_v16  ;;  %v942_v41 = vpop.xlane.xlu1 %941  ;;  %v971_v42 = vsel %vm285_vm3, %v963_v17, inf }
 0x376   : > { %vm958_vm6 = vcmp.ge.f32.partialorder %v4006_v26, %v942_v41  ;;  %972 = vmin.xlane.f32.xlu0 %v971_v42  ;;  %v939_v43 = vpop.xlane.xlu0 %938 }
 0x377   : > { %vm957_vm7 = vcmp.ge.f32.partialorder %v4012_v29, %v939_v43  ;;  %v966_v44 = vsel %vm958_vm6, %v3937_v4, 64.0 }
 0x378   : > { %v980_v45 = vsel %vm285_vm3, %v966_v44, inf  ;;  %v965_v46 = vsel %vm957_vm7, %v3937_v4, 64.0 }
 0x379   : > { %981 = vmin.xlane.f32.xlu1 %v980_v45  ;;  %v948_v47 = vpop.xlane.xlu1 %947  ;;  %v977_v48 = vsel %vm285_vm3, %v965_v46, inf }
 0x37a   : > { %vm960_vm8 = vcmp.ge.f32.partialorder %v4022_v34, %v948_v47  ;;  %978 = vmin.xlane.f32.xlu0 %v977_v48  ;;  %v945_v49 = vpop.xlane.xlu0 %944 }
 0x37b   : > { %vm959_vm9 = vcmp.ge.f32.partialorder %v4028_v3, %v945_v49  ;;  %v968_v50 = vsel %vm960_vm8, %v3937_v4, 64.0 }
 0x37c   : > { %v986_v51 = vsel %vm285_vm3, %v968_v50, inf  ;;  %v967_v52 = vsel %vm959_vm9, %v3937_v4, 64.0 }
 0x37d   : > { %987 = vmin.xlane.f32.xlu1 %v986_v51  ;;  %v954_v53 = vpop.xlane.xlu1 %953  ;;  %v983_v54 = vsel %vm285_vm3, %v967_v52, inf }
 0x37e   : > { %vm962_vm10 = vcmp.ge.f32.partialorder %v4040_v24, %v954_v53  ;;  %984 = vmin.xlane.f32.xlu0 %v983_v54  ;;  %v951_v55 = vpop.xlane.xlu0 %950 }
 0x37f   : > { %vm961_vm11 = vcmp.ge.f32.partialorder %v4045_v39, %v951_v55  ;;  %v970_v56 = vsel %vm962_vm10, %v3937_v4, 64.0 }
 0x380   : > { %v992_v57 = vsel %vm285_vm3, %v970_v56, inf  ;;  %v969_v58 = vsel %vm961_vm11, %v3937_v4, 64.0 }
 0x381   : > { %993 = vmin.xlane.f32.xlu1 %v992_v57  ;;  %v989_v59 = vsel %vm285_vm3, %v969_v58, inf }
 0x382   : > { %990 = vmin.xlane.f32.xlu0 %v989_v59 }
 0x402   : > { %v976_v12 = vpop.xlane.xlu1 %975 }
 0x403   : > { %vm996_vm12 = vcmp.eq.f32.partialorder %v3937_v4, %v976_v12  ;;  %v973_v18 = vpop.xlane.xlu0 %972 }
 0x404   : > { %v2898_v19 = vsel %vm996_vm12, 1.0, %v3736_v5  ;;  %vm995_vm13 = vcmp.eq.f32.partialorder %v3937_v4, %v973_v18 }
 0x405   : > { %v2897_v21 = vsel %vm995_vm13, 1.0, %v3736_v5  ;;  %vm1141_vm14 = vcmp.gt.f32.partialorder %v2898_v19, 0.0 }
 0x406   : > { %v3487_v63 = vpack.c.bf16 %v2898_v19, %v2897_v21  ;;  %v982_v22 = vpop.xlane.xlu1 %981  ;;  %v4098_v1 = vsel %vm1141_vm14, -1e+30, %v3988_v15  ;;  %vm1140_vm15 = vcmp.gt.f32.partialorder %v2897_v21, 0.0 }
 0x407   : > { %vm998_vm1 = vcmp.eq.f32.partialorder %v3937_v4, %v982_v22  ;;  %v979_v25 = vpop.xlane.xlu0 %978  ;;  %v1159_v27 = vsel %vm285_vm3, %v4098_v1, -inf  ;;  %v4104_v28 = vsel %vm1140_vm15, -1e+30, %v3994_v20 }
 0x408   : > { %v2900_v30 = vsel %vm998_vm1, 1.0, %v3736_v5  ;;  %vm997_vm0 = vcmp.eq.f32.partialorder %v3937_v4, %v979_v25  ;;  %1160 = vmax.xlane.f32.xlu1 %v1159_v27  ;;  %3489 = vmatprep.subr.msk.bf16.mxu0 %vm3983_vm2, %v3487_v63  ;;  %v1156_v15 = vsel %vm285_vm3, %v4104_v28, -inf }
 0x409   : > { %v2899_v13 = vsel %vm997_vm0, 1.0, %v3736_v5  ;;  %1157 = vmax.xlane.f32.xlu0 %v1156_v15  ;;  %3492 = vmatpush3.bf16.xpose.msk.msra.mxu0 %vm3983_vm2, %v3487_v63  ;;  %vm1143_vm4 = vcmp.gt.f32.partialorder %v2900_v30, 0.0 }
 0x40a   : > { %v3493_v20 = vpack.c.bf16 %v2900_v30, %v2899_v13  ;;  %v988_v2 = vpop.xlane.xlu1 %987  ;;  %v4116_v33 = vsel %vm1143_vm4, -1e+30, %v4006_v26  ;;  %vm1142_vm5 = vcmp.gt.f32.partialorder %v2899_v13, 0.0 }
 0x40b   : > { %vm1000_vm6 = vcmp.eq.f32.partialorder %v3937_v4, %v988_v2  ;;  %v985_v14 = vpop.xlane.xlu0 %984  ;;  %v1165_v35 = vsel %vm285_vm3, %v4116_v33, -inf  ;;  %v4122_v36 = vsel %vm1142_vm5, -1e+30, %v4012_v29 }
 0x40c   : > { %v2902_v37 = vsel %vm1000_vm6, 1.0, %v3736_v5  ;;  %vm999_vm7 = vcmp.eq.f32.partialorder %v3937_v4, %v985_v14  ;;  %1166 = vmax.xlane.f32.xlu1 %v1165_v35  ;;  %3495 = vmatprep.subr.msk.bf16.mxu0 %vm3983_vm2, %v3493_v20  ;;  %v1162_v26 = vsel %vm285_vm3, %v4122_v36, -inf }
 0x40d   : > { %v2901_v23 = vsel %vm999_vm7, 1.0, %v3736_v5  ;;  %1163 = vmax.xlane.f32.xlu0 %v1162_v26  ;;  %vm1145_vm8 = vcmp.gt.f32.partialorder %v2902_v37, 0.0 }
 0x40e   : > { %v994_v0 = vpop.xlane.xlu1 %993  ;;  %v4132_v38 = vsel %vm1145_vm8, -1e+30, %v4022_v34  ;;  %vm1144_vm9 = vcmp.gt.f32.partialorder %v2901_v23, 0.0  ;;  %v3499_v31 = vpack.c.bf16 %v2902_v37, %v2901_v23 }
 0x40f   : > { %vm1002_vm10 = vcmp.eq.f32.partialorder %v3937_v4, %v994_v0  ;;  %v991_v29 = vpop.xlane.xlu0 %990  ;;  %v1171_v40 = vsel %vm285_vm3, %v4132_v38, -inf  ;;  %v4138_v8 = vsel %vm1144_vm9, -1e+30, %v4028_v3 }
 0x410   : > { %v2904_v32 = vsel %vm1002_vm10, 1.0, %v3736_v5  ;;  %vm1001_vm11 = vcmp.eq.f32.partialorder %v3937_v4, %v991_v29  ;;  %1172 = vmax.xlane.f32.xlu1 %v1171_v40  ;;  %v1168_v34 = vsel %vm285_vm3, %v4138_v8, -inf }
 0x411   : > { %v2903_v10 = vsel %vm1001_vm11, 1.0, %v3736_v5  ;;  %3498 = vmatpush3.bf16.xpose.msk.msra.mxu0 %vm3983_vm2, %v3493_v20  ;;  %1169 = vmax.xlane.f32.xlu0 %v1168_v34  ;;  %vm1147_vm12 = vcmp.gt.f32.partialorder %v2904_v32, 0.0 }
 0x412   : > { %3501 = vmatprep.subr.msk.bf16.mxu0 %vm3983_vm2, %v3499_v31  ;;  %v4150_v3 = vsel %vm1147_vm12, -1e+30, %v4040_v24  ;;  %vm1146_vm13 = vcmp.gt.f32.partialorder %v2903_v10, 0.0  ;;  %v3505_v42 = vpack.c.bf16 %v2904_v32, %v2903_v10  ;;  %v4165_v24 = vpop.f32.mrb[0].mxu1 }
 0x413   : > { %v1177_v16 = vsel %vm285_vm3, %v4150_v3, -inf  ;;  %v4155_v17 = vsel %vm1146_vm13, -1e+30, %v4045_v39  ;;  %v4167_v43 = vpop.f32.mrb[1].mxu1 }
 0x414   : > { %1178 = vmax.xlane.f32.xlu1 %v1177_v16  ;;  %v1174_v41 = vsel %vm285_vm3, %v4155_v17, -inf  ;;  %v4193_v18 = vpop.f32.mrb[2].mxu1 }
 0x415   : > { %1175 = vmax.xlane.f32.xlu0 %v1174_v41  ;;  %v4195_v19 = vpop.f32.mrb[3].mxu1 }
 0x416   : > { %v4197_v21 = vpop.f32.mrb[4].mxu1 }
 0x417   : > { %v4199_v63 = vpop.f32.mrb[5].mxu1 }
 0x418   : > { %v4201_v22 = vpop.f32.mrb[6].mxu1  ;;  %3249 = vmatprep.mubr.msk.f32.mxu1 %vm285_vm3, %v4199_v63  ;;  %3271 = vmatprep.mubr.msk.f32.mxu0 %vm285_vm3, %v4199_v63 }
 0x419   : > { %3504 = vmatpush3.bf16.xpose.msk.msra.mxu0 %vm3983_vm2, %v3499_v31  ;;  %v4207_v25 = vpop.f32.mrb[7].mxu1 }
 0x41a   : > { %3507 = vmatprep.subr.msk.bf16.mxu0 %vm3983_vm2, %v3505_v42  ;;  %3250 = vmatmul.mubr.msk.f32.vlgmr.msra.gmra.mrb[8].mxu1 %vm285_vm3, %v4207_v25 }
 0x41b   : > { %3252 = vmatprep.mubr.msk.f32.mxu1 %vm285_vm3, %v4197_v21 }
 0x41e   : > { %3253 = vmatmul.mubr.msk.f32.gmra.mrb[10].mxu1 %vm285_vm3, %v4201_v22 }
 0x41f   : > { %3293 = vmatprep.mubr.msk.f32.mxu1 %vm285_vm3, %v4199_v63 }
 0x421   : > { %3510 = vmatpush3.bf16.xpose.msk.msra.mxu0 %vm3983_vm2, %v3505_v42 }
 0x428   : > { %3272 = vmatmul.mubr.msk.f32.vlgmr.msra.gmra.mrb[8].mxu0 %vm285_vm3, %v4207_v25 }
 0x429   : > { %3274 = vmatprep.mubr.msk.f32.mxu0 %vm285_vm3, %v4197_v21 }
 0x42c   : > { %3275 = vmatmul.mubr.msk.f32.gmra.mrb[10].mxu0 %vm285_vm3, %v4201_v22 }
 0x42d   : > { %3315 = vmatprep.mubr.msk.f32.mxu0 %vm285_vm3, %v4199_v63 }
 0x495   : > { %v1161_v39 = vpop.xlane.xlu1 %1160 }
 0x496   : > { %vm1181_vm14 = vcmp.ge.f32.partialorder %v4098_v1, %v1161_v39  ;;  %v1158_v44 = vpop.xlane.xlu0 %1157 }
 0x497   : > { %vm1180_vm15 = vcmp.ge.f32.partialorder %v4104_v28, %v1158_v44  ;;  %v1189_v45 = vsel %vm1181_vm14, %v3937_v4, 64.0 }
 0x498   : > { %v1199_v46 = vsel %vm285_vm3, %v1189_v45, inf  ;;  %v1188_v47 = vsel %vm1180_vm15, %v3937_v4, 64.0 }
 0x499   : > { %1200 = vmin.xlane.f32.xlu1 %v1199_v46  ;;  %v1167_v48 = vpop.xlane.xlu1 %1166  ;;  %v1196_v49 = vsel %vm285_vm3, %v1188_v47, inf }
 0x49a   : > { %vm1183_vm1 = vcmp.ge.f32.partialorder %v4116_v33, %v1167_v48  ;;  %1197 = vmin.xlane.f32.xlu0 %v1196_v49  ;;  %v1164_v50 = vpop.xlane.xlu0 %1163 }
 0x49b   : > { %vm1182_vm0 = vcmp.ge.f32.partialorder %v4122_v36, %v1164_v50  ;;  %v1191_v51 = vsel %vm1183_vm1, %v3937_v4, 64.0 }
 0x49c   : > { %v1205_v52 = vsel %vm285_vm3, %v1191_v51, inf  ;;  %v1190_v53 = vsel %vm1182_vm0, %v3937_v4, 64.0 }
 0x49d   : > { %1206 = vmin.xlane.f32.xlu1 %v1205_v52  ;;  %v1173_v54 = vpop.xlane.xlu1 %1172  ;;  %v1202_v55 = vsel %vm285_vm3, %v1190_v53, inf }
 0x49e   : > { %vm1185_vm4 = vcmp.ge.f32.partialorder %v4132_v38, %v1173_v54  ;;  %1203 = vmin.xlane.f32.xlu0 %v1202_v55  ;;  %v1170_v56 = vpop.xlane.xlu0 %1169 }
 0x49f   : > { %vm1184_vm5 = vcmp.ge.f32.partialorder %v4138_v8, %v1170_v56  ;;  %v1193_v57 = vsel %vm1185_vm4, %v3937_v4, 64.0 }
 0x4a0   : > { %v1211_v58 = vsel %vm285_vm3, %v1193_v57, inf  ;;  %v1192_v59 = vsel %vm1184_vm5, %v3937_v4, 64.0 }
 0x4a1   : > { %1212 = vmin.xlane.f32.xlu1 %v1211_v58  ;;  %v1179_v60 = vpop.xlane.xlu1 %1178  ;;  %v1208_v61 = vsel %vm285_vm3, %v1192_v59, inf }
 0x4a2   : > { %vm1187_vm6 = vcmp.ge.f32.partialorder %v4150_v3, %v1179_v60  ;;  %1209 = vmin.xlane.f32.xlu0 %v1208_v61  ;;  %v1176_v62 = vpop.xlane.xlu0 %1175 }
 0x4a3   : > { %vm1186_vm7 = vcmp.ge.f32.partialorder %v4155_v17, %v1176_v62  ;;  %v1195_v6 = vsel %vm1187_vm6, %v3937_v4, 64.0 }
 0x4a4   : > { %v1217_v7 = vsel %vm285_vm3, %v1195_v6, inf  ;;  %v1194_v11 = vsel %vm1186_vm7, %v3937_v4, 64.0 }
 0x4a5   : > { %1218 = vmin.xlane.f32.xlu1 %v1217_v7  ;;  %v1214_v12 = vsel %vm285_vm3, %v1194_v11, inf }
 0x4a6   : > { %1215 = vmin.xlane.f32.xlu0 %v1214_v12 }
 0x526   : > { %v1201_v27 = vpop.xlane.xlu1 %1200 }
 0x527   : > { %vm1221_vm8 = vcmp.eq.f32.partialorder %v3937_v4, %v1201_v27  ;;  %v1198_v30 = vpop.xlane.xlu0 %1197 }
 0x528   : > { %v2918_v15 = vsel %vm1221_vm8, 1.0, %v3736_v5  ;;  %vm1220_vm9 = vcmp.eq.f32.partialorder %v3937_v4, %v1198_v30 }
 0x529   : > { %v2917_v13 = vsel %vm1220_vm9, 1.0, %v3736_v5  ;;  %vm1366_vm10 = vcmp.gt.f32.partialorder %v2918_v15, 0.0 }
 0x52a   : > { %v3511_v20 = vpack.c.bf16 %v2918_v15, %v2917_v13  ;;  %v1207_v2 = vpop.xlane.xlu1 %1206  ;;  %v4230_v14 = vsel %vm1366_vm10, -1e+30, %v4098_v1  ;;  %vm1365_vm11 = vcmp.gt.f32.partialorder %v2917_v13, 0.0 }
 0x52b   : > { %vm1223_vm12 = vcmp.eq.f32.partialorder %v3937_v4, %v1207_v2  ;;  %v1204_v35 = vpop.xlane.xlu0 %1203  ;;  %v1384_v37 = vsel %vm285_vm3, %v4230_v14, -inf  ;;  %v4236_v26 = vsel %vm1365_vm11, -1e+30, %v4104_v28 }
 0x52c   : > { %v2920_v23 = vsel %vm1223_vm12, 1.0, %v3736_v5  ;;  %vm1222_vm13 = vcmp.eq.f32.partialorder %v3937_v4, %v1204_v35  ;;  %1385 = vmax.xlane.f32.xlu1 %v1384_v37  ;;  %3513 = vmatprep.subr.msk.bf16.mxu1 %vm3983_vm2, %v3511_v20  ;;  %v1381_v1 = vsel %vm285_vm3, %v4236_v26, -inf }
 0x52d   : > { %v2919_v0 = vsel %vm1222_vm13, 1.0, %v3736_v5  ;;  %1382 = vmax.xlane.f32.xlu0 %v1381_v1  ;;  %3516 = vmatpush3.bf16.xpose.msk.msra.mxu1 %vm3983_vm2, %v3511_v20  ;;  %vm1368_vm14 = vcmp.gt.f32.partialorder %v2920_v23, 0.0 }
 0x52e   : > { %v3517_v28 = vpack.c.bf16 %v2920_v23, %v2919_v0  ;;  %v1213_v29 = vpop.xlane.xlu1 %1212  ;;  %v4248_v40 = vsel %vm1368_vm14, -1e+30, %v4116_v33  ;;  %vm1367_vm15 = vcmp.gt.f32.partialorder %v2919_v0, 0.0 }
 0x52f   : > { %vm1225_vm1 = vcmp.eq.f32.partialorder %v3937_v4, %v1213_v29  ;;  %v1210_v31 = vpop.xlane.xlu0 %1209  ;;  %v1390_v32 = vsel %vm285_vm3, %v4248_v40, -inf  ;;  %v4254_v34 = vsel %vm1367_vm15, -1e+30, %v4122_v36 }
 0x530   : > { %v2922_v10 = vsel %vm1225_vm1, 1.0, %v3736_v5  ;;  %vm1224_vm0 = vcmp.eq.f32.partialorder %v3937_v4, %v1210_v31  ;;  %1391 = vmax.xlane.f32.xlu1 %v1390_v32  ;;  %3519 = vmatprep.subr.msk.bf16.mxu1 %vm3983_vm2, %v3517_v28  ;;  %v1387_v33 = vsel %vm285_vm3, %v4254_v34, -inf }
 0x531   : > { %v2921_v16 = vsel %vm1224_vm0, 1.0, %v3736_v5  ;;  %1388 = vmax.xlane.f32.xlu0 %v1387_v33  ;;  %vm1370_vm4 = vcmp.gt.f32.partialorder %v2922_v10, 0.0 }
 0x532   : > { %v1219_v41 = vpop.xlane.xlu1 %1218  ;;  %v4264_v42 = vsel %vm1370_vm4, -1e+30, %v4132_v38  ;;  %vm1369_vm5 = vcmp.gt.f32.partialorder %v2921_v16, 0.0  ;;  %v3523_v45 = vpack.c.bf16 %v2922_v10, %v2921_v16 }
 0x533   : > { %vm1227_vm6 = vcmp.eq.f32.partialorder %v3937_v4, %v1219_v41  ;;  %v1216_v36 = vpop.xlane.xlu0 %1215  ;;  %v1396_v39 = vsel %vm285_vm3, %v4264_v42, -inf  ;;  %v4270_v44 = vsel %vm1369_vm5, -1e+30, %v4138_v8 }
 0x534   : > { %v2924_v46 = vsel %vm1227_vm6, 1.0, %v3736_v5  ;;  %vm1226_vm7 = vcmp.eq.f32.partialorder %v3937_v4, %v1216_v36  ;;  %1397 = vmax.xlane.f32.xlu1 %v1396_v39  ;;  %v1393_v38 = vsel %vm285_vm3, %v4270_v44, -inf }
 0x535   : > { %v2923_v47 = vsel %vm1226_vm7, 1.0, %v3736_v5  ;;  %3522 = vmatpush3.bf16.xpose.msk.msra.mxu1 %vm3983_vm2, %v3517_v28  ;;  %1394 = vmax.xlane.f32.xlu0 %v1393_v38  ;;  %vm1372_vm8 = vcmp.gt.f32.partialorder %v2924_v46, 0.0 }
 0x536   : > { %3525 = vmatprep.subr.msk.bf16.mxu1 %vm3983_vm2, %v3523_v45  ;;  %v4282_v8 = vsel %vm1372_vm8, -1e+30, %v4150_v3  ;;  %vm1371_vm9 = vcmp.gt.f32.partialorder %v2923_v47, 0.0  ;;  %v3529_v51 = vpack.c.bf16 %v2924_v46, %v2923_v47 }
 0x537   : > { %v1402_v48 = vsel %vm285_vm3, %v4282_v8, -inf  ;;  %v4287_v49 = vsel %vm1371_vm9, -1e+30, %v4155_v17 }
 0x538   : > { %1403 = vmax.xlane.f32.xlu1 %v1402_v48  ;;  %v1399_v50 = vsel %vm285_vm3, %v4287_v49, -inf }
 0x539   : > { %1400 = vmax.xlane.f32.xlu0 %v1399_v50 }
 0x53d   : > { %3528 = vmatpush3.bf16.xpose.msk.msra.mxu1 %vm3983_vm2, %v3523_v45 }
 0x53e   : > { %3531 = vmatprep.subr.msk.bf16.mxu1 %vm3983_vm2, %v3529_v51 }
 0x545   : > { %3534 = vmatpush3.bf16.xpose.msk.msra.mxu1 %vm3983_vm2, %v3529_v51 }
 0x54c   : > { %3294 = vmatmul.mubr.msk.f32.vlgmr.msra.gmra.mrb[12].mxu1 %vm285_vm3, %v4207_v25 }
 0x54d   : > { %3296 = vmatprep.mubr.msk.f32.mxu1 %vm285_vm3, %v4197_v21 }
 0x550   : > { %3297 = vmatmul.mubr.msk.f32.gmra.mrb[14].mxu1 %vm285_vm3, %v4201_v22 }
 0x551   : > { %3337 = vmatprep.mubr.msk.f32.mxu1 %vm285_vm3, %v4199_v63 }
 0x5b9   : > { %v1386_v3 = vpop.xlane.xlu1 %1385 }
 0x5ba   : > { %vm1406_vm10 = vcmp.ge.f32.partialorder %v4230_v14, %v1386_v3  ;;  %v1383_v17 = vpop.xlane.xlu0 %1382 }
 0x5bb   : > { %vm1405_vm11 = vcmp.ge.f32.partialorder %v4236_v26, %v1383_v17  ;;  %v1414_v52 = vsel %vm1406_vm10, %v3937_v4, 64.0 }
 0x5bc   : > { %v1424_v53 = vsel %vm285_vm3, %v1414_v52, inf  ;;  %v1413_v54 = vsel %vm1405_vm11, %v3937_v4, 64.0 }
 0x5bd   : > { %1425 = vmin.xlane.f32.xlu1 %v1424_v53  ;;  %v1392_v55 = vpop.xlane.xlu1 %1391  ;;  %v1421_v56 = vsel %vm285_vm3, %v1413_v54, inf }
 0x5be   : > { %vm1408_vm12 = vcmp.ge.f32.partialorder %v4248_v40, %v1392_v55  ;;  %1422 = vmin.xlane.f32.xlu0 %v1421_v56  ;;  %v1389_v57 = vpop.xlane.xlu0 %1388 }
 0x5bf   : > { %vm1407_vm13 = vcmp.ge.f32.partialorder %v4254_v34, %v1389_v57  ;;  %v1416_v58 = vsel %vm1408_vm12, %v3937_v4, 64.0 }
 0x5c0   : > { %v1430_v59 = vsel %vm285_vm3, %v1416_v58, inf  ;;  %v1415_v60 = vsel %vm1407_vm13, %v3937_v4, 64.0 }
 0x5c1   : > { %1431 = vmin.xlane.f32.xlu1 %v1430_v59  ;;  %v1398_v61 = vpop.xlane.xlu1 %1397  ;;  %v1427_v62 = vsel %vm285_vm3, %v1415_v60, inf }
 0x5c2   : > { %vm1410_vm14 = vcmp.ge.f32.partialorder %v4264_v42, %v1398_v61  ;;  %1428 = vmin.xlane.f32.xlu0 %v1427_v62  ;;  %v1395_v6 = vpop.xlane.xlu0 %1394 }
 0x5c3   : > { %vm1409_vm15 = vcmp.ge.f32.partialorder %v4270_v44, %v1395_v6  ;;  %v1418_v7 = vsel %vm1410_vm14, %v3937_v4, 64.0 }
 0x5c4   : > { %v1436_v11 = vsel %vm285_vm3, %v1418_v7, inf  ;;  %v1417_v12 = vsel %vm1409_vm15, %v3937_v4, 64.0 }
 0x5c5   : > { %1437 = vmin.xlane.f32.xlu1 %v1436_v11  ;;  %v1404_v27 = vpop.xlane.xlu1 %1403  ;;  %v1433_v30 = vsel %vm285_vm3, %v1417_v12, inf }
 0x5c6   : > { %vm1412_vm1 = vcmp.ge.f32.partialorder %v4282_v8, %v1404_v27  ;;  %1434 = vmin.xlane.f32.xlu0 %v1433_v30  ;;  %v1401_v15 = vpop.xlane.xlu0 %1400 }
 0x5c7   : > { %vm1411_vm0 = vcmp.ge.f32.partialorder %v4287_v49, %v1401_v15  ;;  %v1420_v13 = vsel %vm1412_vm1, %v3937_v4, 64.0 }
 0x5c8   : > { %v1442_v20 = vsel %vm285_vm3, %v1420_v13, inf  ;;  %v1419_v2 = vsel %vm1411_vm0, %v3937_v4, 64.0 }
 0x5c9   : > { %1443 = vmin.xlane.f32.xlu1 %v1442_v20  ;;  %v1439_v35 = vsel %vm285_vm3, %v1419_v2, inf }
 0x5ca   : > { %1440 = vmin.xlane.f32.xlu0 %v1439_v35 }
 0x64a   : > { %v1426_v37 = vpop.xlane.xlu1 %1425 }
 0x64b   : > { %vm1446_vm4 = vcmp.eq.f32.partialorder %v3937_v4, %v1426_v37  ;;  %v1423_v23 = vpop.xlane.xlu0 %1422 }
 0x64c   : > { %v2938_v1 = vsel %vm1446_vm4, 1.0, %v3736_v5  ;;  %vm1445_vm5 = vcmp.eq.f32.partialorder %v3937_v4, %v1423_v23 }
 0x64d   : > { %vm1591_vm6 = vcmp.gt.f32.partialorder %v2938_v1, 0.0  ;;  %v2937_v0 = vsel %vm1445_vm5, 1.0, %v3736_v5 }
 0x64e   : > { %v3535_v28 = vpack.c.bf16 %v2938_v1, %v2937_v0  ;;  %vm1590_vm7 = vcmp.gt.f32.partialorder %v2937_v0, 0.0  ;;  %v1432_v29 = vpop.xlane.xlu1 %1431  ;;  %v4334_v31 = vsel %vm1591_vm6, -1e+30, %v4230_v14 }
 0x64f   : > { %vm1448_vm8 = vcmp.eq.f32.partialorder %v3937_v4, %v1432_v29  ;;  %v1429_v32 = vpop.xlane.xlu0 %1428  ;;  %v1609_v10 = vsel %vm285_vm3, %v4334_v31, -inf  ;;  %v4340_v33 = vsel %vm1590_vm7, -1e+30, %v4236_v26 }
 0x650   : > { %v2940_v16 = vsel %vm1448_vm8, 1.0, %v3736_v5  ;;  %vm1447_vm9 = vcmp.eq.f32.partialorder %v3937_v4, %v1429_v32  ;;  %1610 = vmax.xlane.f32.xlu1 %v1609_v10  ;;  %3537 = vmatprep.subr.msk.bf16.mxu0 %vm3983_vm2, %v3535_v28  ;;  %v1606_v14 = vsel %vm285_vm3, %v4340_v33, -inf }
 0x651   : > { %vm1593_vm10 = vcmp.gt.f32.partialorder %v2940_v16, 0.0  ;;  %v2939_v41 = vsel %vm1447_vm9, 1.0, %v3736_v5  ;;  %1607 = vmax.xlane.f32.xlu0 %v1606_v14  ;;  %3540 = vmatpush3.bf16.xpose.msk.msra.mxu0 %vm3983_vm2, %v3535_v28 }
 0x652   : > { %v3541_v26 = vpack.c.bf16 %v2940_v16, %v2939_v41  ;;  %vm1592_vm11 = vcmp.gt.f32.partialorder %v2939_v41, 0.0  ;;  %v1438_v36 = vpop.xlane.xlu1 %1437  ;;  %v4352_v39 = vsel %vm1593_vm10, -1e+30, %v4248_v40 }
 0x653   : > { %vm1450_vm12 = vcmp.eq.f32.partialorder %v3937_v4, %v1438_v36  ;;  %v1435_v45 = vpop.xlane.xlu0 %1434  ;;  %v1615_v46 = vsel %vm285_vm3, %v4352_v39, -inf  ;;  %v4358_v38 = vsel %vm1592_vm11, -1e+30, %v4254_v34 }
 0x654   : > { %v2942_v47 = vsel %vm1450_vm12, 1.0, %v3736_v5  ;;  %vm1449_vm13 = vcmp.eq.f32.partialorder %v3937_v4, %v1435_v45  ;;  %1616 = vmax.xlane.f32.xlu1 %v1615_v46  ;;  %3543 = vmatprep.subr.msk.bf16.mxu0 %vm3983_vm2, %v3541_v26  ;;  %v1612_v40 = vsel %vm285_vm3, %v4358_v38, -inf }
 0x655   : > { %vm1595_vm14 = vcmp.gt.f32.partialorder %v2942_v47, 0.0  ;;  %v2941_v48 = vsel %vm1449_vm13, 1.0, %v3736_v5  ;;  %1613 = vmax.xlane.f32.xlu0 %v1612_v40 }
 0x656   : > { %vm1594_vm15 = vcmp.gt.f32.partialorder %v2941_v48, 0.0  ;;  %v1444_v50 = vpop.xlane.xlu1 %1443  ;;  %v4368_v34 = vsel %vm1595_vm14, -1e+30, %v4264_v42  ;;  %v3547_v52 = vpack.c.bf16 %v2942_v47, %v2941_v48 }
 0x657   : > { %vm1452_vm1 = vcmp.eq.f32.partialorder %v3937_v4, %v1444_v50  ;;  %v1441_v51 = vpop.xlane.xlu0 %1440  ;;  %v1621_v3 = vsel %vm285_vm3, %v4368_v34, -inf  ;;  %v4374_v17 = vsel %vm1594_vm15, -1e+30, %v4270_v44 }
 0x658   : > { %v2944_v53 = vsel %vm1452_vm1, 1.0, %v3736_v5  ;;  %vm1451_vm0 = vcmp.eq.f32.partialorder %v3937_v4, %v1441_v51  ;;  %1622 = vmax.xlane.f32.xlu1 %v1621_v3  ;;  %v1618_v54 = vsel %vm285_vm3, %v4374_v17, -inf }
 0x659   : > { %vm1597_vm4 = vcmp.gt.f32.partialorder %v2944_v53, 0.0  ;;  %v2943_v42 = vsel %vm1451_vm0, 1.0, %v3736_v5  ;;  %3546 = vmatpush3.bf16.xpose.msk.msra.mxu0 %vm3983_vm2, %v3541_v26  ;;  %1619 = vmax.xlane.f32.xlu0 %v1618_v54 }
 0x65a   : > { %vm1596_vm5 = vcmp.gt.f32.partialorder %v2943_v42, 0.0  ;;  %3549 = vmatprep.subr.msk.bf16.mxu0 %vm3983_vm2, %v3547_v52  ;;  %v4386_v44 = vsel %vm1597_vm4, -1e+30, %v4282_v8  ;;  %v3553_v58 = vpack.c.bf16 %v2944_v53, %v2943_v42 }
 0x65b   : > { %v1627_v55 = vsel %vm285_vm3, %v4386_v44, -inf  ;;  %v4391_v56 = vsel %vm1596_vm5, -1e+30, %v4287_v49 }
 0x65c   : > { %1628 = vmax.xlane.f32.xlu1 %v1627_v55  ;;  %v1624_v57 = vsel %vm285_vm3, %v4391_v56, -inf }
 0x65d   : > { %1625 = vmax.xlane.f32.xlu0 %v1624_v57 }
 0x661   : > { %3552 = vmatpush3.bf16.xpose.msk.msra.mxu0 %vm3983_vm2, %v3547_v52 }
 0x662   : > { %3555 = vmatprep.subr.msk.bf16.mxu0 %vm3983_vm2, %v3553_v58 }
 0x669   : > { %3558 = vmatpush3.bf16.xpose.msk.msra.mxu0 %vm3983_vm2, %v3553_v58 }
 0x670   : > { %3316 = vmatmul.mubr.msk.f32.vlgmr.msra.gmra.mrb[12].mxu0 %vm285_vm3, %v4207_v25 }
 0x671   : > { %3318 = vmatprep.mubr.msk.f32.mxu0 %vm285_vm3, %v4197_v21 }
 0x674   : > { %3319 = vmatmul.mubr.msk.f32.gmra.mrb[14].mxu0 %vm285_vm3, %v4201_v22 }
 0x675   : > { %3359 = vmatprep.mubr.msk.f32.mxu0 %vm285_vm3, %v4199_v63 }
 0x6dd   : > { %v1611_v8 = vpop.xlane.xlu1 %1610 }
 0x6de   : > { %vm1631_vm6 = vcmp.ge.f32.partialorder %v4334_v31, %v1611_v8  ;;  %v1608_v49 = vpop.xlane.xlu0 %1607 }
 0x6df   : > { %vm1630_vm7 = vcmp.ge.f32.partialorder %v4340_v33, %v1608_v49  ;;  %v1639_v59 = vsel %vm1631_vm6, %v3937_v4, 64.0 }
 0x6e0   : > { %v1649_v60 = vsel %vm285_vm3, %v1639_v59, inf  ;;  %v1638_v61 = vsel %vm1630_vm7, %v3937_v4, 64.0 }
 0x6e1   : > { %1650 = vmin.xlane.f32.xlu1 %v1649_v60  ;;  %v1617_v62 = vpop.xlane.xlu1 %1616  ;;  %v1646_v6 = vsel %vm285_vm3, %v1638_v61, inf }
 0x6e2   : > { %vm1633_vm8 = vcmp.ge.f32.partialorder %v4352_v39, %v1617_v62  ;;  %1647 = vmin.xlane.f32.xlu0 %v1646_v6  ;;  %v1614_v7 = vpop.xlane.xlu0 %1613 }
 0x6e3   : > { %vm1632_vm9 = vcmp.ge.f32.partialorder %v4358_v38, %v1614_v7  ;;  %v1641_v11 = vsel %vm1633_vm8, %v3937_v4, 64.0 }
 0x6e4   : > { %v1655_v12 = vsel %vm285_vm3, %v1641_v11, inf  ;;  %v1640_v27 = vsel %vm1632_vm9, %v3937_v4, 64.0 }
 0x6e5   : > { %1656 = vmin.xlane.f32.xlu1 %v1655_v12  ;;  %v1623_v30 = vpop.xlane.xlu1 %1622  ;;  %v1652_v15 = vsel %vm285_vm3, %v1640_v27, inf }
 0x6e6   : > { %vm1635_vm10 = vcmp.ge.f32.partialorder %v4368_v34, %v1623_v30  ;;  %1653 = vmin.xlane.f32.xlu0 %v1652_v15  ;;  %v1620_v13 = vpop.xlane.xlu0 %1619 }
 0x6e7   : > { %vm1634_vm11 = vcmp.ge.f32.partialorder %v4374_v17, %v1620_v13  ;;  %v1643_v20 = vsel %vm1635_vm10, %v3937_v4, 64.0 }
 0x6e8   : > { %v1661_v2 = vsel %vm285_vm3, %v1643_v20, inf  ;;  %v1642_v35 = vsel %vm1634_vm11, %v3937_v4, 64.0 }
 0x6e9   : > { %1662 = vmin.xlane.f32.xlu1 %v1661_v2  ;;  %v1629_v37 = vpop.xlane.xlu1 %1628  ;;  %v1658_v23 = vsel %vm285_vm3, %v1642_v35, inf }
 0x6ea   : > { %vm1637_vm12 = vcmp.ge.f32.partialorder %v4386_v44, %v1629_v37  ;;  %1659 = vmin.xlane.f32.xlu0 %v1658_v23  ;;  %v1626_v1 = vpop.xlane.xlu0 %1625 }
 0x6eb   : > { %vm1636_vm13 = vcmp.ge.f32.partialorder %v4391_v56, %v1626_v1  ;;  %v1645_v0 = vsel %vm1637_vm12, %v3937_v4, 64.0 }
 0x6ec   : > { %v1667_v28 = vsel %vm285_vm3, %v1645_v0, inf  ;;  %v1644_v29 = vsel %vm1636_vm13, %v3937_v4, 64.0 }
 0x6ed   : > { %1668 = vmin.xlane.f32.xlu1 %v1667_v28  ;;  %v1664_v32 = vsel %vm285_vm3, %v1644_v29, inf }
 0x6ee   : > { %1665 = vmin.xlane.f32.xlu0 %v1664_v32 }
 0x76e   : > { %v1651_v10 = vpop.xlane.xlu1 %1650 }
 0x76f   : > { %vm1671_vm14 = vcmp.eq.f32.partialorder %v3937_v4, %v1651_v10  ;;  %v1648_v16 = vpop.xlane.xlu0 %1647 }
 0x770   : > { %v2958_v14 = vsel %vm1671_vm14, 1.0, %v3736_v5  ;;  %vm1670_vm15 = vcmp.eq.f32.partialorder %v3937_v4, %v1648_v16 }
 0x771   : > { %vm1816_vm1 = vcmp.gt.f32.partialorder %v2958_v14, 0.0  ;;  %v2957_v41 = vsel %vm1670_vm15, 1.0, %v3736_v5 }
 0x772   : > { %v3559_v26 = vpack.c.bf16 %v2958_v14, %v2957_v41  ;;  %vm1815_vm0 = vcmp.gt.f32.partialorder %v2957_v41, 0.0  ;;  %v1657_v36 = vpop.xlane.xlu1 %1656  ;;  %v4438_v45 = vsel %vm1816_vm1, -1e+30, %v4334_v31 }
 0x773   : > { %vm1673_vm4 = vcmp.eq.f32.partialorder %v3937_v4, %v1657_v36  ;;  %v1654_v46 = vpop.xlane.xlu0 %1653  ;;  %v1834_v47 = vsel %vm285_vm3, %v4438_v45, -inf  ;;  %v4444_v40 = vsel %vm1815_vm0, -1e+30, %v4340_v33 }
 0x774   : > { %v2960_v48 = vsel %vm1673_vm4, 1.0, %v3736_v5  ;;  %vm1672_vm5 = vcmp.eq.f32.partialorder %v3937_v4, %v1654_v46  ;;  %1835 = vmax.xlane.f32.xlu1 %v1834_v47  ;;  %3561 = vmatprep.subr.msk.bf16.mxu1 %vm3983_vm2, %v3559_v26  ;;  %v1831_v31 = vsel %vm285_vm3, %v4444_v40, -inf }
 0x775   : > { %vm1818_vm6 = vcmp.gt.f32.partialorder %v2960_v48, 0.0  ;;  %v2959_v50 = vsel %vm1672_vm5, 1.0, %v3736_v5  ;;  %1832 = vmax.xlane.f32.xlu0 %v1831_v31  ;;  %3564 = vmatpush3.bf16.xpose.msk.msra.mxu1 %vm3983_vm2, %v3559_v26 }
 0x776   : > { %v3565_v33 = vpack.c.bf16 %v2960_v48, %v2959_v50  ;;  %vm1817_vm7 = vcmp.gt.f32.partialorder %v2959_v50, 0.0  ;;  %v1663_v51 = vpop.xlane.xlu1 %1662  ;;  %v4456_v3 = vsel %vm1818_vm6, -1e+30, %v4352_v39 }
 0x777   : > { %vm1675_vm8 = vcmp.eq.f32.partialorder %v3937_v4, %v1663_v51  ;;  %v1660_v52 = vpop.xlane.xlu0 %1659  ;;  %v1840_v53 = vsel %vm285_vm3, %v4456_v3, -inf  ;;  %v4462_v54 = vsel %vm1817_vm7, -1e+30, %v4358_v38 }
 0x778   : > { %v2962_v42 = vsel %vm1675_vm8, 1.0, %v3736_v5  ;;  %vm1674_vm9 = vcmp.eq.f32.partialorder %v3937_v4, %v1660_v52  ;;  %1841 = vmax.xlane.f32.xlu1 %v1840_v53  ;;  %3567 = vmatprep.subr.msk.bf16.mxu1 %vm3983_vm2, %v3565_v33  ;;  %v1837_v39 = vsel %vm285_vm3, %v4462_v54, -inf }
 0x779   : > { %vm1820_vm10 = vcmp.gt.f32.partialorder %v2962_v42, 0.0  ;;  %v2961_v55 = vsel %vm1674_vm9, 1.0, %v3736_v5  ;;  %1838 = vmax.xlane.f32.xlu0 %v1837_v39 }
 0x77a   : > { %vm1819_vm11 = vcmp.gt.f32.partialorder %v2961_v55, 0.0  ;;  %v1669_v57 = vpop.xlane.xlu1 %1668  ;;  %v4472_v38 = vsel %vm1820_vm10, -1e+30, %v4368_v34  ;;  %v3571_v59 = vpack.c.bf16 %v2962_v42, %v2961_v55 }
 0x77b   : > { %vm1677_vm12 = vcmp.eq.f32.partialorder %v3937_v4, %v1669_v57  ;;  %v1666_v58 = vpop.xlane.xlu0 %1665  ;;  %v1846_v8 = vsel %vm285_vm3, %v4472_v38, -inf  ;;  %v4478_v49 = vsel %vm1819_vm11, -1e+30, %v4374_v17 }
 0x77c   : > { %v2964_v60 = vsel %vm1677_vm12, 1.0, %v3736_v5  ;;  %vm1676_vm13 = vcmp.eq.f32.partialorder %v3937_v4, %v1666_v58  ;;  %1847 = vmax.xlane.f32.xlu1 %v1846_v8  ;;  %v1843_v61 = vsel %vm285_vm3, %v4478_v49, -inf }
 0x77d   : > { %vm1822_vm14 = vcmp.gt.f32.partialorder %v2964_v60, 0.0  ;;  %v2963_v34 = vsel %vm1676_vm13, 1.0, %v3736_v5  ;;  %3570 = vmatpush3.bf16.xpose.msk.msra.mxu1 %vm3983_vm2, %v3565_v33  ;;  %1844 = vmax.xlane.f32.xlu0 %v1843_v61 }
 0x77e   : > { %vm1821_vm15 = vcmp.gt.f32.partialorder %v2963_v34, 0.0  ;;  %3573 = vmatprep.subr.msk.bf16.mxu1 %vm3983_vm2, %v3571_v59  ;;  %v4490_v17 = vsel %vm1822_vm14, -1e+30, %v4386_v44  ;;  %v3577_v11 = vpack.c.bf16 %v2964_v60, %v2963_v34 }
 0x77f   : > { %v1852_v62 = vsel %vm285_vm3, %v4490_v17, -inf  ;;  %v4495_v6 = vsel %vm1821_vm15, -1e+30, %v4391_v56 }
 0x780   : > { %1853 = vmax.xlane.f32.xlu1 %v1852_v62  ;;  %v1849_v7 = vsel %vm285_vm3, %v4495_v6, -inf }
 0x781   : > { %1850 = vmax.xlane.f32.xlu0 %v1849_v7 }
 0x785   : > { %3576 = vmatpush3.bf16.xpose.msk.msra.mxu1 %vm3983_vm2, %v3571_v59 }
 0x786   : > { %3579 = vmatprep.subr.msk.bf16.mxu1 %vm3983_vm2, %v3577_v11 }
 0x78d   : > { %3582 = vmatpush3.bf16.xpose.msk.msra.mxu1 %vm3983_vm2, %v3577_v11 }
 0x794   : > { %3338 = vmatmul.mubr.msk.f32.vlgmr.msra.gmra.mrb[16].mxu1 %vm285_vm3, %v4207_v25 }
 0x795   : > { %3340 = vmatprep.mubr.msk.f32.mxu1 %vm285_vm3, %v4197_v21 }
 0x798   : > { %3341 = vmatmul.mubr.msk.f32.gmra.mrb[18].mxu1 %vm285_vm3, %v4201_v22 }
 0x799   : > { %3381 = vmatprep.mubr.msk.f32.mxu1 %vm285_vm3, %v4199_v63 }
 0x801   : > { %v1836_v44 = vpop.xlane.xlu1 %1835 }
 0x802   : > { %vm1856_vm1 = vcmp.ge.f32.partialorder %v4438_v45, %v1836_v44  ;;  %v1833_v56 = vpop.xlane.xlu0 %1832 }
 0x803   : > { %vm1855_vm0 = vcmp.ge.f32.partialorder %v4444_v40, %v1833_v56  ;;  %v1864_v12 = vsel %vm1856_vm1, %v3937_v4, 64.0 }
 0x804   : > { %v1874_v27 = vsel %vm285_vm3, %v1864_v12, inf  ;;  %v1863_v30 = vsel %vm1855_vm0, %v3937_v4, 64.0 }
 0x805   : > { %1875 = vmin.xlane.f32.xlu1 %v1874_v27  ;;  %v1842_v15 = vpop.xlane.xlu1 %1841  ;;  %v1871_v13 = vsel %vm285_vm3, %v1863_v30, inf }
 0x806   : > { %vm1858_vm4 = vcmp.ge.f32.partialorder %v4456_v3, %v1842_v15  ;;  %1872 = vmin.xlane.f32.xlu0 %v1871_v13  ;;  %v1839_v20 = vpop.xlane.xlu0 %1838 }
 0x807   : > { %v1866_v2 = vsel %vm1858_vm4, %v3937_v4, 64.0  ;;  %vm1857_vm5 = vcmp.ge.f32.partialorder %v4462_v54, %v1839_v20 }
 0x808   : > { %v1865_v35 = vsel %vm1857_vm5, %v3937_v4, 64.0  ;;  %v1880_v37 = vsel %vm285_vm3, %v1866_v2, inf }
 0x809   : > { %1881 = vmin.xlane.f32.xlu1 %v1880_v37  ;;  %v1848_v23 = vpop.xlane.xlu1 %1847  ;;  %v1877_v1 = vsel %vm285_vm3, %v1865_v35, inf }
 0x80a   : > { %vm1860_vm6 = vcmp.ge.f32.partialorder %v4472_v38, %v1848_v23  ;;  %1878 = vmin.xlane.f32.xlu0 %v1877_v1  ;;  %v1845_v0 = vpop.xlane.xlu0 %1844 }
 0x80b   : > { %v1868_v28 = vsel %vm1860_vm6, %v3937_v4, 64.0  ;;  %vm1859_vm7 = vcmp.ge.f32.partialorder %v4478_v49, %v1845_v0 }
 0x80c   : > { %v1867_v29 = vsel %vm1859_vm7, %v3937_v4, 64.0  ;;  %v1886_v32 = vsel %vm285_vm3, %v1868_v28, inf }
 0x80d   : > { %1887 = vmin.xlane.f32.xlu1 %v1886_v32  ;;  %v1854_v10 = vpop.xlane.xlu1 %1853  ;;  %v1883_v16 = vsel %vm285_vm3, %v1867_v29, inf }
 0x80e   : > { %vm1862_vm8 = vcmp.ge.f32.partialorder %v4490_v17, %v1854_v10  ;;  %1884 = vmin.xlane.f32.xlu0 %v1883_v16  ;;  %v1851_v14 = vpop.xlane.xlu0 %1850 }
 0x80f   : > { %v1870_v41 = vsel %vm1862_vm8, %v3937_v4, 64.0  ;;  %vm1861_vm9 = vcmp.ge.f32.partialorder %v4495_v6, %v1851_v14 }
 0x810   : > { %v1869_v26 = vsel %vm1861_vm9, %v3937_v4, 64.0  ;;  %v1892_v36 = vsel %vm285_vm3, %v1870_v41, inf }
 0x811   : > { %1893 = vmin.xlane.f32.xlu1 %v1892_v36  ;;  %v1889_v46 = vsel %vm285_vm3, %v1869_v26, inf }
 0x812   : > { %1890 = vmin.xlane.f32.xlu0 %v1889_v46 }
 0x892   : > { %v1876_v47 = vpop.xlane.xlu1 %1875 }
 0x893   : > { %vm1896_vm10 = vcmp.eq.f32.partialorder %v3937_v4, %v1876_v47  ;;  %v1873_v48 = vpop.xlane.xlu0 %1872 }
 0x894   : > { %v2978_v31 = vsel %vm1896_vm10, 1.0, %v3736_v5  ;;  %vm1895_vm11 = vcmp.eq.f32.partialorder %v3937_v4, %v1873_v48 }
 0x895   : > { %vm2041_vm12 = vcmp.gt.f32.partialorder %v2978_v31, 0.0  ;;  %v2977_v50 = vsel %vm1895_vm11, 1.0, %v3736_v5 }
 0x896   : > { %v4542_v33 = vsel %vm2041_vm12, -1e+30, %v4438_v45  ;;  %v3583_v51 = vpack.c.bf16 %v2978_v31, %v2977_v50  ;;  %vm2040_vm13 = vcmp.gt.f32.partialorder %v2977_v50, 0.0  ;;  %v1882_v52 = vpop.xlane.xlu1 %1881 }
 0x897   : > { %v4545_v53 = vsel %vm2040_vm13, -1e+30, %v4444_v40  ;;  %vm1898_vm14 = vcmp.eq.f32.partialorder %v3937_v4, %v1882_v52  ;;  %v1879_v42 = vpop.xlane.xlu0 %1878  ;;  %v2059_v39 = vsel %vm285_vm3, %v4542_v33, -inf }
 0x898   : > { %v2980_v55 = vsel %vm1898_vm14, 1.0, %v3736_v5  ;;  %vm1897_vm15 = vcmp.eq.f32.partialorder %v3937_v4, %v1879_v42  ;;  %2060 = vmax.xlane.f32.xlu1 %v2059_v39  ;;  %3585 = vmatprep.subr.msk.bf16.mxu0 %vm3983_vm2, %v3583_v51  ;;  %v2056_v45 = vsel %vm285_vm3, %v4545_v53, -inf }
 0x899   : > { %vm2043_vm1 = vcmp.gt.f32.partialorder %v2980_v55, 0.0  ;;  %v2979_v40 = vsel %vm1897_vm15, 1.0, %v3736_v5  ;;  %2057 = vmax.xlane.f32.xlu0 %v2056_v45  ;;  %3588 = vmatpush3.bf16.xpose.msk.msra.mxu0 %vm3983_vm2, %v3583_v51 }
 0x89a   : > { %v4560_v57 = vsel %vm2043_vm1, -1e+30, %v4456_v3  ;;  %v3589_v58 = vpack.c.bf16 %v2980_v55, %v2979_v40  ;;  %vm2042_vm0 = vcmp.gt.f32.partialorder %v2979_v40, 0.0  ;;  %v1888_v8 = vpop.xlane.xlu1 %1887 }
 0x89b   : > { %v4563_v59 = vsel %vm2042_vm0, -1e+30, %v4462_v54  ;;  %vm1900_vm4 = vcmp.eq.f32.partialorder %v3937_v4, %v1888_v8  ;;  %v1885_v60 = vpop.xlane.xlu0 %1884  ;;  %v2065_v61 = vsel %vm285_vm3, %v4560_v57, -inf }
 0x89c   : > { %v2982_v34 = vsel %vm1900_vm4, 1.0, %v3736_v5  ;;  %vm1899_vm5 = vcmp.eq.f32.partialorder %v3937_v4, %v1885_v60  ;;  %2066 = vmax.xlane.f32.xlu1 %v2065_v61  ;;  %3591 = vmatprep.subr.msk.bf16.mxu0 %vm3983_vm2, %v3589_v58  ;;  %v2062_v3 = vsel %vm285_vm3, %v4563_v59, -inf }
 0x89d   : > { %vm2045_vm6 = vcmp.gt.f32.partialorder %v2982_v34, 0.0  ;;  %v2981_v54 = vsel %vm1899_vm5, 1.0, %v3736_v5  ;;  %2063 = vmax.xlane.f32.xlu0 %v2062_v3 }
 0x89e   : > { %v4576_v62 = vsel %vm2045_vm6, -1e+30, %v4472_v38  ;;  %vm2044_vm7 = vcmp.gt.f32.partialorder %v2981_v54, 0.0  ;;  %v1894_v7 = vpop.xlane.xlu1 %1893  ;;  %v3595_v12 = vpack.c.bf16 %v2982_v34, %v2981_v54 }
 0x89f   : > { %v4579_v11 = vsel %vm2044_vm7, -1e+30, %v4478_v49  ;;  %vm1902_vm8 = vcmp.eq.f32.partialorder %v3937_v4, %v1894_v7  ;;  %v1891_v44 = vpop.xlane.xlu0 %1890  ;;  %v2071_v56 = vsel %vm285_vm3, %v4576_v62, -inf }
 0x8a0   : > { %v2984_v27 = vsel %vm1902_vm8, 1.0, %v3736_v5  ;;  %vm1901_vm9 = vcmp.eq.f32.partialorder %v3937_v4, %v1891_v44  ;;  %2072 = vmax.xlane.f32.xlu1 %v2071_v56  ;;  %v2068_v38 = vsel %vm285_vm3, %v4579_v11, -inf }
 0x8a1   : > { %vm2047_vm10 = vcmp.gt.f32.partialorder %v2984_v27, 0.0  ;;  %v2983_v30 = vsel %vm1901_vm9, 1.0, %v3736_v5  ;;  %3594 = vmatpush3.bf16.xpose.msk.msra.mxu0 %vm3983_vm2, %v3589_v58  ;;  %2069 = vmax.xlane.f32.xlu0 %v2068_v38 }
 0x8a2   : > { %v4592_v49 = vsel %vm2047_vm10, -1e+30, %v4490_v17  ;;  %vm2046_vm11 = vcmp.gt.f32.partialorder %v2983_v30, 0.0  ;;  %3597 = vmatprep.subr.msk.bf16.mxu0 %vm3983_vm2, %v3595_v12  ;;  %v3601_v2 = vpack.c.bf16 %v2984_v27, %v2983_v30 }
 0x8a3   : > { %v4597_v15 = vsel %vm2046_vm11, -1e+30, %v4495_v6  ;;  %v2077_v13 = vsel %vm285_vm3, %v4592_v49, -inf }
 0x8a4   : > { %2078 = vmax.xlane.f32.xlu1 %v2077_v13  ;;  %v2074_v20 = vsel %vm285_vm3, %v4597_v15, -inf }
 0x8a5   : > { %2075 = vmax.xlane.f32.xlu0 %v2074_v20 }
 0x8a9   : > { %3600 = vmatpush3.bf16.xpose.msk.msra.mxu0 %vm3983_vm2, %v3595_v12 }
 0x8aa   : > { %3603 = vmatprep.subr.msk.bf16.mxu0 %vm3983_vm2, %v3601_v2 }
 0x8b1   : > { %3606 = vmatpush3.bf16.xpose.msk.msra.mxu0 %vm3983_vm2, %v3601_v2 }
 0x8b8   : > { %3360 = vmatmul.mubr.msk.f32.vlgmr.msra.gmra.mrb[16].mxu0 %vm285_vm3, %v4207_v25 }
 0x8b9   : > { %3362 = vmatprep.mubr.msk.f32.mxu0 %vm285_vm3, %v4197_v21 }
 0x8bc   : > { %3363 = vmatmul.mubr.msk.f32.gmra.mrb[18].mxu0 %vm285_vm3, %v4201_v22 }
 0x8bd   : > { %3403 = vmatprep.mubr.msk.f32.mxu0 %vm285_vm3, %v4199_v63 }
 0x925   : > { %v2061_v17 = vpop.xlane.xlu1 %2060 }
 0x926   : > { %vm2081_vm12 = vcmp.ge.f32.partialorder %v4542_v33, %v2061_v17  ;;  %v2058_v6 = vpop.xlane.xlu0 %2057 }
 0x927   : > { %v2089_v35 = vsel %vm2081_vm12, %v3937_v4, 64.0  ;;  %vm2080_vm13 = vcmp.ge.f32.partialorder %v4545_v53, %v2058_v6 }
 0x928   : > { %v2088_v37 = vsel %vm2080_vm13, %v3937_v4, 64.0  ;;  %v2099_v23 = vsel %vm285_vm3, %v2089_v35, inf }
 0x929   : > { %2100 = vmin.xlane.f32.xlu1 %v2099_v23  ;;  %v2067_v1 = vpop.xlane.xlu1 %2066  ;;  %v2096_v0 = vsel %vm285_vm3, %v2088_v37, inf }
 0x92a   : > { %vm2083_vm14 = vcmp.ge.f32.partialorder %v4560_v57, %v2067_v1  ;;  %2097 = vmin.xlane.f32.xlu0 %v2096_v0  ;;  %v2064_v28 = vpop.xlane.xlu0 %2063 }
 0x92b   : > { %v2091_v29 = vsel %vm2083_vm14, %v3937_v4, 64.0  ;;  %vm2082_vm15 = vcmp.ge.f32.partialorder %v4563_v59, %v2064_v28 }
 0x92c   : > { %v2090_v32 = vsel %vm2082_vm15, %v3937_v4, 64.0  ;;  %v2105_v10 = vsel %vm285_vm3, %v2091_v29, inf }
 0x92d   : > { %2106 = vmin.xlane.f32.xlu1 %v2105_v10  ;;  %v2073_v16 = vpop.xlane.xlu1 %2072  ;;  %v2102_v14 = vsel %vm285_vm3, %v2090_v32, inf }
 0x92e   : > { %vm2085_vm1 = vcmp.ge.f32.partialorder %v4576_v62, %v2073_v16  ;;  %2103 = vmin.xlane.f32.xlu0 %v2102_v14  ;;  %v2070_v41 = vpop.xlane.xlu0 %2069 }
 0x92f   : > { %v2093_v26 = vsel %vm2085_vm1, %v3937_v4, 64.0  ;;  %vm2084_vm0 = vcmp.ge.f32.partialorder %v4579_v11, %v2070_v41 }
 0x930   : > { %v2092_v36 = vsel %vm2084_vm0, %v3937_v4, 64.0  ;;  %v2111_v46 = vsel %vm285_vm3, %v2093_v26, inf }
 0x931   : > { %2112 = vmin.xlane.f32.xlu1 %v2111_v46  ;;  %v2079_v47 = vpop.xlane.xlu1 %2078  ;;  %v2108_v48 = vsel %vm285_vm3, %v2092_v36, inf }
 0x932   : > { %vm2087_vm4 = vcmp.ge.f32.partialorder %v4592_v49, %v2079_v47  ;;  %2109 = vmin.xlane.f32.xlu0 %v2108_v48  ;;  %v2076_v31 = vpop.xlane.xlu0 %2075 }
 0x933   : > { %v2095_v50 = vsel %vm2087_vm4, %v3937_v4, 64.0  ;;  %vm2086_vm5 = vcmp.ge.f32.partialorder %v4597_v15, %v2076_v31 }
 0x934   : > { %v2094_v51 = vsel %vm2086_vm5, %v3937_v4, 64.0  ;;  %v2117_v52 = vsel %vm285_vm3, %v2095_v50, inf }
 0x935   : > { %2118 = vmin.xlane.f32.xlu1 %v2117_v52  ;;  %v2114_v42 = vsel %vm285_vm3, %v2094_v51, inf }
 0x936   : > { %2115 = vmin.xlane.f32.xlu0 %v2114_v42 }
 0x9b6   : > { %v2101_v39 = vpop.xlane.xlu1 %2100 }
 0x9b7   : > { %vm2121_vm6 = vcmp.eq.f32.partialorder %v3937_v4, %v2101_v39  ;;  %v2098_v55 = vpop.xlane.xlu0 %2097 }
 0x9b8   : > { %v2998_v45 = vsel %vm2121_vm6, 1.0, %v3736_v5  ;;  %vm2120_vm7 = vcmp.eq.f32.partialorder %v3937_v4, %v2098_v55 }
 0x9b9   : > { %vm2266_vm8 = vcmp.gt.f32.partialorder %v2998_v45, 0.0  ;;  %v2997_v40 = vsel %vm2120_vm7, 1.0, %v3736_v5 }
 0x9ba   : > { %v4646_v58 = vsel %vm2266_vm8, -1e+30, %v4542_v33  ;;  %v3607_v8 = vpack.c.bf16 %v2998_v45, %v2997_v40  ;;  %vm2265_vm9 = vcmp.gt.f32.partialorder %v2997_v40, 0.0  ;;  %v2107_v60 = vpop.xlane.xlu1 %2106 }
 0x9bb   : > { %v4649_v61 = vsel %vm2265_vm9, -1e+30, %v4545_v53  ;;  %vm2123_vm10 = vcmp.eq.f32.partialorder %v3937_v4, %v2107_v60  ;;  %v2104_v34 = vpop.xlane.xlu0 %2103  ;;  %v2284_v3 = vsel %vm285_vm3, %v4646_v58, -inf }
 0x9bc   : > { %v3000_v54 = vsel %vm2123_vm10, 1.0, %v3736_v5  ;;  %vm2122_vm11 = vcmp.eq.f32.partialorder %v3937_v4, %v2104_v34  ;;  %2285 = vmax.xlane.f32.xlu1 %v2284_v3  ;;  %3609 = vmatprep.subr.msk.bf16.mxu1 %vm3983_vm2, %v3607_v8  ;;  %v2281_v33 = vsel %vm285_vm3, %v4649_v61, -inf }
 0x9bd   : > { %vm2268_vm12 = vcmp.gt.f32.partialorder %v3000_v54, 0.0  ;;  %v2999_v53 = vsel %vm2122_vm11, 1.0, %v3736_v5  ;;  %2282 = vmax.xlane.f32.xlu0 %v2281_v33  ;;  %3612 = vmatpush3.bf16.xpose.msk.msra.mxu1 %vm3983_vm2, %v3607_v8 }
 0x9be   : > { %v4664_v7 = vsel %vm2268_vm12, -1e+30, %v4560_v57  ;;  %v3613_v44 = vpack.c.bf16 %v3000_v54, %v2999_v53  ;;  %vm2267_vm13 = vcmp.gt.f32.partialorder %v2999_v53, 0.0  ;;  %v2113_v56 = vpop.xlane.xlu1 %2112 }
 0x9bf   : > { %v4667_v12 = vsel %vm2267_vm13, -1e+30, %v4563_v59  ;;  %vm2125_vm14 = vcmp.eq.f32.partialorder %v3937_v4, %v2113_v56  ;;  %v2110_v27 = vpop.xlane.xlu0 %2109  ;;  %v2290_v38 = vsel %vm285_vm3, %v4664_v7, -inf }
 0x9c0   : > { %v3002_v30 = vsel %vm2125_vm14, 1.0, %v3736_v5  ;;  %vm2124_vm15 = vcmp.eq.f32.partialorder %v3937_v4, %v2110_v27  ;;  %2291 = vmax.xlane.f32.xlu1 %v2290_v38  ;;  %3615 = vmatprep.subr.msk.bf16.mxu1 %vm3983_vm2, %v3613_v44  ;;  %v2287_v57 = vsel %vm285_vm3, %v4667_v12, -inf }
 0x9c1   : > { %vm2270_vm1 = vcmp.gt.f32.partialorder %v3002_v30, 0.0  ;;  %v3001_v59 = vsel %vm2124_vm15, 1.0, %v3736_v5  ;;  %2288 = vmax.xlane.f32.xlu0 %v2287_v57 }
 0x9c2   : > { %v4680_v13 = vsel %vm2270_vm1, -1e+30, %v4576_v62  ;;  %vm2269_vm0 = vcmp.gt.f32.partialorder %v3001_v59, 0.0  ;;  %v2119_v20 = vpop.xlane.xlu1 %2118  ;;  %v3619_v35 = vpack.c.bf16 %v3002_v30, %v3001_v59 }
 0x9c3   : > { %v4683_v2 = vsel %vm2269_vm0, -1e+30, %v4579_v11  ;;  %vm2127_vm4 = vcmp.eq.f32.partialorder %v3937_v4, %v2119_v20  ;;  %v2116_v17 = vpop.xlane.xlu0 %2115  ;;  %v2296_v6 = vsel %vm285_vm3, %v4680_v13, -inf }
 0x9c4   : > { %v3004_v37 = vsel %vm2127_vm4, 1.0, %v3736_v5  ;;  %vm2126_vm5 = vcmp.eq.f32.partialorder %v3937_v4, %v2116_v17  ;;  %2297 = vmax.xlane.f32.xlu1 %v2296_v6  ;;  %v2293_v62 = vsel %vm285_vm3, %v4683_v2, -inf }
 0x9c5   : > { %vm2272_vm6 = vcmp.gt.f32.partialorder %v3004_v37, 0.0  ;;  %v3003_v23 = vsel %vm2126_vm5, 1.0, %v3736_v5  ;;  %3618 = vmatpush3.bf16.xpose.msk.msra.mxu1 %vm3983_vm2, %v3613_v44  ;;  %2294 = vmax.xlane.f32.xlu0 %v2293_v62 }
 0x9c6   : > { %v4696_v11 = vsel %vm2272_vm6, -1e+30, %v4592_v49  ;;  %vm2271_vm7 = vcmp.gt.f32.partialorder %v3003_v23, 0.0  ;;  %3621 = vmatprep.subr.msk.bf16.mxu1 %vm3983_vm2, %v3619_v35  ;;  %v3625_v29 = vpack.c.bf16 %v3004_v37, %v3003_v23 }
 0x9c7   : > { %v4701_v1 = vsel %vm2271_vm7, -1e+30, %v4597_v15  ;;  %v2302_v0 = vsel %vm285_vm3, %v4696_v11, -inf }
 0x9c8   : > { %2303 = vmax.xlane.f32.xlu1 %v2302_v0  ;;  %v2299_v28 = vsel %vm285_vm3, %v4701_v1, -inf }
 0x9c9   : > { %2300 = vmax.xlane.f32.xlu0 %v2299_v28 }
 0x9cd   : > { %3624 = vmatpush3.bf16.xpose.msk.msra.mxu1 %vm3983_vm2, %v3619_v35 }
 0x9ce   : > { %3627 = vmatprep.subr.msk.bf16.mxu1 %vm3983_vm2, %v3625_v29 }
 0x9d5   : > { %3630 = vmatpush3.bf16.xpose.msk.msra.mxu1 %vm3983_vm2, %v3625_v29 }
 0x9dc   : > { %3382 = vmatmul.mubr.msk.f32.vlgmr.msra.gmra.mrb[20].mxu1 %vm285_vm3, %v4207_v25 }
 0x9dd   : > { %3384 = vmatprep.mubr.msk.f32.mxu1 %vm285_vm3, %v4197_v21 }
 0x9e0   : > { %3385 = vmatmul.mubr.msk.f32.gmra.mrb[22].mxu1 %vm285_vm3, %v4201_v22 }
 0x9e1   : > { %3425 = vmatprep.mubr.msk.f32.mxu1 %vm285_vm3, %v4199_v63 }
 0xa49   : > { %v2286_v49 = vpop.xlane.xlu1 %2285 }
 0xa4a   : > { %vm2306_vm8 = vcmp.ge.f32.partialorder %v4646_v58, %v2286_v49  ;;  %v2283_v15 = vpop.xlane.xlu0 %2282 }
 0xa4b   : > { %v2314_v32 = vsel %vm2306_vm8, %v3937_v4, 64.0  ;;  %vm2305_vm9 = vcmp.ge.f32.partialorder %v4649_v61, %v2283_v15 }
 0xa4c   : > { %v2313_v10 = vsel %vm2305_vm9, %v3937_v4, 64.0  ;;  %v2324_v16 = vsel %vm285_vm3, %v2314_v32, inf }
 0xa4d   : > { %2325 = vmin.xlane.f32.xlu1 %v2324_v16  ;;  %v2292_v14 = vpop.xlane.xlu1 %2291  ;;  %v2321_v41 = vsel %vm285_vm3, %v2313_v10, inf }
 0xa4e   : > { %vm2308_vm10 = vcmp.ge.f32.partialorder %v4664_v7, %v2292_v14  ;;  %2322 = vmin.xlane.f32.xlu0 %v2321_v41  ;;  %v2289_v63 = vpop.xlane.xlu0 %2288 }
 0xa4f   : > { %v2316_v26 = vsel %vm2308_vm10, %v3937_v4, 64.0  ;;  %vm2307_vm11 = vcmp.ge.f32.partialorder %v4667_v12, %v2289_v63 }
 0xa50   : > { %v2315_v36 = vsel %vm2307_vm11, %v3937_v4, 64.0  ;;  %v2330_v46 = vsel %vm285_vm3, %v2316_v26, inf }
 0xa51   : > { %2331 = vmin.xlane.f32.xlu1 %v2330_v46  ;;  %v2298_v47 = vpop.xlane.xlu1 %2297  ;;  %v2327_v48 = vsel %vm285_vm3, %v2315_v36, inf }
 0xa52   : > { %vm2310_vm12 = vcmp.ge.f32.partialorder %v4680_v13, %v2298_v47  ;;  %2328 = vmin.xlane.f32.xlu0 %v2327_v48  ;;  %v2295_v31 = vpop.xlane.xlu0 %2294 }
 0xa53   : > { %v2318_v50 = vsel %vm2310_vm12, %v3937_v4, 64.0  ;;  %vm2309_vm13 = vcmp.ge.f32.partialorder %v4683_v2, %v2295_v31 }
 0xa54   : > { %v2317_v51 = vsel %vm2309_vm13, %v3937_v4, 64.0  ;;  %v2336_v52 = vsel %vm285_vm3, %v2318_v50, inf }
 0xa55   : > { %2337 = vmin.xlane.f32.xlu1 %v2336_v52  ;;  %v2304_v42 = vpop.xlane.xlu1 %2303  ;;  %v2333_v39 = vsel %vm285_vm3, %v2317_v51, inf }
 0xa56   : > { %vm2312_vm14 = vcmp.ge.f32.partialorder %v4696_v11, %v2304_v42  ;;  %2334 = vmin.xlane.f32.xlu0 %v2333_v39  ;;  %v2301_v55 = vpop.xlane.xlu0 %2300 }
 0xa57   : > { %v2320_v45 = vsel %vm2312_vm14, %v3937_v4, 64.0  ;;  %vm2311_vm15 = vcmp.ge.f32.partialorder %v4701_v1, %v2301_v55 }
 0xa58   : > { %v2319_v40 = vsel %vm2311_vm15, %v3937_v4, 64.0  ;;  %v2342_v8 = vsel %vm285_vm3, %v2320_v45, inf }
 0xa59   : > { %2343 = vmin.xlane.f32.xlu1 %v2342_v8  ;;  %v2339_v60 = vsel %vm285_vm3, %v2319_v40, inf }
 0xa5a   : > { %2340 = vmin.xlane.f32.xlu0 %v2339_v60 }
 0xada   : > { %v2326_v34 = vpop.xlane.xlu1 %2325 }
 0xadb   : > { %vm2346_vm1 = vcmp.eq.f32.partialorder %v3937_v4, %v2326_v34  ;;  %v2323_v3 = vpop.xlane.xlu0 %2322 }
 0xadc   : > { %v3018_v54 = vsel %vm2346_vm1, 1.0, %v3736_v5  ;;  %vm2345_vm0 = vcmp.eq.f32.partialorder %v3937_v4, %v2323_v3 }
 0xadd   : > { %vm2491_vm4 = vcmp.gt.f32.partialorder %v3018_v54, 0.0  ;;  %v3017_v33 = vsel %vm2345_vm0, 1.0, %v3736_v5 }
 0xade   : > { %v3631_v53 = vpack.c.bf16 %v3018_v54, %v3017_v33  ;;  %vm2490_vm5 = vcmp.gt.f32.partialorder %v3017_v33, 0.0  ;;  %v2332_v44 = vpop.xlane.xlu1 %2331  ;;  %v4750_v56 = vsel %vm2491_vm4, -1e+30, %v4646_v58 }
 0xadf   : > { %vm2348_vm6 = vcmp.eq.f32.partialorder %v3937_v4, %v2332_v44  ;;  %v2329_v27 = vpop.xlane.xlu0 %2328  ;;  %v2509_v38 = vsel %vm285_vm3, %v4750_v56, -inf  ;;  %v4756_v30 = vsel %vm2490_vm5, -1e+30, %v4649_v61 }
 0xae0   : > { %v3020_v57 = vsel %vm2348_vm6, 1.0, %v3736_v5  ;;  %vm2347_vm7 = vcmp.eq.f32.partialorder %v3937_v4, %v2329_v27  ;;  %2510 = vmax.xlane.f32.xlu1 %v2509_v38  ;;  %3633 = vmatprep.subr.msk.bf16.mxu0 %vm3983_vm2, %v3631_v53  ;;  %v2506_v58 = vsel %vm285_vm3, %v4756_v30, -inf  ;;  %v4824_v27 = vpop.f32.mrb[8].mxu1  ;;  %v4826_v38 = vpop.f32.mrb[8].mxu0 }
 0xae1   : > { %vm2493_vm8 = vcmp.gt.f32.partialorder %v3020_v57, 0.0  ;;  %v3019_v59 = vsel %vm2347_vm7, 1.0, %v3736_v5  ;;  %2507 = vmax.xlane.f32.xlu0 %v2506_v58  ;;  %3636 = vmatpush3.bf16.xpose.msk.msra.mxu0 %vm3983_vm2, %v3631_v53 }
 0xae2   : > { %v3637_v61 = vpack.c.bf16 %v3020_v57, %v3019_v59  ;;  %vm2492_vm9 = vcmp.gt.f32.partialorder %v3019_v59, 0.0  ;;  %v2338_v20 = vpop.xlane.xlu1 %2337  ;;  %v2501_v17 = vsel %vm2493_vm8, -1e+30, %v4664_v7  ;;  %v4830_v57 = vpop.f32.mrb[9].mxu0 }
 0xae3   : > { %vm2350_vm10 = vcmp.eq.f32.partialorder %v3937_v4, %v2338_v20  ;;  %v2335_v6 = vpop.xlane.xlu0 %2334  ;;  %v2515_v35 = vsel %vm285_vm3, %v2501_v17, -inf  ;;  %v2500_v37 = vsel %vm2492_vm9, -1e+30, %v4667_v12  ;;  %v4834_v59 = vpop.f32.mrb[10].mxu0 }
 0xae4   : > { %v3022_v62 = vsel %vm2350_vm10, 1.0, %v3736_v5  ;;  %vm2349_vm11 = vcmp.eq.f32.partialorder %v3937_v4, %v2335_v6  ;;  %2516 = vmax.xlane.f32.xlu1 %v2515_v35  ;;  %3639 = vmatprep.subr.msk.bf16.mxu0 %vm3983_vm2, %v3637_v61  ;;  %v2512_v23 = vsel %vm285_vm3, %v2500_v37, -inf  ;;  %v4838_v20 = vpop.f32.mrb[11].mxu0 }
 0xae5   : > { %vm2495_vm12 = vcmp.gt.f32.partialorder %v3022_v62, 0.0  ;;  %v3021_v7 = vsel %vm2349_vm11, 1.0, %v3736_v5  ;;  %2513 = vmax.xlane.f32.xlu0 %v2512_v23  ;;  %v4842_v6 = vpop.f32.mrb[12].mxu0 }
 0xae6   : > { %vm2494_vm13 = vcmp.gt.f32.partialorder %v3021_v7, 0.0  ;;  %v2344_v0 = vpop.xlane.xlu1 %2343  ;;  %v2503_v28 = vsel %vm2495_vm12, -1e+30, %v4680_v13  ;;  %v3643_v15 = vpack.c.bf16 %v3022_v62, %v3021_v7  ;;  %v664_v7 = vld [vmem:[%s5039_s3 + $0x8] sm:$0xff] }
 0xae7   : > { %vm2352_vm14 = vcmp.eq.f32.partialorder %v3937_v4, %v2344_v0  ;;  %v2341_v12 = vpop.xlane.xlu0 %2340  ;;  %v2521_v29 = vsel %vm285_vm3, %v2503_v28, -inf  ;;  %v2502_v49 = vsel %vm2494_vm13, -1e+30, %v4683_v2 }
 0xae8   : > { %v3024_v32 = vsel %vm2352_vm14, 1.0, %v3736_v5  ;;  %vm2351_vm15 = vcmp.eq.f32.partialorder %v3937_v4, %v2341_v12  ;;  %2522 = vmax.xlane.f32.xlu1 %v2521_v29  ;;  %v2518_v10 = vsel %vm285_vm3, %v2502_v49, -inf }
 0xae9   : > { %vm2497_vm1 = vcmp.gt.f32.partialorder %v3024_v32, 0.0  ;;  %v3023_v16 = vsel %vm2351_vm15, 1.0, %v3736_v5  ;;  %3642 = vmatpush3.bf16.xpose.msk.msra.mxu0 %vm3983_vm2, %v3637_v61  ;;  %2519 = vmax.xlane.f32.xlu0 %v2518_v10 }
 0xaea   : > { %vm2496_vm0 = vcmp.gt.f32.partialorder %v3023_v16, 0.0  ;;  %3645 = vmatprep.subr.msk.bf16.mxu0 %vm3983_vm2, %v3643_v15  ;;  %v2505_v13 = vsel %vm2497_vm1, -1e+30, %v4696_v11  ;;  %v3649_v63 = vpack.c.bf16 %v3024_v32, %v3023_v16  ;;  %v3737_v11 = vmov 0   ;;  %v665_v16 = vld [vmem:[%s5039_s3 + $0x10] sm:$0xff] }
 0xaeb   : > { %v2527_v2 = vsel %vm285_vm3, %v2505_v13, -inf  ;;  %v2504_v14 = vsel %vm2496_vm0, -1e+30, %v4701_v1  ;;  %3691 = vset.pattern.permute.xlu1 %v3737_v11  ;;  %3690 = vset.pattern.permute.xlu0 %v3737_v11 }
 0xaec   : > { %2528 = vmax.xlane.f32.xlu1 %v2527_v2  ;;  %v2524_v41 = vsel %vm285_vm3, %v2504_v14, -inf }
 0xaed   : > { %2525 = vmax.xlane.f32.xlu0 %v2524_v41 }
 0xaf1   : > { %3648 = vmatpush3.bf16.xpose.msk.msra.mxu0 %vm3983_vm2, %v3643_v15 }
 0xaf2   : > { %3651 = vmatprep.subr.msk.bf16.mxu0 %vm3983_vm2, %v3649_v63 }
 0xaf9   : > { %3654 = vmatpush3.bf16.xpose.msk.msra.mxu0 %vm3983_vm2, %v3649_v63  ;;  %v666_v63 = vld [vmem:[%s5039_s3 + $0x18] sm:$0xff] }
 0xafa   : > { %3431 = vmatprep.subr.bf16.mxu0 %v3736_v5 }
 0xb00   : > { %3404 = vmatmul.mubr.msk.f32.vlgmr.msra.gmra.mrb[20].mxu0 %vm285_vm3, %v4207_v25 }
 0xb01   : > { %3406 = vmatprep.mubr.msk.f32.mxu0 %vm285_vm3, %v4197_v21 }
 0xb04   : > { %3407 = vmatmul.mubr.msk.f32.gmra.mrb[22].mxu0 %vm285_vm3, %v4201_v22 }
 0xb6d   : > { %v2511_v1 = vpop.xlane.xlu1 %2510 }
 0xb6e   : > { %vm2531_vm4 = vcmp.ge.f32.partialorder %v4750_v56, %v2511_v1  ;;  %v2508_v26 = vpop.xlane.xlu0 %2507 }
 0xb6f   : > { %v2539_v36 = vsel %vm2531_vm4, %v3937_v4, 64.0  ;;  %vm2530_vm5 = vcmp.ge.f32.partialorder %v4756_v30, %v2508_v26  ;;  %v4828_v30 = vpop.f32.mrb[9].mxu1 }
 0xb70   : > { %v2538_v46 = vsel %vm2530_vm5, %v3937_v4, 64.0  ;;  %v2549_v47 = vsel %vm285_vm3, %v2539_v36, inf  ;;  %v4832_v58 = vpop.f32.mrb[10].mxu1  ;;  %v2720_v36 = vld [vmem:[%s5041_s5] sm:$0xff] }
 0xb71   : > { %2550 = vmin.xlane.f32.xlu1 %v2549_v47  ;;  %v2517_v48 = vpop.xlane.xlu1 %2516  ;;  %v2546_v31 = vsel %vm285_vm3, %v2538_v46, inf  ;;  %v4836_v61 = vpop.f32.mrb[11].mxu1  ;;  %v2721_v46 = vld [vmem:[%s5041_s5 + $0x8] sm:$0xff] }
 0xb72   : > { %vm2533_vm6 = vcmp.ge.f32.partialorder %v2501_v17, %v2517_v48  ;;  %2547 = vmin.xlane.f32.xlu0 %v2546_v31  ;;  %v2514_v50 = vpop.xlane.xlu0 %2513  ;;  %v4840_v17 = vpop.f32.mrb[12].mxu1 }
 0xb73   : > { %v2541_v51 = vsel %vm2533_vm6, %v3937_v4, 64.0  ;;  %vm2532_vm7 = vcmp.ge.f32.partialorder %v2500_v37, %v2514_v50  ;;  %v4844_v35 = vpop.f32.mrb[13].mxu1  ;;  %v4846_v37 = vpop.f32.mrb[13].mxu0  ;;  %vm2732_vm6 = vcmask 261120  }
 0xb74   : > { %v2540_v52 = vsel %vm2532_vm7, %v3937_v4, 64.0  ;;  %v2555_v42 = vsel %vm285_vm3, %v2541_v51, inf  ;;  %v4848_v62 = vpop.f32.mrb[14].mxu1  ;;  %v4850_v23 = vpop.f32.mrb[14].mxu0 }
 0xb75   : > { %2556 = vmin.xlane.f32.xlu1 %v2555_v42  ;;  %v2523_v39 = vpop.xlane.xlu1 %2522  ;;  %v2552_v55 = vsel %vm285_vm3, %v2540_v52, inf  ;;  %v4855_v0 = vpop.f32.mrb[15].mxu1 }
 0xb76   : > { %vm2535_vm8 = vcmp.ge.f32.partialorder %v2503_v28, %v2523_v39  ;;  %2553 = vmin.xlane.f32.xlu0 %v2552_v55  ;;  %v2520_v45 = vpop.xlane.xlu0 %2519  ;;  %v4857_v28 = vpop.f32.mrb[15].mxu0 }
 0xb77   : > { %v2543_v40 = vsel %vm2535_vm8, %v3937_v4, 64.0  ;;  %vm2534_vm9 = vcmp.ge.f32.partialorder %v2502_v49, %v2520_v45  ;;  %v4859_v12 = vpop.f32.mrb[16].mxu1  ;;  %v4861_v29 = vpop.f32.mrb[16].mxu0 }
 0xb78   : > { %v2542_v8 = vsel %vm2534_vm9, %v3937_v4, 64.0  ;;  %v2561_v60 = vsel %vm285_vm3, %v2543_v40, inf  ;;  %v4863_v49 = vpop.f32.mrb[17].mxu1  ;;  %v4865_v15 = vpop.f32.mrb[17].mxu0 }
 0xb79   : > { %2562 = vmin.xlane.f32.xlu1 %v2561_v60  ;;  %v2529_v34 = vpop.xlane.xlu1 %2528  ;;  %v2558_v3 = vsel %vm285_vm3, %v2542_v8, inf  ;;  %v4867_v32 = vpop.f32.mrb[18].mxu1 }
 0xb7a   : > { %vm2537_vm10 = vcmp.ge.f32.partialorder %v2505_v13, %v2529_v34  ;;  %2559 = vmin.xlane.f32.xlu0 %v2558_v3  ;;  %v2526_v54 = vpop.xlane.xlu0 %2525  ;;  %v4869_v10 = vpop.f32.mrb[18].mxu0 }
 0xb7b   : > { %v2545_v33 = vsel %vm2537_vm10, %v3937_v4, 64.0  ;;  %vm2536_vm11 = vcmp.ge.f32.partialorder %v2504_v14, %v2526_v54  ;;  %v4874_v13 = vpop.f32.mrb[19].mxu1  ;;  %v4876_v2 = vpop.f32.mrb[19].mxu0  ;;  %v663_v14 = vld [vmem:[%s5039_s3] sm:$0xff] }
 0xb7c   : > { %v2544_v53 = vsel %vm2536_vm11, %v3937_v4, 64.0  ;;  %v2567_v44 = vsel %vm285_vm3, %v2545_v33, inf  ;;  %v3383_v41 = vpop.f32.mrb[20].mxu1 }
 0xb7d   : > { %2568 = vmin.xlane.f32.xlu1 %v2567_v44  ;;  %v2564_v56 = vsel %vm285_vm3, %v2544_v53, inf  ;;  %v4884_v11 = vpop.f32.mrb[21].mxu1 }
 0xb7e   : > { %2565 = vmin.xlane.f32.xlu0 %v2564_v56  ;;  %v4886_v1 = vpop.f32.mrb[22].mxu1 }
 0xb7f   : > { %v4888_v26 = vpop.f32.mrb[23].mxu1 }
 0xb8e   : > { %674 = vperm.xlu1 %3691, %v664_v7  }
 0xb92   : > { %679 = vperm.xlu1 %3691, %v665_v16  }
 0xb94   : > { %669 = vperm.xlu0 %3690, %v663_v14  }
 0xb96   : > { %684 = vperm.xlu1 %3691, %v666_v63  }
 0xb9a   : > { %2724 = vperm.xlu1 %3691, %v2720_v36  }
 0xb9e   : > { %2729 = vperm.xlu1 %3691, %v2721_v46  }
 0xbd3   : > { %v3405_v47 = vpop.f32.mrb[20].mxu0 }
 0xbd4   : > { %v4896_v48 = vpop.f32.mrb[21].mxu0 }
 0xbd7   : > { %v4898_v31 = vpop.f32.mrb[22].mxu0 }
 0xbd8   : > { %v4900_v50 = vpop.f32.mrb[23].mxu0 }
 0xbfe   : > { %v2551_v51 = vpop.xlane.xlu1 %2550 }
 0xbff   : > { %vm2571_vm12 = vcmp.eq.f32.partialorder %v3937_v4, %v2551_v51  ;;  %v2548_v52 = vpop.xlane.xlu0 %2547 }
 0xc00   : > { %v3038_v42 = vsel %vm2571_vm12, 1.0, %v3736_v5  ;;  %vm2570_vm13 = vcmp.eq.f32.partialorder %v3937_v4, %v2548_v52 }
 0xc01   : > { %v3037_v39 = vsel %vm2570_vm13, 1.0, %v3736_v5 }
 0xc02   : > { %v3655_v55 = vpack.c.bf16 %v3038_v42, %v3037_v39  ;;  %v2557_v45 = vpop.xlane.xlu1 %2556 }
 0xc03   : > { %vm2573_vm14 = vcmp.eq.f32.partialorder %v3937_v4, %v2557_v45  ;;  %v2554_v40 = vpop.xlane.xlu0 %2553 }
 0xc04   : > { %v3040_v8 = vsel %vm2573_vm14, 1.0, %v3736_v5  ;;  %vm2572_vm15 = vcmp.eq.f32.partialorder %v3937_v4, %v2554_v40  ;;  %3657 = vmatprep.subr.msk.bf16.mxu1 %vm3983_vm2, %v3655_v55 }
 0xc05   : > { %v3039_v60 = vsel %vm2572_vm15, 1.0, %v3736_v5  ;;  %3660 = vmatpush3.bf16.xpose.msk.msra.mxu1 %vm3983_vm2, %v3655_v55 }
 0xc06   : > { %v3661_v34 = vpack.c.bf16 %v3040_v8, %v3039_v60  ;;  %v2563_v3 = vpop.xlane.xlu1 %2562 }
 0xc07   : > { %vm2575_vm1 = vcmp.eq.f32.partialorder %v3937_v4, %v2563_v3  ;;  %v2560_v54 = vpop.xlane.xlu0 %2559 }
 0xc08   : > { %vm2574_vm0 = vcmp.eq.f32.partialorder %v3937_v4, %v2560_v54  ;;  %3663 = vmatprep.subr.msk.bf16.mxu1 %vm3983_vm2, %v3661_v34  ;;  %v3042_v33 = vsel %vm2575_vm1, 1.0, %v3736_v5 }
 0xc09   : > { %v3041_v53 = vsel %vm2574_vm0, 1.0, %v3736_v5 }
 0xc0a   : > { %v2569_v44 = vpop.xlane.xlu1 %2568  ;;  %v3667_v7 = vpack.c.bf16 %v3042_v33, %v3041_v53 }
 0xc0b   : > { %v2566_v56 = vpop.xlane.xlu0 %2565  ;;  %vm2577_vm4 = vcmp.eq.f32.partialorder %v3937_v4, %v2569_v44 }
 0xc0c   : > { %vm2576_vm5 = vcmp.eq.f32.partialorder %v3937_v4, %v2566_v56  ;;  %v3044_v63 = vsel %vm2577_vm4, 1.0, %v3736_v5 }
 0xc0d   : > { %3666 = vmatpush3.bf16.xpose.msk.msra.mxu1 %vm3983_vm2, %v3661_v34  ;;  %v3043_v36 = vsel %vm2576_vm5, 1.0, %v3736_v5 }
 0xc0e   : > { %v675_v16 = vpop.permute.xlu1 %674  ;;  %3669 = vmatprep.subr.msk.bf16.mxu1 %vm3983_vm2, %v3667_v7 }
 0xc0f   : > { %v4927_v14 = vadd.f32 %v675_v16, %v4195_v19 }
 0xc11   : > { %v904_v46 = vadd.f32 %v4824_v27, %v4927_v14  ;;  %v1129_v4 = vadd.f32 %v4826_v38, %v4927_v14  ;;  %v1354_v51 = vadd.f32 %v4840_v17, %v4927_v14  ;;  %v1579_v52 = vadd.f32 %v4842_v6, %v4927_v14 }
 0xc12   : > { %v1804_v19 = vadd.f32 %v4859_v12, %v4927_v14  ;;  %v2029_v42 = vadd.f32 %v4861_v29, %v4927_v14  ;;  %v2254_v39 = vadd.f32 %v3383_v41, %v4927_v14  ;;  %v2479_v55 = vadd.f32 %v3405_v47, %v4927_v14  ;;  %v680_v27 = vpop.permute.xlu1 %679 }
 0xc13   : > { %v908_v45 = vmax.f32 %v904_v46, 0.0  ;;  %v670_v40 = vpop.permute.xlu0 %669  ;;  %v3673_v38 = vpack.c.bf16 %v3044_v63, %v3043_v36  ;;  %v1133_v60 = vmax.f32 %v1129_v4, 0.0  ;;  %v4946_v17 = vadd.f32 %v4165_v24, %v680_v27 }
 0xc14   : > { %v1358_v6 = vmax.f32 %v1354_v51, 0.0  ;;  %v4951_v12 = vadd.f32 %v670_v40, %v4167_v43  ;;  %v1583_v53 = vmax.f32 %v1579_v52, 0.0  ;;  %v2033_v56 = vmax.f32 %v2029_v42, 0.0 }
 0xc15   : > { %v912_v8 = vmax.f32 %v908_v45, 0.0  ;;  %3672 = vmatpush3.bf16.xpose.msk.msra.mxu1 %vm3983_vm2, %v3667_v7  ;;  %v905_v41 = vadd.f32 %v4836_v61, %v4946_v17  ;;  %v1130_v47 = vadd.f32 %v4838_v20, %v4946_v17  ;;  %v1355_v24 = vadd.f32 %v4855_v0, %v4946_v17 }
 0xc16   : > { %3675 = vmatprep.subr.msk.bf16.mxu1 %vm3983_vm2, %v3673_v38  ;;  %v1580_v34 = vadd.f32 %v4857_v28, %v4946_v17  ;;  %v1805_v43 = vadd.f32 %v4874_v13, %v4946_v17  ;;  %v2030_v3 = vadd.f32 %v4876_v2, %v4946_v17  ;;  %v2255_v54 = vadd.f32 %v4888_v26, %v4946_v17  ;;  %v685_v33 = vpop.permute.xlu1 %684 }
 0xc17   : > { %v1137_v29 = vmax.f32 %v912_v8, %v1133_v60  ;;  %v909_v44 = vmax.f32 %v905_v41, 0.0  ;;  %v1808_v20 = vmax.f32 %v1804_v19, 0.0  ;;  %v2258_v7 = vmax.f32 %v2254_v39, 0.0 }
 0xc18   : > { %v1134_v0 = vmax.f32 %v1130_v47, 0.0  ;;  %v2480_v28 = vadd.f32 %v4900_v50, %v4946_v17  ;;  %v4972_v13 = vadd.f32 %v4193_v18, %v685_v33  ;;  %v903_v2 = vadd.f32 %v4828_v30, %v4951_v12 }
 0xc19   : > { %v1362_v61 = vmax.f32 %v1137_v29, %v1358_v6  ;;  %v913_v63 = vmax.f32 %v909_v44, 0.0  ;;  %v1128_v26 = vadd.f32 %v4830_v57, %v4951_v12  ;;  %v1353_v36 = vadd.f32 %v4844_v35, %v4951_v12 }
 0xc1a   : > { %v1578_v46 = vadd.f32 %v4846_v37, %v4951_v12  ;;  %v1359_v52 = vmax.f32 %v1355_v24, 0.0  ;;  %v1803_v18 = vadd.f32 %v4863_v49, %v4951_v12  ;;  %v2483_v50 = vmax.f32 %v2479_v55, 0.0 }
 0xc1b   : > { %v1587_v16 = vmax.f32 %v1362_v61, %v1583_v53  ;;  %v1138_v51 = vmax.f32 %v913_v63, %v1134_v0  ;;  %v1584_v30 = vmax.f32 %v1580_v34, 0.0  ;;  %v1809_v19 = vmax.f32 %v1805_v43, 0.0 }
 0xc1c   : > { %v907_v42 = vmax.f32 %v903_v2, 0.0  ;;  %v1132_v27 = vmax.f32 %v1128_v26, 0.0  ;;  %v2028_v35 = vadd.f32 %v4865_v15, %v4951_v12  ;;  %v2253_v45 = vadd.f32 %v4884_v11, %v4951_v12 }
 0xc1d   : > { %v1812_v4 = vmax.f32 %v1587_v16, %v1808_v20  ;;  %3678 = vmatpush3.bf16.xpose.msk.msra.mxu1 %vm3983_vm2, %v3673_v38  ;;  %v1363_v39 = vmax.f32 %v1138_v51, %v1359_v52  ;;  %v2478_v9 = vadd.f32 %v4896_v48, %v4951_v12  ;;  %v906_v49 = vadd.f32 %v4832_v58, %v4972_v13 }
 0xc1e   : > { %v911_v37 = vmax.f32 %v907_v42, 0.0  ;;  %v2034_v38 = vmax.f32 %v2030_v3, 0.0  ;;  %v1131_v8 = vadd.f32 %v4834_v59, %v4972_v13  ;;  %v1357_v6 = vmax.f32 %v1353_v36, 0.0 }
 0xc1f   : > { %v2037_v57 = vmax.f32 %v1812_v4, %v2033_v56  ;;  %v1588_v40 = vmax.f32 %v1363_v39, %v1584_v30  ;;  %v1582_v29 = vmax.f32 %v1578_v46, 0.0  ;;  %v910_v15 = vmax.f32 %v906_v49, 0.0 }
 0xc20   : > { %v1136_v60 = vmax.f32 %v911_v37, %v1132_v27  ;;  %v1135_v24 = vmax.f32 %v1131_v8, 0.0  ;;  %v1356_v11 = vadd.f32 %v4848_v62, %v4972_v13  ;;  %v1581_v34 = vadd.f32 %v4850_v23, %v4972_v13 }
 0xc21   : > { %v2262_v55 = vmax.f32 %v2037_v57, %v2258_v7  ;;  %v1813_v47 = vmax.f32 %v1588_v40, %v1809_v19  ;;  %v914_v48 = vmax.f32 %v910_v15, 0.0  ;;  %v1806_v59 = vadd.f32 %v4867_v32, %v4972_v13 }
 0xc22   : > { %v1361_v58 = vmax.f32 %v1136_v60, %v1357_v6  ;;  %v2259_v3 = vmax.f32 %v2255_v54, 0.0  ;;  %v2031_v33 = vadd.f32 %v4869_v10, %v4972_v13  ;;  %v2256_v62 = vadd.f32 %v4886_v1, %v4972_v13 }
 0xc23   : > { %v2487_v41 = vmax.f32 %v2262_v55, %v2483_v50  ;;  %v2038_v43 = vmax.f32 %v1813_v47, %v2034_v38  ;;  %v1807_v61 = vmax.f32 %v1803_v18, 0.0  ;;  %v1139_v53 = vmax.f32 %v914_v48, %v1135_v24 }
 0xc24   : > { %3426 = vmatmul.mubr.msk.f32.vlgmr.msra.gmra.mrb[24].mxu1 %vm285_vm3, %v4207_v25  ;;  %v1586_v25 = vmax.f32 %v1361_v58, %v1582_v29  ;;  %v1360_v44 = vmax.f32 %v1356_v11, 0.0  ;;  %v2484_v23 = vmax.f32 %v2480_v28, 0.0  ;;  %v2481_v32 = vadd.f32 %v4898_v31, %v4972_v13 }
 0xc25   : > { %3428 = vmatprep.mubr.msk.f32.mxu1 %vm285_vm3, %v4197_v21  ;;  %v2263_v20 = vmax.f32 %v2038_v43, %v2259_v3  ;;  %v2032_v21 = vmax.f32 %v2028_v35, 0.0  ;;  %v1585_v7 = vmax.f32 %v1581_v34, 0.0  ;;  %v2257_v16 = vmax.f32 %v2253_v45, 0.0 }
 0xc26   : > { %v1811_v54 = vmax.f32 %v1586_v25, %v1807_v61  ;;  %v1364_v56 = vmax.f32 %v1139_v53, %v1360_v44  ;;  %v1810_v63 = vmax.f32 %v1806_v59, 0.0  ;;  %v2482_v26 = vmax.f32 %v2478_v9, 0.0 }
 0xc27   : > { %v2488_v10 = vmax.f32 %v2263_v20, %v2484_v23  ;;  %v2035_v46 = vmax.f32 %v2031_v33, 0.0  ;;  %v2260_v51 = vmax.f32 %v2256_v62, 0.0  ;;  %v2485_v52 = vmax.f32 %v2481_v32, 0.0 }
 0xc28   : > { %3429 = vmatmul.mubr.msk.f32.gmra.mrb[26].mxu1 %vm285_vm3, %v4201_v22  ;;  %v2036_v0 = vmax.f32 %v1811_v54, %v2032_v21  ;;  %v1589_v1 = vmax.f32 %v1364_v56, %v1585_v7  ;;  %vm3738_vm2 = vmmov 0  }
 0xc29   : > { %3435 = vmatprep.mubr.msk.bf16.mxu0 %vm3738_vm2, %v3736_v5 }
 0xc2a   : > { %v2261_v2 = vmax.f32 %v2036_v0, %v2257_v16  ;;  %v1814_v36 = vmax.f32 %v1589_v1, %v1810_v63 }
 0xc2c   : > { %v2486_v28 = vmax.f32 %v2261_v2, %v2482_v26  ;;  %v2039_v4 = vmax.f32 %v1814_v36, %v2035_v46 }
 0xc2e   : > { %v2264_v31 = vmax.f32 %v2039_v4, %v2260_v51 }
 0xc30   : > { %v2489_v18 = vmax.f32 %v2264_v31, %v2485_v52 }
 0xcf7   : > { %v3427_v22 = vpop.f32.mrb[24].mxu1 }
 0xcf8   : > { %v2704_v50 = vadd.f32 %v3427_v22, %v4927_v14  ;;  %v2684_v30 = vpop.f32.mrb[25].mxu1  ;;  %v2715_v14 = vld [vmem:[%s5040_s4] sm:$0xff] }
 0xcf9   : > { %v2703_v19 = vadd.f32 %v2684_v30, %v4951_v12  ;;  %v2716_v12 = vld [vmem:[%s5040_s4 + $0x8] sm:$0xff] }
 0xcfa   : > { %v2708_v42 = vmax.f32 %v2704_v50, 0.0  ;;  %v2717_v60 = vpack.c.bf16 %v2716_v12, %v2715_v14 }
 0xcfb   : > { %v2707_v57 = vmax.f32 %v2703_v19, 0.0  ;;  %v3430_v39 = vpop.f32.mrb[26].mxu1 }
 0xcfc   : > { %v2712_v27 = vmax.f32 %v2487_v41, %v2708_v42  ;;  %v2706_v35 = vadd.f32 %v3430_v39, %v4972_v13  ;;  %v2694_v37 = vpop.f32.mrb[27].mxu1 }
 0xcfd   : > { %v2711_v45 = vmax.f32 %v2486_v28, %v2707_v57  ;;  %v2705_v9 = vadd.f32 %v2694_v37, %v4946_v17  ;;  %v2725_v17 = vpop.permute.xlu1 %2724 }
 0xcfe   : > { %v2710_v49 = vmax.f32 %v2706_v35, 0.0 }
 0xcff   : > { %v2718_v55 = vpack.c.bf16 %v2712_v27, %v2711_v45  ;;  %v2709_v40 = vmax.f32 %v2705_v9, 0.0 }
 0xd00   : > { %v2714_v38 = vmax.f32 %v2489_v18, %v2710_v49 }
 0xd01   : > { %v2713_v8 = vmax.f32 %v2488_v10, %v2709_v40  ;;  %3432 = vmatpush3.bf16.msra.mxu0 %v2718_v55  ;;  %v2730_v41 = vpop.permute.xlu1 %2729 }
 0xd02   : > { %3433 = vmatprep.subr.bf16.mxu0 %v3736_v5 }
 0xd03   : > { %v2719_v13 = vpack.c.bf16 %v2714_v38, %v2713_v8 }
 0xd05   : > { %3434 = vmatpush3.bf16.msra.mxu0 %v2719_v13 }
 0xd08   : > { %3436 = vmatmul.mubr.msk.bf16.vlgmr.msra.gmra.mrb[24].mxu0 %vm2732_vm6, %v2717_v60 }
 0xddb   : > { %v2770_v6 = vpop.f32.mrb[24].mxu0 }
 0xddc   : > { %v2771_v29 = vadd.f32 %v2770_v6, %v2725_v17  ;;  %v3437_v15 = vpop.f32.mrb[25].mxu0 }
 0xddd   : > { %v2773_v47 = vpop.f32.mrb[26].mxu0 }
 0xdde   : > { %2777 = vst.msk [vmem:[%s271_s20] sm:$0xff] %vm285_vm3, %v2771_v29  ;;  %v2774_v24 = vadd.f32 %v2773_v47, %v2730_v41  ;;  %v3438_v5 = vpop.f32.mrb[27].mxu0 }
 0xde0   : > { %2778 = vst.msk [vmem:[%s271_s20 + $0x8] sm:$0xff] %vm285_vm3, %v2774_v24 }
 0xde1 PF: > { %s16_s21 = sadd.s32 1, %s3734_s21  }
 0xde2   : > { %p13_p4 = scmp.ge.s32.totalorder %s16_s21, 4  }
 0xde4   :  { %15 = sbr.rel (!%p13_p4) target bundleno = 1 (0x1), region = 77 }

</bundles_post_ra>
